<compile_context>
chip_gen: v5e
topology: v5e:2x2
jax: 0.10.0
libtpu: 0.0.40
codegen_flags: <defaults>
</compile_context>

<pallas_src>
import functools

import jax
import jax.numpy as jnp
from jax import lax
from jax.experimental import pallas as pl
from jax.experimental.pallas import tpu as pltpu

CFG = dict(
    vocab_size=128,
    hidden=32,
    num_layers=6,          # 'rbt6'
    num_heads=4,
    head_dim=8,
    intermediate=64,
    max_position=16,
    type_vocab=2,
    embedding_size=128,    # Roberta(embedding_size=128) default
)

LN_EPS = 1e-12
FIELD = 128                # lane-aligned packing stride for consolidated slabs


# ---------------------------------------------------------------------------
# Shared math helpers (used inside the kernel and in the pure-JAX reference)
# ---------------------------------------------------------------------------
def _layernorm(x, g, b):
    mu = jnp.mean(x, axis=-1, keepdims=True)
    var = jnp.mean(jnp.square(x - mu), axis=-1, keepdims=True)
    return (x - mu) * lax.rsqrt(var + LN_EPS) * g + b


def _gelu_erf(x):  # exact (erf) GELU, as in HF BertIntermediate
    return 0.5 * x * (1.0 + lax.erf(x * (1.0 / jnp.sqrt(jnp.float32(2.0)))))


# ---------------------------------------------------------------------------
# The single fused kernel: grid=(B,) parallel; all layers looped in-body.
# ---------------------------------------------------------------------------
def _roberta_kernel(x_ref, mask_ref, wa_ref, wo2_ref, vec_ref, headw_ref,
                    miscb_ref, out_ref, *, num_layers, num_heads, head_dim,
                    intermediate, embed):
    H = num_heads * head_dim
    I = intermediate
    scale = 1.0 / float(head_dim) ** 0.5

    x = x_ref[0]              # (S, H)  summed embeddings for this batch row
    bias = mask_ref[0]        # (1, S)  additive attention-mask bias

    # Embedding LayerNorm (gamma/beta packed in misc_b fields 2 and 3).
    emb_g = miscb_ref[:, 2 * FIELD:2 * FIELD + H]
    emb_b = miscb_ref[:, 3 * FIELD:3 * FIELD + H]
    h = _layernorm(x, emb_g, emb_b)

    for l in range(num_layers):
        # ---- static, lane-aligned slices of the VMEM-resident slabs --------
        wqkv = wa_ref[l, :, 0:3 * H]                       # (H, 3H)
        wo = wa_ref[l, :, FIELD:FIELD + H]                 # (H, H)
        wi = wa_ref[l, :, 2 * FIELD:2 * FIELD + I]         # (H, I)
        wo2 = wo2_ref[l]                                   # (I, H)
        bqkv = vec_ref[l, :, 0:3 * H]
        bo = vec_ref[l, :, FIELD:FIELD + H]
        ln1g = vec_ref[l, :, 2 * FIELD:2 * FIELD + H]
        ln1b = vec_ref[l, :, 3 * FIELD:3 * FIELD + H]
        bi = vec_ref[l, :, 4 * FIELD:4 * FIELD + I]
        bo2 = vec_ref[l, :, 5 * FIELD:5 * FIELD + H]
        ln2g = vec_ref[l, :, 6 * FIELD:6 * FIELD + H]
        ln2b = vec_ref[l, :, 7 * FIELD:7 * FIELD + H]

        # ---- fused QKV projection: one MXU matmul with 3H output lanes -----
        qkv = jnp.dot(h, wqkv, preferred_element_type=jnp.float32) + bqkv

        # ---- attention: static per-head loop, no concatenates --------------
        # Head contexts are merged by accumulating ctx_h @ wo[rows of head]
        # (8-row sublane-aligned slices) instead of a lane concatenate.
        attn = None
        for hh in range(num_heads):
            c0 = hh * head_dim
            q_h = qkv[:, c0:c0 + head_dim]                 # (S, dH)
            k_h = qkv[:, H + c0:H + c0 + head_dim]
            v_h = qkv[:, 2 * H + c0:2 * H + c0 + head_dim]
            s = lax.dot_general(q_h, k_h, (((1,), (1,)), ((), ())),
                                preferred_element_type=jnp.float32)
            s = s * scale + bias                           # (S, S)
            s = s - jnp.max(s, axis=-1, keepdims=True)
            p = jnp.exp(s)
            p = p * pl.reciprocal(jnp.sum(p, axis=-1, keepdims=True),
                                  approx=True)
            ctx_h = jnp.dot(p, v_h, preferred_element_type=jnp.float32)
            part = jnp.dot(ctx_h, wo[c0:c0 + head_dim, :],
                           preferred_element_type=jnp.float32)
            attn = part if attn is None else attn + part

        # ---- attention output bias + residual + LayerNorm -------------------
        h = _layernorm(h + attn + bo, ln1g, ln1b)

        # ---- feed-forward (exact-erf GELU) + residual + LayerNorm ----------
        ff = _gelu_erf(jnp.dot(h, wi, preferred_element_type=jnp.float32) + bi)
        ff_out = jnp.dot(ff, wo2, preferred_element_type=jnp.float32) + bo2
        h = _layernorm(h + ff_out, ln2g, ln2b)

    # ---- pooler (tanh on [CLS] row) + final fc → lane-dense (1,128) write --
    cls = h[0:1, :]                                        # (1, H)
    pw = headw_ref[:, 0:H]
    fw = headw_ref[:, FIELD:FIELD + embed]
    pb = miscb_ref[:, 0:H]
    fb = miscb_ref[:, FIELD:FIELD + embed]
    pooled = jnp.tanh(jnp.dot(cls, pw, preferred_element_type=jnp.float32) + pb)
    out_ref[0] = (jnp.dot(pooled, fw, preferred_element_type=jnp.float32)
                  + fb).astype(out_ref.dtype)


# ---------------------------------------------------------------------------
# Operand packing: concatenate pieces along the last axis into 128-lane fields
# ---------------------------------------------------------------------------
def _pack_lane_fields(pieces):
    padded = []
    for p in pieces:
        assert p.shape[-1] <= FIELD, "field wider than 128 lanes"
        cfg = [(0, 0)] * (p.ndim - 1) + [(0, FIELD - p.shape[-1])]
        padded.append(jnp.pad(p, cfg))
    return jnp.concatenate(padded, axis=-1)


# ---------------------------------------------------------------------------
# Forward pass wrapper (== Roberta.forward: BERT encoder -> pooler -> fc)
# ---------------------------------------------------------------------------
def roberta_forward(params, input_ids, token_type_ids, attention_mask):
    B, S = input_ids.shape
    H = CFG["hidden"]
    nH, dH = CFG["num_heads"], CFG["head_dim"]
    L = CFG["num_layers"]
    I = CFG["intermediate"]
    E = CFG["embedding_size"]

    # Embedding gathers are XLA glue (tables are tiny); kernel does the rest.
    # BERT-style position ids starting at 0 ('hfl/rbt6' is a BERT arch).
    pos_ids = jnp.arange(S, dtype=jnp.int32)
    x_emb = (jnp.take(params["word_emb"], input_ids, axis=0)
             + jnp.take(params["pos_emb"], pos_ids, axis=0)[None, :, :]
             + jnp.take(params["type_emb"], token_type_ids, axis=0)
             ).astype(jnp.float32)                               # (B, S, H)

    # additive attention-mask bias, (B, 1, S)
    mask_bias = ((1.0 - attention_mask.astype(jnp.float32))
                 * -10000.0)[:, None, :]

    # Consolidated, 128-lane-aligned weight slabs (VMEM-resident, DMA'd once).
    w_a = _pack_lane_fields([params["wqkv"], params["wo"], params["wi"]])
    vec = _pack_lane_fields([params["bqkv"], params["bo"],
                             params["ln1_g"], params["ln1_b"],
                             params["bi"], params["bo2"],
                             params["ln2_g"], params["ln2_b"]])
    head_w = _pack_lane_fields([params["pooler_w"], params["fc_w"]])
    misc_b = _pack_lane_fields([params["pooler_b"], params["fc_b"],
                                params["emb_ln_g"], params["emb_ln_b"]])
    wo2 = params["wo2"]                                          # (L, I, H)

    kernel = functools.partial(
        _roberta_kernel, num_layers=L, num_heads=nH, head_dim=dH,
        intermediate=I, embed=E)

    flops_layer = (2 * S * H * 3 * H + 2 * S * H * H + 4 * S * H * I
                   + 4 * nH * S * S * dH)
    cost = pl.CostEstimate(
        flops=int(B * (L * flops_layer + 2 * H * H + 2 * H * E)),
        transcendentals=int(B * (L * (nH * S * S + S * I) + H)),
        bytes_accessed=int(4 * (B * S * H + B * S + w_a.size + wo2.size
                                + vec.size + head_w.size + misc_b.size
                                + B * E)))

    out = pl.pallas_call(
        kernel,
        out_shape=jax.ShapeDtypeStruct((B, 1, E), jnp.float32),
        grid=(B,),
        in_specs=[
            pl.BlockSpec((1, S, H), lambda b: (b, 0, 0)),        # embeddings
            pl.BlockSpec((1, 1, S), lambda b: (b, 0, 0)),        # mask bias
            pl.BlockSpec((L, H, 3 * FIELD), lambda b: (0, 0, 0)),  # wqkv|wo|wi
            pl.BlockSpec((L, I, H), lambda b: (0, 0, 0)),        # wo2
            pl.BlockSpec((L, 1, 8 * FIELD), lambda b: (0, 0, 0)),  # bias/LN slab
            pl.BlockSpec((H, 2 * FIELD), lambda b: (0, 0)),      # pooler_w|fc_w
            pl.BlockSpec((1, 4 * FIELD), lambda b: (0, 0)),      # pb|fb|emb_ln
        ],
        out_specs=pl.BlockSpec((1, 1, E), lambda b: (b, 0, 0)),
        compiler_params=pltpu.CompilerParams(
            dimension_semantics=("parallel",)),
        cost_estimate=cost,
    )(x_emb, mask_bias, w_a, wo2, vec, head_w, misc_b)

    return out.reshape(B, E)


# ---------------------------------------------------------------------------
# Pure-JAX reference (for correctness check)
# ---------------------------------------------------------------------------
def roberta_reference(params, input_ids, token_type_ids, attention_mask):
    B, S = input_ids.shape
    H, nH, dH = CFG["hidden"], CFG["num_heads"], CFG["head_dim"]
    L = CFG["num_layers"]
    hp = lax.Precision.HIGHEST

    pos_ids = jnp.arange(S, dtype=jnp.int32)
    x = (jnp.take(params["word_emb"], input_ids, axis=0)
         + jnp.take(params["pos_emb"], pos_ids, axis=0)[None, :, :]
         + jnp.take(params["type_emb"], token_type_ids, axis=0))
    h = _layernorm(x.reshape(B * S, H), params["emb_ln_g"], params["emb_ln_b"])

    bias = (1.0 - attention_mask.astype(jnp.float32))[:, None, None, :] * -10000.0
    scale = 1.0 / float(dH) ** 0.5

    for l in range(L):
        qkv = jnp.dot(h, params["wqkv"][l], precision=hp) + params["bqkv"][l]
        q, k, v = jnp.split(qkv, 3, axis=-1)

        def heads(t):
            return t.reshape(B, S, nH, dH).transpose(0, 2, 1, 3)

        q, k, v = heads(q), heads(k), heads(v)
        s = jnp.einsum("bhqd,bhkd->bhqk", q, k, precision=hp) * scale + bias
        p = jax.nn.softmax(s, axis=-1)
        ctx = jnp.einsum("bhqk,bhkd->bhqd", p, v, precision=hp)
        ctx = ctx.transpose(0, 2, 1, 3).reshape(B * S, H)
        attn_out = jnp.dot(ctx, params["wo"][l], precision=hp) + params["bo"][l]
        h = _layernorm(h + attn_out, params["ln1_g"][l], params["ln1_b"][l])

        ff = _gelu_erf(jnp.dot(h, params["wi"][l], precision=hp) + params["bi"][l])
        ff_out = jnp.dot(ff, params["wo2"][l], precision=hp) + params["bo2"][l]
        h = _layernorm(h + ff_out, params["ln2_g"][l], params["ln2_b"][l])

    cls = h.reshape(B, S, H)[:, 0, :]
    pooled = jnp.tanh(jnp.dot(cls, params["pooler_w"], precision=hp)
                      + params["pooler_b"])
    return jnp.dot(pooled, params["fc_w"], precision=hp) + params["fc_b"]


# ---------------------------------------------------------------------------
# Deterministic synthetic parameters (stacked per-layer weights, fused QKV)
# ---------------------------------------------------------------------------
def init_params(key):
    h = CFG["hidden"]
    inter = CFG["intermediate"]
    emb = CFG["embedding_size"]
    L = CFG["num_layers"]

    def nrm(k, shape):
        return 0.02 * jax.random.normal(k, shape, dtype=jnp.float32)

    keys = iter(jax.random.split(key, 7 + 10 * L))
    p = {
        "word_emb": nrm(next(keys), (CFG["vocab_size"], h)),
        "pos_emb": nrm(next(keys), (CFG["max_position"], h)),
        "type_emb": nrm(next(keys), (CFG["type_vocab"], h)),
        "emb_ln_g": jnp.ones((1, h), jnp.float32),
        "emb_ln_b": jnp.zeros((1, h), jnp.float32),
        "pooler_w": nrm(next(keys), (h, h)),
        "pooler_b": nrm(next(keys), (1, h)),
        "fc_w": nrm(next(keys), (h, emb)),
        "fc_b": nrm(next(keys), (1, emb)),
    }

    wqkv, bqkv, wo, bo, wi, bi, wo2, bo2 = ([] for _ in range(8))
    for _ in range(L):
        wq = nrm(next(keys), (h, h))
        wk = nrm(next(keys), (h, h))
        wv = nrm(next(keys), (h, h))
        wqkv.append(jnp.concatenate([wq, wk, wv], axis=1))     # (H, 3H)
        bqkv.append(nrm(next(keys), (1, 3 * h)))
        wo.append(nrm(next(keys), (h, h)))
        bo.append(nrm(next(keys), (1, h)))
        wi.append(nrm(next(keys), (h, inter)))
        bi.append(nrm(next(keys), (1, inter)))
        wo2.append(nrm(next(keys), (inter, h)))
        bo2.append(nrm(next(keys), (1, h)))

    p.update({
        "wqkv": jnp.stack(wqkv), "bqkv": jnp.stack(bqkv),
        "wo": jnp.stack(wo), "bo": jnp.stack(bo),
        "ln1_g": jnp.ones((L, 1, h), jnp.float32),
        "ln1_b": jnp.zeros((L, 1, h), jnp.float32),
        "wi": jnp.stack(wi), "bi": jnp.stack(bi),
        "wo2": jnp.stack(wo2), "bo2": jnp.stack(bo2),
        "ln2_g": jnp.ones((L, 1, h), jnp.float32),
        "ln2_b": jnp.zeros((L, 1, h), jnp.float32),
    })
    return p


# ---------------------------------------------------------------------------
if __name__ == "__main__":
    key = jax.random.PRNGKey(0)
    k_param, k_ids = jax.random.split(key)

    params = init_params(k_param)

    B, S = 2, 8
    input_ids = jax.random.randint(k_ids, (B, S), 0, CFG["vocab_size"],
                                   dtype=jnp.int32)
    token_type_ids = jnp.zeros((B, S), dtype=jnp.int32)
    attention_mask = jnp.array(
        [[1, 1, 1, 1, 1, 1, 1, 1],
         [1, 1, 1, 1, 1, 0, 0, 0]], dtype=jnp.int32)

    out = jax.jit(roberta_forward)(params, input_ids, token_type_ids,
                                   attention_mask)
    out = jax.block_until_ready(out)
    assert out.shape == (B, CFG["embedding_size"])
    assert out.dtype == jnp.float32
    assert bool(jnp.all(jnp.isfinite(out)))

    ref = jax.block_until_ready(
        jax.jit(roberta_reference)(params, input_ids, token_type_ids,
                                   attention_mask))
    assert bool(jnp.allclose(out, ref, atol=1e-3, rtol=1e-2)), (
        "mismatch vs reference, max abs diff = "
        f"{float(jnp.max(jnp.abs(out - ref)))}")

    print("KERNEL_OK")
</pallas_src>

<mosaic_0001>
module attributes {stable_mosaic.version = 11 : i64} {
  func.func @_roberta_kernel(%arg0: i32, %arg1: memref<1x8x32xf32, #tpu.memory_space<vmem>>, %arg2: memref<1x1x8xf32, #tpu.memory_space<vmem>>, %arg3: memref<6x32x384xf32, #tpu.memory_space<vmem>>, %arg4: memref<6x64x32xf32, #tpu.memory_space<vmem>>, %arg5: memref<6x1x1024xf32, #tpu.memory_space<vmem>>, %arg6: memref<32x256xf32, #tpu.memory_space<vmem>>, %arg7: memref<1x512xf32, #tpu.memory_space<vmem>>, %arg8: memref<1x1x128xf32, #tpu.memory_space<vmem>>) attributes {dimension_semantics = [#tpu.dimension_semantics<parallel>], iteration_bounds = array<i64: 2>, scalar_prefetch = 0 : i64, scratch_operands = 0 : i64, tpu.core_type = #tpu.core_type<tc>, window_params = [{transform_indices = @transform_0, window_bounds = array<i64: 1, 8, 32>}, {transform_indices = @transform_1, window_bounds = array<i64: 1, 1, 8>}, {pipeline_mode = #tpu.pipeline_mode<synchronous>, transform_indices = @transform_2, window_bounds = array<i64: 6, 32, 384>}, {pipeline_mode = #tpu.pipeline_mode<synchronous>, transform_indices = @transform_3, window_bounds = array<i64: 6, 64, 32>}, {pipeline_mode = #tpu.pipeline_mode<synchronous>, transform_indices = @transform_4, window_bounds = array<i64: 6, 1, 1024>}, {pipeline_mode = #tpu.pipeline_mode<synchronous>, transform_indices = @transform_5, window_bounds = array<i64: 32, 256>}, {pipeline_mode = #tpu.pipeline_mode<synchronous>, transform_indices = @transform_6, window_bounds = array<i64: 1, 512>}, {transform_indices = @transform_7, window_bounds = array<i64: 1, 1, 128>}]} {
    %c0 = arith.constant 0 : index
    %c0_0 = arith.constant 0 : index
    %c0_1 = arith.constant 0 : index
    %0 = vector.load %arg1[%c0, %c0_0, %c0_1] : memref<1x8x32xf32, #tpu.memory_space<vmem>>, vector<1x8x32xf32>
    %1 = vector.shape_cast %0 : vector<1x8x32xf32> to vector<8x32xf32>
    %c0_2 = arith.constant 0 : index
    %c0_3 = arith.constant 0 : index
    %c0_4 = arith.constant 0 : index
    %2 = vector.load %arg2[%c0_2, %c0_3, %c0_4] : memref<1x1x8xf32, #tpu.memory_space<vmem>>, vector<1x1x8xf32>
    %3 = vector.shape_cast %2 : vector<1x1x8xf32> to vector<1x8xf32>
    %c0_5 = arith.constant 0 : index
    %c256 = arith.constant 256 : index
    %4 = vector.load %arg7[%c0_5, %c256] : memref<1x512xf32, #tpu.memory_space<vmem>>, vector<1x32xf32>
    %c0_6 = arith.constant 0 : index
    %c384 = arith.constant 384 : index
    %5 = vector.load %arg7[%c0_6, %c384] : memref<1x512xf32, #tpu.memory_space<vmem>>, vector<1x32xf32>
    %cst = arith.constant dense<0.000000e+00> : vector<8xf32>
    %6 = vector.multi_reduction <add>, %1, %cst [1] : vector<8x32xf32> to vector<8xf32>
    %7 = vector.shape_cast %6 : vector<8xf32> to vector<8x1xf32>
    %cst_7 = arith.constant 3.200000e+01 : f32
    %8 = vector.broadcast %cst_7 : f32 to vector<8x1xf32>
    %9 = arith.divf %7, %8 : vector<8x1xf32>
    %10 = vector.broadcast %9 : vector<8x1xf32> to vector<8x32xf32>
    %11 = arith.subf %1, %10 : vector<8x32xf32>
    %12 = arith.mulf %11, %11 : vector<8x32xf32>
    %cst_8 = arith.constant dense<0.000000e+00> : vector<8xf32>
    %13 = vector.multi_reduction <add>, %12, %cst_8 [1] : vector<8x32xf32> to vector<8xf32>
    %14 = vector.shape_cast %13 : vector<8xf32> to vector<8x1xf32>
    %cst_9 = arith.constant 3.200000e+01 : f32
    %15 = vector.broadcast %cst_9 : f32 to vector<8x1xf32>
    %16 = arith.divf %14, %15 : vector<8x1xf32>
    %17 = vector.broadcast %9 : vector<8x1xf32> to vector<8x32xf32>
    %18 = arith.subf %1, %17 : vector<8x32xf32>
    %cst_10 = arith.constant 9.99999996E-13 : f32
    %19 = vector.broadcast %cst_10 : f32 to vector<8x1xf32>
    %20 = arith.addf %16, %19 : vector<8x1xf32>
    %21 = math.rsqrt %20 : vector<8x1xf32>
    %22 = vector.broadcast %21 : vector<8x1xf32> to vector<8x32xf32>
    %23 = arith.mulf %18, %22 : vector<8x32xf32>
    %24 = vector.broadcast %4 : vector<1x32xf32> to vector<8x32xf32>
    %25 = arith.mulf %23, %24 : vector<8x32xf32>
    %26 = vector.broadcast %5 : vector<1x32xf32> to vector<8x32xf32>
    %27 = arith.addf %25, %26 : vector<8x32xf32>
    %c0_11 = arith.constant 0 : index
    %c0_12 = arith.constant 0 : index
    %c0_13 = arith.constant 0 : index
    %28 = vector.load %arg3[%c0_11, %c0_12, %c0_13] : memref<6x32x384xf32, #tpu.memory_space<vmem>>, vector<1x32x96xf32>
    %29 = vector.shape_cast %28 : vector<1x32x96xf32> to vector<32x96xf32>
    %c0_14 = arith.constant 0 : index
    %c0_15 = arith.constant 0 : index
    %c128 = arith.constant 128 : index
    %30 = vector.load %arg3[%c0_14, %c0_15, %c128] : memref<6x32x384xf32, #tpu.memory_space<vmem>>, vector<1x32x32xf32>
    %31 = vector.shape_cast %30 : vector<1x32x32xf32> to vector<32x32xf32>
    %c0_16 = arith.constant 0 : index
    %c0_17 = arith.constant 0 : index
    %c256_18 = arith.constant 256 : index
    %32 = vector.load %arg3[%c0_16, %c0_17, %c256_18] : memref<6x32x384xf32, #tpu.memory_space<vmem>>, vector<1x32x64xf32>
    %33 = vector.shape_cast %32 : vector<1x32x64xf32> to vector<32x64xf32>
    %c0_19 = arith.constant 0 : index
    %c0_20 = arith.constant 0 : index
    %c0_21 = arith.constant 0 : index
    %34 = vector.load %arg4[%c0_19, %c0_20, %c0_21] : memref<6x64x32xf32, #tpu.memory_space<vmem>>, vector<1x64x32xf32>
    %35 = vector.shape_cast %34 : vector<1x64x32xf32> to vector<64x32xf32>
    %c0_22 = arith.constant 0 : index
    %c0_23 = arith.constant 0 : index
    %c0_24 = arith.constant 0 : index
    %36 = vector.load %arg5[%c0_22, %c0_23, %c0_24] : memref<6x1x1024xf32, #tpu.memory_space<vmem>>, vector<1x1x96xf32>
    %37 = vector.shape_cast %36 : vector<1x1x96xf32> to vector<1x96xf32>
    %c0_25 = arith.constant 0 : index
    %c0_26 = arith.constant 0 : index
    %c128_27 = arith.constant 128 : index
    %38 = vector.load %arg5[%c0_25, %c0_26, %c128_27] : memref<6x1x1024xf32, #tpu.memory_space<vmem>>, vector<1x1x32xf32>
    %39 = vector.shape_cast %38 : vector<1x1x32xf32> to vector<1x32xf32>
    %c0_28 = arith.constant 0 : index
    %c0_29 = arith.constant 0 : index
    %c256_30 = arith.constant 256 : index
    %40 = vector.load %arg5[%c0_28, %c0_29, %c256_30] : memref<6x1x1024xf32, #tpu.memory_space<vmem>>, vector<1x1x32xf32>
    %41 = vector.shape_cast %40 : vector<1x1x32xf32> to vector<1x32xf32>
    %c0_31 = arith.constant 0 : index
    %c0_32 = arith.constant 0 : index
    %c384_33 = arith.constant 384 : index
    %42 = vector.load %arg5[%c0_31, %c0_32, %c384_33] : memref<6x1x1024xf32, #tpu.memory_space<vmem>>, vector<1x1x32xf32>
    %43 = vector.shape_cast %42 : vector<1x1x32xf32> to vector<1x32xf32>
    %c0_34 = arith.constant 0 : index
    %c0_35 = arith.constant 0 : index
    %c512 = arith.constant 512 : index
    %44 = vector.load %arg5[%c0_34, %c0_35, %c512] : memref<6x1x1024xf32, #tpu.memory_space<vmem>>, vector<1x1x64xf32>
    %45 = vector.shape_cast %44 : vector<1x1x64xf32> to vector<1x64xf32>
    %c0_36 = arith.constant 0 : index
    %c0_37 = arith.constant 0 : index
    %c640 = arith.constant 640 : index
    %46 = vector.load %arg5[%c0_36, %c0_37, %c640] : memref<6x1x1024xf32, #tpu.memory_space<vmem>>, vector<1x1x32xf32>
    %47 = vector.shape_cast %46 : vector<1x1x32xf32> to vector<1x32xf32>
    %c0_38 = arith.constant 0 : index
    %c0_39 = arith.constant 0 : index
    %c768 = arith.constant 768 : index
    %48 = vector.load %arg5[%c0_38, %c0_39, %c768] : memref<6x1x1024xf32, #tpu.memory_space<vmem>>, vector<1x1x32xf32>
    %49 = vector.shape_cast %48 : vector<1x1x32xf32> to vector<1x32xf32>
    %c0_40 = arith.constant 0 : index
    %c0_41 = arith.constant 0 : index
    %c896 = arith.constant 896 : index
    %50 = vector.load %arg5[%c0_40, %c0_41, %c896] : memref<6x1x1024xf32, #tpu.memory_space<vmem>>, vector<1x1x32xf32>
    %51 = vector.shape_cast %50 : vector<1x1x32xf32> to vector<1x32xf32>
    %cst_42 = arith.constant dense<0.000000e+00> : vector<8x96xf32>
    %52 = tpu.matmul %27, %29, %cst_42 {dimension_numbers = #tpu.dot_dimension_numbers<[1], [0], [0], [1], [0, 0, 1, 1], [], []>} : vector<8x32xf32>, vector<32x96xf32>, vector<8x96xf32> -> vector<8x96xf32>
    %53 = vector.broadcast %37 : vector<1x96xf32> to vector<8x96xf32>
    %54 = arith.addf %52, %53 : vector<8x96xf32>
    %55 = vector.extract_strided_slice %54 {offsets = [0, 0], sizes = [8, 8], strides = [1, 1]} : vector<8x96xf32> to vector<8x8xf32>
    %56 = vector.extract_strided_slice %54 {offsets = [0, 32], sizes = [8, 8], strides = [1, 1]} : vector<8x96xf32> to vector<8x8xf32>
    %57 = vector.extract_strided_slice %54 {offsets = [0, 64], sizes = [8, 8], strides = [1, 1]} : vector<8x96xf32> to vector<8x8xf32>
    %cst_43 = arith.constant dense<0.000000e+00> : vector<8x8xf32>
    %58 = tpu.matmul %55, %56, %cst_43 {dimension_numbers = #tpu.dot_dimension_numbers<[1], [1], [0], [0], [0, 0, 1, 0], [], []>} : vector<8x8xf32>, vector<8x8xf32>, vector<8x8xf32> -> vector<8x8xf32>
    %cst_44 = arith.constant 0.353553385 : f32
    %59 = vector.broadcast %cst_44 : f32 to vector<8x8xf32>
    %60 = arith.mulf %58, %59 : vector<8x8xf32>
    %61 = vector.broadcast %3 : vector<1x8xf32> to vector<8x8xf32>
    %62 = arith.addf %60, %61 : vector<8x8xf32>
    %cst_45 = arith.constant dense<0xFF800000> : vector<8xf32>
    %63 = vector.multi_reduction <maximumf>, %62, %cst_45 [1] : vector<8x8xf32> to vector<8xf32>
    %64 = vector.shape_cast %63 : vector<8xf32> to vector<8x1xf32>
    %65 = vector.broadcast %64 : vector<8x1xf32> to vector<8x8xf32>
    %66 = arith.subf %62, %65 : vector<8x8xf32>
    %67 = math.exp %66 : vector<8x8xf32>
    %cst_46 = arith.constant dense<0.000000e+00> : vector<8xf32>
    %68 = vector.multi_reduction <add>, %67, %cst_46 [1] : vector<8x8xf32> to vector<8xf32>
    %69 = vector.shape_cast %68 : vector<8xf32> to vector<8x1xf32>
    %70 = tpu.reciprocal %69 {approx = true} : vector<8x1xf32> -> vector<8x1xf32>
    %71 = vector.broadcast %70 : vector<8x1xf32> to vector<8x8xf32>
    %72 = arith.mulf %67, %71 : vector<8x8xf32>
    %cst_47 = arith.constant dense<0.000000e+00> : vector<8x8xf32>
    %73 = tpu.matmul %72, %57, %cst_47 {dimension_numbers = #tpu.dot_dimension_numbers<[1], [0], [0], [1], [0, 0, 1, 1], [], []>} : vector<8x8xf32>, vector<8x8xf32>, vector<8x8xf32> -> vector<8x8xf32>
    %74 = vector.extract_strided_slice %31 {offsets = [0, 0], sizes = [8, 32], strides = [1, 1]} : vector<32x32xf32> to vector<8x32xf32>
    %cst_48 = arith.constant dense<0.000000e+00> : vector<8x32xf32>
    %75 = tpu.matmul %73, %74, %cst_48 {dimension_numbers = #tpu.dot_dimension_numbers<[1], [0], [0], [1], [0, 0, 1, 1], [], []>} : vector<8x8xf32>, vector<8x32xf32>, vector<8x32xf32> -> vector<8x32xf32>
    %76 = vector.extract_strided_slice %54 {offsets = [0, 8], sizes = [8, 8], strides = [1, 1]} : vector<8x96xf32> to vector<8x8xf32>
    %77 = vector.extract_strided_slice %54 {offsets = [0, 40], sizes = [8, 8], strides = [1, 1]} : vector<8x96xf32> to vector<8x8xf32>
    %78 = vector.extract_strided_slice %54 {offsets = [0, 72], sizes = [8, 8], strides = [1, 1]} : vector<8x96xf32> to vector<8x8xf32>
    %cst_49 = arith.constant dense<0.000000e+00> : vector<8x8xf32>
    %79 = tpu.matmul %76, %77, %cst_49 {dimension_numbers = #tpu.dot_dimension_numbers<[1], [1], [0], [0], [0, 0, 1, 0], [], []>} : vector<8x8xf32>, vector<8x8xf32>, vector<8x8xf32> -> vector<8x8xf32>
    %cst_50 = arith.constant 0.353553385 : f32
    %80 = vector.broadcast %cst_50 : f32 to vector<8x8xf32>
    %81 = arith.mulf %79, %80 : vector<8x8xf32>
    %82 = vector.broadcast %3 : vector<1x8xf32> to vector<8x8xf32>
    %83 = arith.addf %81, %82 : vector<8x8xf32>
    %cst_51 = arith.constant dense<0xFF800000> : vector<8xf32>
    %84 = vector.multi_reduction <maximumf>, %83, %cst_51 [1] : vector<8x8xf32> to vector<8xf32>
    %85 = vector.shape_cast %84 : vector<8xf32> to vector<8x1xf32>
    %86 = vector.broadcast %85 : vector<8x1xf32> to vector<8x8xf32>
    %87 = arith.subf %83, %86 : vector<8x8xf32>
    %88 = math.exp %87 : vector<8x8xf32>
    %cst_52 = arith.constant dense<0.000000e+00> : vector<8xf32>
    %89 = vector.multi_reduction <add>, %88, %cst_52 [1] : vector<8x8xf32> to vector<8xf32>
    %90 = vector.shape_cast %89 : vector<8xf32> to vector<8x1xf32>
    %91 = tpu.reciprocal %90 {approx = true} : vector<8x1xf32> -> vector<8x1xf32>
    %92 = vector.broadcast %91 : vector<8x1xf32> to vector<8x8xf32>
    %93 = arith.mulf %88, %92 : vector<8x8xf32>
    %cst_53 = arith.constant dense<0.000000e+00> : vector<8x8xf32>
    %94 = tpu.matmul %93, %78, %cst_53 {dimension_numbers = #tpu.dot_dimension_numbers<[1], [0], [0], [1], [0, 0, 1, 1], [], []>} : vector<8x8xf32>, vector<8x8xf32>, vector<8x8xf32> -> vector<8x8xf32>
    %95 = vector.extract_strided_slice %31 {offsets = [8, 0], sizes = [8, 32], strides = [1, 1]} : vector<32x32xf32> to vector<8x32xf32>
    %cst_54 = arith.constant dense<0.000000e+00> : vector<8x32xf32>
    %96 = tpu.matmul %94, %95, %cst_54 {dimension_numbers = #tpu.dot_dimension_numbers<[1], [0], [0], [1], [0, 0, 1, 1], [], []>} : vector<8x8xf32>, vector<8x32xf32>, vector<8x32xf32> -> vector<8x32xf32>
    %97 = arith.addf %75, %96 : vector<8x32xf32>
    %98 = vector.extract_strided_slice %54 {offsets = [0, 16], sizes = [8, 8], strides = [1, 1]} : vector<8x96xf32> to vector<8x8xf32>
    %99 = vector.extract_strided_slice %54 {offsets = [0, 48], sizes = [8, 8], strides = [1, 1]} : vector<8x96xf32> to vector<8x8xf32>
    %100 = vector.extract_strided_slice %54 {offsets = [0, 80], sizes = [8, 8], strides = [1, 1]} : vector<8x96xf32> to vector<8x8xf32>
    %cst_55 = arith.constant dense<0.000000e+00> : vector<8x8xf32>
    %101 = tpu.matmul %98, %99, %cst_55 {dimension_numbers = #tpu.dot_dimension_numbers<[1], [1], [0], [0], [0, 0, 1, 0], [], []>} : vector<8x8xf32>, vector<8x8xf32>, vector<8x8xf32> -> vector<8x8xf32>
    %cst_56 = arith.constant 0.353553385 : f32
    %102 = vector.broadcast %cst_56 : f32 to vector<8x8xf32>
    %103 = arith.mulf %101, %102 : vector<8x8xf32>
    %104 = vector.broadcast %3 : vector<1x8xf32> to vector<8x8xf32>
    %105 = arith.addf %103, %104 : vector<8x8xf32>
    %cst_57 = arith.constant dense<0xFF800000> : vector<8xf32>
    %106 = vector.multi_reduction <maximumf>, %105, %cst_57 [1] : vector<8x8xf32> to vector<8xf32>
    %107 = vector.shape_cast %106 : vector<8xf32> to vector<8x1xf32>
    %108 = vector.broadcast %107 : vector<8x1xf32> to vector<8x8xf32>
    %109 = arith.subf %105, %108 : vector<8x8xf32>
    %110 = math.exp %109 : vector<8x8xf32>
    %cst_58 = arith.constant dense<0.000000e+00> : vector<8xf32>
    %111 = vector.multi_reduction <add>, %110, %cst_58 [1] : vector<8x8xf32> to vector<8xf32>
    %112 = vector.shape_cast %111 : vector<8xf32> to vector<8x1xf32>
    %113 = tpu.reciprocal %112 {approx = true} : vector<8x1xf32> -> vector<8x1xf32>
    %114 = vector.broadcast %113 : vector<8x1xf32> to vector<8x8xf32>
    %115 = arith.mulf %110, %114 : vector<8x8xf32>
    %cst_59 = arith.constant dense<0.000000e+00> : vector<8x8xf32>
    %116 = tpu.matmul %115, %100, %cst_59 {dimension_numbers = #tpu.dot_dimension_numbers<[1], [0], [0], [1], [0, 0, 1, 1], [], []>} : vector<8x8xf32>, vector<8x8xf32>, vector<8x8xf32> -> vector<8x8xf32>
    %117 = vector.extract_strided_slice %31 {offsets = [16, 0], sizes = [8, 32], strides = [1, 1]} : vector<32x32xf32> to vector<8x32xf32>
    %cst_60 = arith.constant dense<0.000000e+00> : vector<8x32xf32>
    %118 = tpu.matmul %116, %117, %cst_60 {dimension_numbers = #tpu.dot_dimension_numbers<[1], [0], [0], [1], [0, 0, 1, 1], [], []>} : vector<8x8xf32>, vector<8x32xf32>, vector<8x32xf32> -> vector<8x32xf32>
    %119 = arith.addf %97, %118 : vector<8x32xf32>
    %120 = vector.extract_strided_slice %54 {offsets = [0, 24], sizes = [8, 8], strides = [1, 1]} : vector<8x96xf32> to vector<8x8xf32>
    %121 = vector.extract_strided_slice %54 {offsets = [0, 56], sizes = [8, 8], strides = [1, 1]} : vector<8x96xf32> to vector<8x8xf32>
    %122 = vector.extract_strided_slice %54 {offsets = [0, 88], sizes = [8, 8], strides = [1, 1]} : vector<8x96xf32> to vector<8x8xf32>
    %cst_61 = arith.constant dense<0.000000e+00> : vector<8x8xf32>
    %123 = tpu.matmul %120, %121, %cst_61 {dimension_numbers = #tpu.dot_dimension_numbers<[1], [1], [0], [0], [0, 0, 1, 0], [], []>} : vector<8x8xf32>, vector<8x8xf32>, vector<8x8xf32> -> vector<8x8xf32>
    %cst_62 = arith.constant 0.353553385 : f32
    %124 = vector.broadcast %cst_62 : f32 to vector<8x8xf32>
    %125 = arith.mulf %123, %124 : vector<8x8xf32>
    %126 = vector.broadcast %3 : vector<1x8xf32> to vector<8x8xf32>
    %127 = arith.addf %125, %126 : vector<8x8xf32>
    %cst_63 = arith.constant dense<0xFF800000> : vector<8xf32>
    %128 = vector.multi_reduction <maximumf>, %127, %cst_63 [1] : vector<8x8xf32> to vector<8xf32>
    %129 = vector.shape_cast %128 : vector<8xf32> to vector<8x1xf32>
    %130 = vector.broadcast %129 : vector<8x1xf32> to vector<8x8xf32>
    %131 = arith.subf %127, %130 : vector<8x8xf32>
    %132 = math.exp %131 : vector<8x8xf32>
    %cst_64 = arith.constant dense<0.000000e+00> : vector<8xf32>
    %133 = vector.multi_reduction <add>, %132, %cst_64 [1] : vector<8x8xf32> to vector<8xf32>
    %134 = vector.shape_cast %133 : vector<8xf32> to vector<8x1xf32>
    %135 = tpu.reciprocal %134 {approx = true} : vector<8x1xf32> -> vector<8x1xf32>
    %136 = vector.broadcast %135 : vector<8x1xf32> to vector<8x8xf32>
    %137 = arith.mulf %132, %136 : vector<8x8xf32>
    %cst_65 = arith.constant dense<0.000000e+00> : vector<8x8xf32>
    %138 = tpu.matmul %137, %122, %cst_65 {dimension_numbers = #tpu.dot_dimension_numbers<[1], [0], [0], [1], [0, 0, 1, 1], [], []>} : vector<8x8xf32>, vector<8x8xf32>, vector<8x8xf32> -> vector<8x8xf32>
    %139 = vector.extract_strided_slice %31 {offsets = [24, 0], sizes = [8, 32], strides = [1, 1]} : vector<32x32xf32> to vector<8x32xf32>
    %cst_66 = arith.constant dense<0.000000e+00> : vector<8x32xf32>
    %140 = tpu.matmul %138, %139, %cst_66 {dimension_numbers = #tpu.dot_dimension_numbers<[1], [0], [0], [1], [0, 0, 1, 1], [], []>} : vector<8x8xf32>, vector<8x32xf32>, vector<8x32xf32> -> vector<8x32xf32>
    %141 = arith.addf %119, %140 : vector<8x32xf32>
    %142 = arith.addf %27, %141 : vector<8x32xf32>
    %143 = vector.broadcast %39 : vector<1x32xf32> to vector<8x32xf32>
    %144 = arith.addf %142, %143 : vector<8x32xf32>
    %cst_67 = arith.constant dense<0.000000e+00> : vector<8xf32>
    %145 = vector.multi_reduction <add>, %144, %cst_67 [1] : vector<8x32xf32> to vector<8xf32>
    %146 = vector.shape_cast %145 : vector<8xf32> to vector<8x1xf32>
    %cst_68 = arith.constant 3.200000e+01 : f32
    %147 = vector.broadcast %cst_68 : f32 to vector<8x1xf32>
    %148 = arith.divf %146, %147 : vector<8x1xf32>
    %149 = vector.broadcast %148 : vector<8x1xf32> to vector<8x32xf32>
    %150 = arith.subf %144, %149 : vector<8x32xf32>
    %151 = arith.mulf %150, %150 : vector<8x32xf32>
    %cst_69 = arith.constant dense<0.000000e+00> : vector<8xf32>
    %152 = vector.multi_reduction <add>, %151, %cst_69 [1] : vector<8x32xf32> to vector<8xf32>
    %153 = vector.shape_cast %152 : vector<8xf32> to vector<8x1xf32>
    %cst_70 = arith.constant 3.200000e+01 : f32
    %154 = vector.broadcast %cst_70 : f32 to vector<8x1xf32>
    %155 = arith.divf %153, %154 : vector<8x1xf32>
    %156 = vector.broadcast %148 : vector<8x1xf32> to vector<8x32xf32>
    %157 = arith.subf %144, %156 : vector<8x32xf32>
    %cst_71 = arith.constant 9.99999996E-13 : f32
    %158 = vector.broadcast %cst_71 : f32 to vector<8x1xf32>
    %159 = arith.addf %155, %158 : vector<8x1xf32>
    %160 = math.rsqrt %159 : vector<8x1xf32>
    %161 = vector.broadcast %160 : vector<8x1xf32> to vector<8x32xf32>
    %162 = arith.mulf %157, %161 : vector<8x32xf32>
    %163 = vector.broadcast %41 : vector<1x32xf32> to vector<8x32xf32>
    %164 = arith.mulf %162, %163 : vector<8x32xf32>
    %165 = vector.broadcast %43 : vector<1x32xf32> to vector<8x32xf32>
    %166 = arith.addf %164, %165 : vector<8x32xf32>
    %cst_72 = arith.constant dense<0.000000e+00> : vector<8x64xf32>
    %167 = tpu.matmul %166, %33, %cst_72 {dimension_numbers = #tpu.dot_dimension_numbers<[1], [0], [0], [1], [0, 0, 1, 1], [], []>} : vector<8x32xf32>, vector<32x64xf32>, vector<8x64xf32> -> vector<8x64xf32>
    %168 = vector.broadcast %45 : vector<1x64xf32> to vector<8x64xf32>
    %169 = arith.addf %167, %168 : vector<8x64xf32>
    %cst_73 = arith.constant 5.000000e-01 : f32
    %170 = vector.broadcast %cst_73 : f32 to vector<8x64xf32>
    %171 = arith.mulf %170, %169 : vector<8x64xf32>
    %cst_74 = arith.constant 2.000000e+00 : f32
    %172 = math.sqrt %cst_74 : f32
    %cst_75 = arith.constant 1.000000e+00 : f32
    %173 = arith.divf %cst_75, %172 : f32
    %174 = vector.broadcast %173 : f32 to vector<8x64xf32>
    %175 = arith.mulf %169, %174 : vector<8x64xf32>
    %176 = math.erf %175 : vector<8x64xf32>
    %cst_76 = arith.constant 1.000000e+00 : f32
    %177 = vector.broadcast %cst_76 : f32 to vector<8x64xf32>
    %178 = arith.addf %177, %176 : vector<8x64xf32>
    %179 = arith.mulf %171, %178 : vector<8x64xf32>
    %cst_77 = arith.constant dense<0.000000e+00> : vector<8x32xf32>
    %180 = tpu.matmul %179, %35, %cst_77 {dimension_numbers = #tpu.dot_dimension_numbers<[1], [0], [0], [1], [0, 0, 1, 1], [], []>} : vector<8x64xf32>, vector<64x32xf32>, vector<8x32xf32> -> vector<8x32xf32>
    %181 = vector.broadcast %47 : vector<1x32xf32> to vector<8x32xf32>
    %182 = arith.addf %180, %181 : vector<8x32xf32>
    %183 = arith.addf %166, %182 : vector<8x32xf32>
    %cst_78 = arith.constant dense<0.000000e+00> : vector<8xf32>
    %184 = vector.multi_reduction <add>, %183, %cst_78 [1] : vector<8x32xf32> to vector<8xf32>
    %185 = vector.shape_cast %184 : vector<8xf32> to vector<8x1xf32>
    %cst_79 = arith.constant 3.200000e+01 : f32
    %186 = vector.broadcast %cst_79 : f32 to vector<8x1xf32>
    %187 = arith.divf %185, %186 : vector<8x1xf32>
    %188 = vector.broadcast %187 : vector<8x1xf32> to vector<8x32xf32>
    %189 = arith.subf %183, %188 : vector<8x32xf32>
    %190 = arith.mulf %189, %189 : vector<8x32xf32>
    %cst_80 = arith.constant dense<0.000000e+00> : vector<8xf32>
    %191 = vector.multi_reduction <add>, %190, %cst_80 [1] : vector<8x32xf32> to vector<8xf32>
    %192 = vector.shape_cast %191 : vector<8xf32> to vector<8x1xf32>
    %cst_81 = arith.constant 3.200000e+01 : f32
    %193 = vector.broadcast %cst_81 : f32 to vector<8x1xf32>
    %194 = arith.divf %192, %193 : vector<8x1xf32>
    %195 = vector.broadcast %187 : vector<8x1xf32> to vector<8x32xf32>
    %196 = arith.subf %183, %195 : vector<8x32xf32>
    %cst_82 = arith.constant 9.99999996E-13 : f32
    %197 = vector.broadcast %cst_82 : f32 to vector<8x1xf32>
    %198 = arith.addf %194, %197 : vector<8x1xf32>
    %199 = math.rsqrt %198 : vector<8x1xf32>
    %200 = vector.broadcast %199 : vector<8x1xf32> to vector<8x32xf32>
    %201 = arith.mulf %196, %200 : vector<8x32xf32>
    %202 = vector.broadcast %49 : vector<1x32xf32> to vector<8x32xf32>
    %203 = arith.mulf %201, %202 : vector<8x32xf32>
    %204 = vector.broadcast %51 : vector<1x32xf32> to vector<8x32xf32>
    %205 = arith.addf %203, %204 : vector<8x32xf32>
    %c1 = arith.constant 1 : index
    %c0_83 = arith.constant 0 : index
    %c0_84 = arith.constant 0 : index
    %206 = vector.load %arg3[%c1, %c0_83, %c0_84] : memref<6x32x384xf32, #tpu.memory_space<vmem>>, vector<1x32x96xf32>
    %207 = vector.shape_cast %206 : vector<1x32x96xf32> to vector<32x96xf32>
    %c1_85 = arith.constant 1 : index
    %c0_86 = arith.constant 0 : index
    %c128_87 = arith.constant 128 : index
    %208 = vector.load %arg3[%c1_85, %c0_86, %c128_87] : memref<6x32x384xf32, #tpu.memory_space<vmem>>, vector<1x32x32xf32>
    %209 = vector.shape_cast %208 : vector<1x32x32xf32> to vector<32x32xf32>
    %c1_88 = arith.constant 1 : index
    %c0_89 = arith.constant 0 : index
    %c256_90 = arith.constant 256 : index
    %210 = vector.load %arg3[%c1_88, %c0_89, %c256_90] : memref<6x32x384xf32, #tpu.memory_space<vmem>>, vector<1x32x64xf32>
    %211 = vector.shape_cast %210 : vector<1x32x64xf32> to vector<32x64xf32>
    %c1_91 = arith.constant 1 : index
    %c0_92 = arith.constant 0 : index
    %c0_93 = arith.constant 0 : index
    %212 = vector.load %arg4[%c1_91, %c0_92, %c0_93] : memref<6x64x32xf32, #tpu.memory_space<vmem>>, vector<1x64x32xf32>
    %213 = vector.shape_cast %212 : vector<1x64x32xf32> to vector<64x32xf32>
    %c1_94 = arith.constant 1 : index
    %c0_95 = arith.constant 0 : index
    %c0_96 = arith.constant 0 : index
    %214 = vector.load %arg5[%c1_94, %c0_95, %c0_96] : memref<6x1x1024xf32, #tpu.memory_space<vmem>>, vector<1x1x96xf32>
    %215 = vector.shape_cast %214 : vector<1x1x96xf32> to vector<1x96xf32>
    %c1_97 = arith.constant 1 : index
    %c0_98 = arith.constant 0 : index
    %c128_99 = arith.constant 128 : index
    %216 = vector.load %arg5[%c1_97, %c0_98, %c128_99] : memref<6x1x1024xf32, #tpu.memory_space<vmem>>, vector<1x1x32xf32>
    %217 = vector.shape_cast %216 : vector<1x1x32xf32> to vector<1x32xf32>
    %c1_100 = arith.constant 1 : index
    %c0_101 = arith.constant 0 : index
    %c256_102 = arith.constant 256 : index
    %218 = vector.load %arg5[%c1_100, %c0_101, %c256_102] : memref<6x1x1024xf32, #tpu.memory_space<vmem>>, vector<1x1x32xf32>
    %219 = vector.shape_cast %218 : vector<1x1x32xf32> to vector<1x32xf32>
    %c1_103 = arith.constant 1 : index
    %c0_104 = arith.constant 0 : index
    %c384_105 = arith.constant 384 : index
    %220 = vector.load %arg5[%c1_103, %c0_104, %c384_105] : memref<6x1x1024xf32, #tpu.memory_space<vmem>>, vector<1x1x32xf32>
    %221 = vector.shape_cast %220 : vector<1x1x32xf32> to vector<1x32xf32>
    %c1_106 = arith.constant 1 : index
    %c0_107 = arith.constant 0 : index
    %c512_108 = arith.constant 512 : index
    %222 = vector.load %arg5[%c1_106, %c0_107, %c512_108] : memref<6x1x1024xf32, #tpu.memory_space<vmem>>, vector<1x1x64xf32>
    %223 = vector.shape_cast %222 : vector<1x1x64xf32> to vector<1x64xf32>
    %c1_109 = arith.constant 1 : index
    %c0_110 = arith.constant 0 : index
    %c640_111 = arith.constant 640 : index
    %224 = vector.load %arg5[%c1_109, %c0_110, %c640_111] : memref<6x1x1024xf32, #tpu.memory_space<vmem>>, vector<1x1x32xf32>
    %225 = vector.shape_cast %224 : vector<1x1x32xf32> to vector<1x32xf32>
    %c1_112 = arith.constant 1 : index
    %c0_113 = arith.constant 0 : index
    %c768_114 = arith.constant 768 : index
    %226 = vector.load %arg5[%c1_112, %c0_113, %c768_114] : memref<6x1x1024xf32, #tpu.memory_space<vmem>>, vector<1x1x32xf32>
    %227 = vector.shape_cast %226 : vector<1x1x32xf32> to vector<1x32xf32>
    %c1_115 = arith.constant 1 : index
    %c0_116 = arith.constant 0 : index
    %c896_117 = arith.constant 896 : index
    %228 = vector.load %arg5[%c1_115, %c0_116, %c896_117] : memref<6x1x1024xf32, #tpu.memory_space<vmem>>, vector<1x1x32xf32>
    %229 = vector.shape_cast %228 : vector<1x1x32xf32> to vector<1x32xf32>
    %cst_118 = arith.constant dense<0.000000e+00> : vector<8x96xf32>
    %230 = tpu.matmul %205, %207, %cst_118 {dimension_numbers = #tpu.dot_dimension_numbers<[1], [0], [0], [1], [0, 0, 1, 1], [], []>} : vector<8x32xf32>, vector<32x96xf32>, vector<8x96xf32> -> vector<8x96xf32>
    %231 = vector.broadcast %215 : vector<1x96xf32> to vector<8x96xf32>
    %232 = arith.addf %230, %231 : vector<8x96xf32>
    %233 = vector.extract_strided_slice %232 {offsets = [0, 0], sizes = [8, 8], strides = [1, 1]} : vector<8x96xf32> to vector<8x8xf32>
    %234 = vector.extract_strided_slice %232 {offsets = [0, 32], sizes = [8, 8], strides = [1, 1]} : vector<8x96xf32> to vector<8x8xf32>
    %235 = vector.extract_strided_slice %232 {offsets = [0, 64], sizes = [8, 8], strides = [1, 1]} : vector<8x96xf32> to vector<8x8xf32>
    %cst_119 = arith.constant dense<0.000000e+00> : vector<8x8xf32>
    %236 = tpu.matmul %233, %234, %cst_119 {dimension_numbers = #tpu.dot_dimension_numbers<[1], [1], [0], [0], [0, 0, 1, 0], [], []>} : vector<8x8xf32>, vector<8x8xf32>, vector<8x8xf32> -> vector<8x8xf32>
    %cst_120 = arith.constant 0.353553385 : f32
    %237 = vector.broadcast %cst_120 : f32 to vector<8x8xf32>
    %238 = arith.mulf %236, %237 : vector<8x8xf32>
    %239 = vector.broadcast %3 : vector<1x8xf32> to vector<8x8xf32>
    %240 = arith.addf %238, %239 : vector<8x8xf32>
    %cst_121 = arith.constant dense<0xFF800000> : vector<8xf32>
    %241 = vector.multi_reduction <maximumf>, %240, %cst_121 [1] : vector<8x8xf32> to vector<8xf32>
    %242 = vector.shape_cast %241 : vector<8xf32> to vector<8x1xf32>
    %243 = vector.broadcast %242 : vector<8x1xf32> to vector<8x8xf32>
    %244 = arith.subf %240, %243 : vector<8x8xf32>
    %245 = math.exp %244 : vector<8x8xf32>
    %cst_122 = arith.constant dense<0.000000e+00> : vector<8xf32>
    %246 = vector.multi_reduction <add>, %245, %cst_122 [1] : vector<8x8xf32> to vector<8xf32>
    %247 = vector.shape_cast %246 : vector<8xf32> to vector<8x1xf32>
    %248 = tpu.reciprocal %247 {approx = true} : vector<8x1xf32> -> vector<8x1xf32>
    %249 = vector.broadcast %248 : vector<8x1xf32> to vector<8x8xf32>
    %250 = arith.mulf %245, %249 : vector<8x8xf32>
    %cst_123 = arith.constant dense<0.000000e+00> : vector<8x8xf32>
    %251 = tpu.matmul %250, %235, %cst_123 {dimension_numbers = #tpu.dot_dimension_numbers<[1], [0], [0], [1], [0, 0, 1, 1], [], []>} : vector<8x8xf32>, vector<8x8xf32>, vector<8x8xf32> -> vector<8x8xf32>
    %252 = vector.extract_strided_slice %209 {offsets = [0, 0], sizes = [8, 32], strides = [1, 1]} : vector<32x32xf32> to vector<8x32xf32>
    %cst_124 = arith.constant dense<0.000000e+00> : vector<8x32xf32>
    %253 = tpu.matmul %251, %252, %cst_124 {dimension_numbers = #tpu.dot_dimension_numbers<[1], [0], [0], [1], [0, 0, 1, 1], [], []>} : vector<8x8xf32>, vector<8x32xf32>, vector<8x32xf32> -> vector<8x32xf32>
    %254 = vector.extract_strided_slice %232 {offsets = [0, 8], sizes = [8, 8], strides = [1, 1]} : vector<8x96xf32> to vector<8x8xf32>
    %255 = vector.extract_strided_slice %232 {offsets = [0, 40], sizes = [8, 8], strides = [1, 1]} : vector<8x96xf32> to vector<8x8xf32>
    %256 = vector.extract_strided_slice %232 {offsets = [0, 72], sizes = [8, 8], strides = [1, 1]} : vector<8x96xf32> to vector<8x8xf32>
    %cst_125 = arith.constant dense<0.000000e+00> : vector<8x8xf32>
    %257 = tpu.matmul %254, %255, %cst_125 {dimension_numbers = #tpu.dot_dimension_numbers<[1], [1], [0], [0], [0, 0, 1, 0], [], []>} : vector<8x8xf32>, vector<8x8xf32>, vector<8x8xf32> -> vector<8x8xf32>
    %cst_126 = arith.constant 0.353553385 : f32
    %258 = vector.broadcast %cst_126 : f32 to vector<8x8xf32>
    %259 = arith.mulf %257, %258 : vector<8x8xf32>
    %260 = vector.broadcast %3 : vector<1x8xf32> to vector<8x8xf32>
    %261 = arith.addf %259, %260 : vector<8x8xf32>
    %cst_127 = arith.constant dense<0xFF800000> : vector<8xf32>
    %262 = vector.multi_reduction <maximumf>, %261, %cst_127 [1] : vector<8x8xf32> to vector<8xf32>
    %263 = vector.shape_cast %262 : vector<8xf32> to vector<8x1xf32>
    %264 = vector.broadcast %263 : vector<8x1xf32> to vector<8x8xf32>
    %265 = arith.subf %261, %264 : vector<8x8xf32>
    %266 = math.exp %265 : vector<8x8xf32>
    %cst_128 = arith.constant dense<0.000000e+00> : vector<8xf32>
    %267 = vector.multi_reduction <add>, %266, %cst_128 [1] : vector<8x8xf32> to vector<8xf32>
    %268 = vector.shape_cast %267 : vector<8xf32> to vector<8x1xf32>
    %269 = tpu.reciprocal %268 {approx = true} : vector<8x1xf32> -> vector<8x1xf32>
    %270 = vector.broadcast %269 : vector<8x1xf32> to vector<8x8xf32>
    %271 = arith.mulf %266, %270 : vector<8x8xf32>
    %cst_129 = arith.constant dense<0.000000e+00> : vector<8x8xf32>
    %272 = tpu.matmul %271, %256, %cst_129 {dimension_numbers = #tpu.dot_dimension_numbers<[1], [0], [0], [1], [0, 0, 1, 1], [], []>} : vector<8x8xf32>, vector<8x8xf32>, vector<8x8xf32> -> vector<8x8xf32>
    %273 = vector.extract_strided_slice %209 {offsets = [8, 0], sizes = [8, 32], strides = [1, 1]} : vector<32x32xf32> to vector<8x32xf32>
    %cst_130 = arith.constant dense<0.000000e+00> : vector<8x32xf32>
    %274 = tpu.matmul %272, %273, %cst_130 {dimension_numbers = #tpu.dot_dimension_numbers<[1], [0], [0], [1], [0, 0, 1, 1], [], []>} : vector<8x8xf32>, vector<8x32xf32>, vector<8x32xf32> -> vector<8x32xf32>
    %275 = arith.addf %253, %274 : vector<8x32xf32>
    %276 = vector.extract_strided_slice %232 {offsets = [0, 16], sizes = [8, 8], strides = [1, 1]} : vector<8x96xf32> to vector<8x8xf32>
    %277 = vector.extract_strided_slice %232 {offsets = [0, 48], sizes = [8, 8], strides = [1, 1]} : vector<8x96xf32> to vector<8x8xf32>
    %278 = vector.extract_strided_slice %232 {offsets = [0, 80], sizes = [8, 8], strides = [1, 1]} : vector<8x96xf32> to vector<8x8xf32>
    %cst_131 = arith.constant dense<0.000000e+00> : vector<8x8xf32>
    %279 = tpu.matmul %276, %277, %cst_131 {dimension_numbers = #tpu.dot_dimension_numbers<[1], [1], [0], [0], [0, 0, 1, 0], [], []>} : vector<8x8xf32>, vector<8x8xf32>, vector<8x8xf32> -> vector<8x8xf32>
    %cst_132 = arith.constant 0.353553385 : f32
    %280 = vector.broadcast %cst_132 : f32 to vector<8x8xf32>
    %281 = arith.mulf %279, %280 : vector<8x8xf32>
    %282 = vector.broadcast %3 : vector<1x8xf32> to vector<8x8xf32>
    %283 = arith.addf %281, %282 : vector<8x8xf32>
    %cst_133 = arith.constant dense<0xFF800000> : vector<8xf32>
    %284 = vector.multi_reduction <maximumf>, %283, %cst_133 [1] : vector<8x8xf32> to vector<8xf32>
    %285 = vector.shape_cast %284 : vector<8xf32> to vector<8x1xf32>
    %286 = vector.broadcast %285 : vector<8x1xf32> to vector<8x8xf32>
    %287 = arith.subf %283, %286 : vector<8x8xf32>
    %288 = math.exp %287 : vector<8x8xf32>
    %cst_134 = arith.constant dense<0.000000e+00> : vector<8xf32>
    %289 = vector.multi_reduction <add>, %288, %cst_134 [1] : vector<8x8xf32> to vector<8xf32>
    %290 = vector.shape_cast %289 : vector<8xf32> to vector<8x1xf32>
    %291 = tpu.reciprocal %290 {approx = true} : vector<8x1xf32> -> vector<8x1xf32>
    %292 = vector.broadcast %291 : vector<8x1xf32> to vector<8x8xf32>
    %293 = arith.mulf %288, %292 : vector<8x8xf32>
    %cst_135 = arith.constant dense<0.000000e+00> : vector<8x8xf32>
    %294 = tpu.matmul %293, %278, %cst_135 {dimension_numbers = #tpu.dot_dimension_numbers<[1], [0], [0], [1], [0, 0, 1, 1], [], []>} : vector<8x8xf32>, vector<8x8xf32>, vector<8x8xf32> -> vector<8x8xf32>
    %295 = vector.extract_strided_slice %209 {offsets = [16, 0], sizes = [8, 32], strides = [1, 1]} : vector<32x32xf32> to vector<8x32xf32>
    %cst_136 = arith.constant dense<0.000000e+00> : vector<8x32xf32>
    %296 = tpu.matmul %294, %295, %cst_136 {dimension_numbers = #tpu.dot_dimension_numbers<[1], [0], [0], [1], [0, 0, 1, 1], [], []>} : vector<8x8xf32>, vector<8x32xf32>, vector<8x32xf32> -> vector<8x32xf32>
    %297 = arith.addf %275, %296 : vector<8x32xf32>
    %298 = vector.extract_strided_slice %232 {offsets = [0, 24], sizes = [8, 8], strides = [1, 1]} : vector<8x96xf32> to vector<8x8xf32>
    %299 = vector.extract_strided_slice %232 {offsets = [0, 56], sizes = [8, 8], strides = [1, 1]} : vector<8x96xf32> to vector<8x8xf32>
    %300 = vector.extract_strided_slice %232 {offsets = [0, 88], sizes = [8, 8], strides = [1, 1]} : vector<8x96xf32> to vector<8x8xf32>
    %cst_137 = arith.constant dense<0.000000e+00> : vector<8x8xf32>
    %301 = tpu.matmul %298, %299, %cst_137 {dimension_numbers = #tpu.dot_dimension_numbers<[1], [1], [0], [0], [0, 0, 1, 0], [], []>} : vector<8x8xf32>, vector<8x8xf32>, vector<8x8xf32> -> vector<8x8xf32>
    %cst_138 = arith.constant 0.353553385 : f32
    %302 = vector.broadcast %cst_138 : f32 to vector<8x8xf32>
    %303 = arith.mulf %301, %302 : vector<8x8xf32>
    %304 = vector.broadcast %3 : vector<1x8xf32> to vector<8x8xf32>
    %305 = arith.addf %303, %304 : vector<8x8xf32>
    %cst_139 = arith.constant dense<0xFF800000> : vector<8xf32>
    %306 = vector.multi_reduction <maximumf>, %305, %cst_139 [1] : vector<8x8xf32> to vector<8xf32>
    %307 = vector.shape_cast %306 : vector<8xf32> to vector<8x1xf32>
    %308 = vector.broadcast %307 : vector<8x1xf32> to vector<8x8xf32>
    %309 = arith.subf %305, %308 : vector<8x8xf32>
    %310 = math.exp %309 : vector<8x8xf32>
    %cst_140 = arith.constant dense<0.000000e+00> : vector<8xf32>
    %311 = vector.multi_reduction <add>, %310, %cst_140 [1] : vector<8x8xf32> to vector<8xf32>
    %312 = vector.shape_cast %311 : vector<8xf32> to vector<8x1xf32>
    %313 = tpu.reciprocal %312 {approx = true} : vector<8x1xf32> -> vector<8x1xf32>
    %314 = vector.broadcast %313 : vector<8x1xf32> to vector<8x8xf32>
    %315 = arith.mulf %310, %314 : vector<8x8xf32>
    %cst_141 = arith.constant dense<0.000000e+00> : vector<8x8xf32>
    %316 = tpu.matmul %315, %300, %cst_141 {dimension_numbers = #tpu.dot_dimension_numbers<[1], [0], [0], [1], [0, 0, 1, 1], [], []>} : vector<8x8xf32>, vector<8x8xf32>, vector<8x8xf32> -> vector<8x8xf32>
    %317 = vector.extract_strided_slice %209 {offsets = [24, 0], sizes = [8, 32], strides = [1, 1]} : vector<32x32xf32> to vector<8x32xf32>
    %cst_142 = arith.constant dense<0.000000e+00> : vector<8x32xf32>
    %318 = tpu.matmul %316, %317, %cst_142 {dimension_numbers = #tpu.dot_dimension_numbers<[1], [0], [0], [1], [0, 0, 1, 1], [], []>} : vector<8x8xf32>, vector<8x32xf32>, vector<8x32xf32> -> vector<8x32xf32>
    %319 = arith.addf %297, %318 : vector<8x32xf32>
    %320 = arith.addf %205, %319 : vector<8x32xf32>
    %321 = vector.broadcast %217 : vector<1x32xf32> to vector<8x32xf32>
    %322 = arith.addf %320, %321 : vector<8x32xf32>
    %cst_143 = arith.constant dense<0.000000e+00> : vector<8xf32>
    %323 = vector.multi_reduction <add>, %322, %cst_143 [1] : vector<8x32xf32> to vector<8xf32>
    %324 = vector.shape_cast %323 : vector<8xf32> to vector<8x1xf32>
    %cst_144 = arith.constant 3.200000e+01 : f32
    %325 = vector.broadcast %cst_144 : f32 to vector<8x1xf32>
    %326 = arith.divf %324, %325 : vector<8x1xf32>
    %327 = vector.broadcast %326 : vector<8x1xf32> to vector<8x32xf32>
    %328 = arith.subf %322, %327 : vector<8x32xf32>
    %329 = arith.mulf %328, %328 : vector<8x32xf32>
    %cst_145 = arith.constant dense<0.000000e+00> : vector<8xf32>
    %330 = vector.multi_reduction <add>, %329, %cst_145 [1] : vector<8x32xf32> to vector<8xf32>
    %331 = vector.shape_cast %330 : vector<8xf32> to vector<8x1xf32>
    %cst_146 = arith.constant 3.200000e+01 : f32
    %332 = vector.broadcast %cst_146 : f32 to vector<8x1xf32>
    %333 = arith.divf %331, %332 : vector<8x1xf32>
    %334 = vector.broadcast %326 : vector<8x1xf32> to vector<8x32xf32>
    %335 = arith.subf %322, %334 : vector<8x32xf32>
    %cst_147 = arith.constant 9.99999996E-13 : f32
    %336 = vector.broadcast %cst_147 : f32 to vector<8x1xf32>
    %337 = arith.addf %333, %336 : vector<8x1xf32>
    %338 = math.rsqrt %337 : vector<8x1xf32>
    %339 = vector.broadcast %338 : vector<8x1xf32> to vector<8x32xf32>
    %340 = arith.mulf %335, %339 : vector<8x32xf32>
    %341 = vector.broadcast %219 : vector<1x32xf32> to vector<8x32xf32>
    %342 = arith.mulf %340, %341 : vector<8x32xf32>
    %343 = vector.broadcast %221 : vector<1x32xf32> to vector<8x32xf32>
    %344 = arith.addf %342, %343 : vector<8x32xf32>
    %cst_148 = arith.constant dense<0.000000e+00> : vector<8x64xf32>
    %345 = tpu.matmul %344, %211, %cst_148 {dimension_numbers = #tpu.dot_dimension_numbers<[1], [0], [0], [1], [0, 0, 1, 1], [], []>} : vector<8x32xf32>, vector<32x64xf32>, vector<8x64xf32> -> vector<8x64xf32>
    %346 = vector.broadcast %223 : vector<1x64xf32> to vector<8x64xf32>
    %347 = arith.addf %345, %346 : vector<8x64xf32>
    %cst_149 = arith.constant 5.000000e-01 : f32
    %348 = vector.broadcast %cst_149 : f32 to vector<8x64xf32>
    %349 = arith.mulf %348, %347 : vector<8x64xf32>
    %cst_150 = arith.constant 2.000000e+00 : f32
    %350 = math.sqrt %cst_150 : f32
    %cst_151 = arith.constant 1.000000e+00 : f32
    %351 = arith.divf %cst_151, %350 : f32
    %352 = vector.broadcast %351 : f32 to vector<8x64xf32>
    %353 = arith.mulf %347, %352 : vector<8x64xf32>
    %354 = math.erf %353 : vector<8x64xf32>
    %cst_152 = arith.constant 1.000000e+00 : f32
    %355 = vector.broadcast %cst_152 : f32 to vector<8x64xf32>
    %356 = arith.addf %355, %354 : vector<8x64xf32>
    %357 = arith.mulf %349, %356 : vector<8x64xf32>
    %cst_153 = arith.constant dense<0.000000e+00> : vector<8x32xf32>
    %358 = tpu.matmul %357, %213, %cst_153 {dimension_numbers = #tpu.dot_dimension_numbers<[1], [0], [0], [1], [0, 0, 1, 1], [], []>} : vector<8x64xf32>, vector<64x32xf32>, vector<8x32xf32> -> vector<8x32xf32>
    %359 = vector.broadcast %225 : vector<1x32xf32> to vector<8x32xf32>
    %360 = arith.addf %358, %359 : vector<8x32xf32>
    %361 = arith.addf %344, %360 : vector<8x32xf32>
    %cst_154 = arith.constant dense<0.000000e+00> : vector<8xf32>
    %362 = vector.multi_reduction <add>, %361, %cst_154 [1] : vector<8x32xf32> to vector<8xf32>
    %363 = vector.shape_cast %362 : vector<8xf32> to vector<8x1xf32>
    %cst_155 = arith.constant 3.200000e+01 : f32
    %364 = vector.broadcast %cst_155 : f32 to vector<8x1xf32>
    %365 = arith.divf %363, %364 : vector<8x1xf32>
    %366 = vector.broadcast %365 : vector<8x1xf32> to vector<8x32xf32>
    %367 = arith.subf %361, %366 : vector<8x32xf32>
    %368 = arith.mulf %367, %367 : vector<8x32xf32>
    %cst_156 = arith.constant dense<0.000000e+00> : vector<8xf32>
    %369 = vector.multi_reduction <add>, %368, %cst_156 [1] : vector<8x32xf32> to vector<8xf32>
    %370 = vector.shape_cast %369 : vector<8xf32> to vector<8x1xf32>
    %cst_157 = arith.constant 3.200000e+01 : f32
    %371 = vector.broadcast %cst_157 : f32 to vector<8x1xf32>
    %372 = arith.divf %370, %371 : vector<8x1xf32>
    %373 = vector.broadcast %365 : vector<8x1xf32> to vector<8x32xf32>
    %374 = arith.subf %361, %373 : vector<8x32xf32>
    %cst_158 = arith.constant 9.99999996E-13 : f32
    %375 = vector.broadcast %cst_158 : f32 to vector<8x1xf32>
    %376 = arith.addf %372, %375 : vector<8x1xf32>
    %377 = math.rsqrt %376 : vector<8x1xf32>
    %378 = vector.broadcast %377 : vector<8x1xf32> to vector<8x32xf32>
    %379 = arith.mulf %374, %378 : vector<8x32xf32>
    %380 = vector.broadcast %227 : vector<1x32xf32> to vector<8x32xf32>
    %381 = arith.mulf %379, %380 : vector<8x32xf32>
    %382 = vector.broadcast %229 : vector<1x32xf32> to vector<8x32xf32>
    %383 = arith.addf %381, %382 : vector<8x32xf32>
    %c2 = arith.constant 2 : index
    %c0_159 = arith.constant 0 : index
    %c0_160 = arith.constant 0 : index
    %384 = vector.load %arg3[%c2, %c0_159, %c0_160] : memref<6x32x384xf32, #tpu.memory_space<vmem>>, vector<1x32x96xf32>
    %385 = vector.shape_cast %384 : vector<1x32x96xf32> to vector<32x96xf32>
    %c2_161 = arith.constant 2 : index
    %c0_162 = arith.constant 0 : index
    %c128_163 = arith.constant 128 : index
    %386 = vector.load %arg3[%c2_161, %c0_162, %c128_163] : memref<6x32x384xf32, #tpu.memory_space<vmem>>, vector<1x32x32xf32>
    %387 = vector.shape_cast %386 : vector<1x32x32xf32> to vector<32x32xf32>
    %c2_164 = arith.constant 2 : index
    %c0_165 = arith.constant 0 : index
    %c256_166 = arith.constant 256 : index
    %388 = vector.load %arg3[%c2_164, %c0_165, %c256_166] : memref<6x32x384xf32, #tpu.memory_space<vmem>>, vector<1x32x64xf32>
    %389 = vector.shape_cast %388 : vector<1x32x64xf32> to vector<32x64xf32>
    %c2_167 = arith.constant 2 : index
    %c0_168 = arith.constant 0 : index
    %c0_169 = arith.constant 0 : index
    %390 = vector.load %arg4[%c2_167, %c0_168, %c0_169] : memref<6x64x32xf32, #tpu.memory_space<vmem>>, vector<1x64x32xf32>
    %391 = vector.shape_cast %390 : vector<1x64x32xf32> to vector<64x32xf32>
    %c2_170 = arith.constant 2 : index
    %c0_171 = arith.constant 0 : index
    %c0_172 = arith.constant 0 : index
    %392 = vector.load %arg5[%c2_170, %c0_171, %c0_172] : memref<6x1x1024xf32, #tpu.memory_space<vmem>>, vector<1x1x96xf32>
    %393 = vector.shape_cast %392 : vector<1x1x96xf32> to vector<1x96xf32>
    %c2_173 = arith.constant 2 : index
    %c0_174 = arith.constant 0 : index
    %c128_175 = arith.constant 128 : index
    %394 = vector.load %arg5[%c2_173, %c0_174, %c128_175] : memref<6x1x1024xf32, #tpu.memory_space<vmem>>, vector<1x1x32xf32>
    %395 = vector.shape_cast %394 : vector<1x1x32xf32> to vector<1x32xf32>
    %c2_176 = arith.constant 2 : index
    %c0_177 = arith.constant 0 : index
    %c256_178 = arith.constant 256 : index
    %396 = vector.load %arg5[%c2_176, %c0_177, %c256_178] : memref<6x1x1024xf32, #tpu.memory_space<vmem>>, vector<1x1x32xf32>
    %397 = vector.shape_cast %396 : vector<1x1x32xf32> to vector<1x32xf32>
    %c2_179 = arith.constant 2 : index
    %c0_180 = arith.constant 0 : index
    %c384_181 = arith.constant 384 : index
    %398 = vector.load %arg5[%c2_179, %c0_180, %c384_181] : memref<6x1x1024xf32, #tpu.memory_space<vmem>>, vector<1x1x32xf32>
    %399 = vector.shape_cast %398 : vector<1x1x32xf32> to vector<1x32xf32>
    %c2_182 = arith.constant 2 : index
    %c0_183 = arith.constant 0 : index
    %c512_184 = arith.constant 512 : index
    %400 = vector.load %arg5[%c2_182, %c0_183, %c512_184] : memref<6x1x1024xf32, #tpu.memory_space<vmem>>, vector<1x1x64xf32>
    %401 = vector.shape_cast %400 : vector<1x1x64xf32> to vector<1x64xf32>
    %c2_185 = arith.constant 2 : index
    %c0_186 = arith.constant 0 : index
    %c640_187 = arith.constant 640 : index
    %402 = vector.load %arg5[%c2_185, %c0_186, %c640_187] : memref<6x1x1024xf32, #tpu.memory_space<vmem>>, vector<1x1x32xf32>
    %403 = vector.shape_cast %402 : vector<1x1x32xf32> to vector<1x32xf32>
    %c2_188 = arith.constant 2 : index
    %c0_189 = arith.constant 0 : index
    %c768_190 = arith.constant 768 : index
    %404 = vector.load %arg5[%c2_188, %c0_189, %c768_190] : memref<6x1x1024xf32, #tpu.memory_space<vmem>>, vector<1x1x32xf32>
    %405 = vector.shape_cast %404 : vector<1x1x32xf32> to vector<1x32xf32>
    %c2_191 = arith.constant 2 : index
    %c0_192 = arith.constant 0 : index
    %c896_193 = arith.constant 896 : index
    %406 = vector.load %arg5[%c2_191, %c0_192, %c896_193] : memref<6x1x1024xf32, #tpu.memory_space<vmem>>, vector<1x1x32xf32>
    %407 = vector.shape_cast %406 : vector<1x1x32xf32> to vector<1x32xf32>
    %cst_194 = arith.constant dense<0.000000e+00> : vector<8x96xf32>
    %408 = tpu.matmul %383, %385, %cst_194 {dimension_numbers = #tpu.dot_dimension_numbers<[1], [0], [0], [1], [0, 0, 1, 1], [], []>} : vector<8x32xf32>, vector<32x96xf32>, vector<8x96xf32> -> vector<8x96xf32>
    %409 = vector.broadcast %393 : vector<1x96xf32> to vector<8x96xf32>
    %410 = arith.addf %408, %409 : vector<8x96xf32>
    %411 = vector.extract_strided_slice %410 {offsets = [0, 0], sizes = [8, 8], strides = [1, 1]} : vector<8x96xf32> to vector<8x8xf32>
    %412 = vector.extract_strided_slice %410 {offsets = [0, 32], sizes = [8, 8], strides = [1, 1]} : vector<8x96xf32> to vector<8x8xf32>
    %413 = vector.extract_strided_slice %410 {offsets = [0, 64], sizes = [8, 8], strides = [1, 1]} : vector<8x96xf32> to vector<8x8xf32>
    %cst_195 = arith.constant dense<0.000000e+00> : vector<8x8xf32>
    %414 = tpu.matmul %411, %412, %cst_195 {dimension_numbers = #tpu.dot_dimension_numbers<[1], [1], [0], [0], [0, 0, 1, 0], [], []>} : vector<8x8xf32>, vector<8x8xf32>, vector<8x8xf32> -> vector<8x8xf32>
    %cst_196 = arith.constant 0.353553385 : f32
    %415 = vector.broadcast %cst_196 : f32 to vector<8x8xf32>
    %416 = arith.mulf %414, %415 : vector<8x8xf32>
    %417 = vector.broadcast %3 : vector<1x8xf32> to vector<8x8xf32>
    %418 = arith.addf %416, %417 : vector<8x8xf32>
    %cst_197 = arith.constant dense<0xFF800000> : vector<8xf32>
    %419 = vector.multi_reduction <maximumf>, %418, %cst_197 [1] : vector<8x8xf32> to vector<8xf32>
    %420 = vector.shape_cast %419 : vector<8xf32> to vector<8x1xf32>
    %421 = vector.broadcast %420 : vector<8x1xf32> to vector<8x8xf32>
    %422 = arith.subf %418, %421 : vector<8x8xf32>
    %423 = math.exp %422 : vector<8x8xf32>
    %cst_198 = arith.constant dense<0.000000e+00> : vector<8xf32>
    %424 = vector.multi_reduction <add>, %423, %cst_198 [1] : vector<8x8xf32> to vector<8xf32>
    %425 = vector.shape_cast %424 : vector<8xf32> to vector<8x1xf32>
    %426 = tpu.reciprocal %425 {approx = true} : vector<8x1xf32> -> vector<8x1xf32>
    %427 = vector.broadcast %426 : vector<8x1xf32> to vector<8x8xf32>
    %428 = arith.mulf %423, %427 : vector<8x8xf32>
    %cst_199 = arith.constant dense<0.000000e+00> : vector<8x8xf32>
    %429 = tpu.matmul %428, %413, %cst_199 {dimension_numbers = #tpu.dot_dimension_numbers<[1], [0], [0], [1], [0, 0, 1, 1], [], []>} : vector<8x8xf32>, vector<8x8xf32>, vector<8x8xf32> -> vector<8x8xf32>
    %430 = vector.extract_strided_slice %387 {offsets = [0, 0], sizes = [8, 32], strides = [1, 1]} : vector<32x32xf32> to vector<8x32xf32>
    %cst_200 = arith.constant dense<0.000000e+00> : vector<8x32xf32>
    %431 = tpu.matmul %429, %430, %cst_200 {dimension_numbers = #tpu.dot_dimension_numbers<[1], [0], [0], [1], [0, 0, 1, 1], [], []>} : vector<8x8xf32>, vector<8x32xf32>, vector<8x32xf32> -> vector<8x32xf32>
    %432 = vector.extract_strided_slice %410 {offsets = [0, 8], sizes = [8, 8], strides = [1, 1]} : vector<8x96xf32> to vector<8x8xf32>
    %433 = vector.extract_strided_slice %410 {offsets = [0, 40], sizes = [8, 8], strides = [1, 1]} : vector<8x96xf32> to vector<8x8xf32>
    %434 = vector.extract_strided_slice %410 {offsets = [0, 72], sizes = [8, 8], strides = [1, 1]} : vector<8x96xf32> to vector<8x8xf32>
    %cst_201 = arith.constant dense<0.000000e+00> : vector<8x8xf32>
    %435 = tpu.matmul %432, %433, %cst_201 {dimension_numbers = #tpu.dot_dimension_numbers<[1], [1], [0], [0], [0, 0, 1, 0], [], []>} : vector<8x8xf32>, vector<8x8xf32>, vector<8x8xf32> -> vector<8x8xf32>
    %cst_202 = arith.constant 0.353553385 : f32
    %436 = vector.broadcast %cst_202 : f32 to vector<8x8xf32>
    %437 = arith.mulf %435, %436 : vector<8x8xf32>
    %438 = vector.broadcast %3 : vector<1x8xf32> to vector<8x8xf32>
    %439 = arith.addf %437, %438 : vector<8x8xf32>
    %cst_203 = arith.constant dense<0xFF800000> : vector<8xf32>
    %440 = vector.multi_reduction <maximumf>, %439, %cst_203 [1] : vector<8x8xf32> to vector<8xf32>
    %441 = vector.shape_cast %440 : vector<8xf32> to vector<8x1xf32>
    %442 = vector.broadcast %441 : vector<8x1xf32> to vector<8x8xf32>
    %443 = arith.subf %439, %442 : vector<8x8xf32>
    %444 = math.exp %443 : vector<8x8xf32>
    %cst_204 = arith.constant dense<0.000000e+00> : vector<8xf32>
    %445 = vector.multi_reduction <add>, %444, %cst_204 [1] : vector<8x8xf32> to vector<8xf32>
    %446 = vector.shape_cast %445 : vector<8xf32> to vector<8x1xf32>
    %447 = tpu.reciprocal %446 {approx = true} : vector<8x1xf32> -> vector<8x1xf32>
    %448 = vector.broadcast %447 : vector<8x1xf32> to vector<8x8xf32>
    %449 = arith.mulf %444, %448 : vector<8x8xf32>
    %cst_205 = arith.constant dense<0.000000e+00> : vector<8x8xf32>
    %450 = tpu.matmul %449, %434, %cst_205 {dimension_numbers = #tpu.dot_dimension_numbers<[1], [0], [0], [1], [0, 0, 1, 1], [], []>} : vector<8x8xf32>, vector<8x8xf32>, vector<8x8xf32> -> vector<8x8xf32>
    %451 = vector.extract_strided_slice %387 {offsets = [8, 0], sizes = [8, 32], strides = [1, 1]} : vector<32x32xf32> to vector<8x32xf32>
    %cst_206 = arith.constant dense<0.000000e+00> : vector<8x32xf32>
    %452 = tpu.matmul %450, %451, %cst_206 {dimension_numbers = #tpu.dot_dimension_numbers<[1], [0], [0], [1], [0, 0, 1, 1], [], []>} : vector<8x8xf32>, vector<8x32xf32>, vector<8x32xf32> -> vector<8x32xf32>
    %453 = arith.addf %431, %452 : vector<8x32xf32>
    %454 = vector.extract_strided_slice %410 {offsets = [0, 16], sizes = [8, 8], strides = [1, 1]} : vector<8x96xf32> to vector<8x8xf32>
    %455 = vector.extract_strided_slice %410 {offsets = [0, 48], sizes = [8, 8], strides = [1, 1]} : vector<8x96xf32> to vector<8x8xf32>
    %456 = vector.extract_strided_slice %410 {offsets = [0, 80], sizes = [8, 8], strides = [1, 1]} : vector<8x96xf32> to vector<8x8xf32>
    %cst_207 = arith.constant dense<0.000000e+00> : vector<8x8xf32>
    %457 = tpu.matmul %454, %455, %cst_207 {dimension_numbers = #tpu.dot_dimension_numbers<[1], [1], [0], [0], [0, 0, 1, 0], [], []>} : vector<8x8xf32>, vector<8x8xf32>, vector<8x8xf32> -> vector<8x8xf32>
    %cst_208 = arith.constant 0.353553385 : f32
    %458 = vector.broadcast %cst_208 : f32 to vector<8x8xf32>
    %459 = arith.mulf %457, %458 : vector<8x8xf32>
    %460 = vector.broadcast %3 : vector<1x8xf32> to vector<8x8xf32>
    %461 = arith.addf %459, %460 : vector<8x8xf32>
    %cst_209 = arith.constant dense<0xFF800000> : vector<8xf32>
    %462 = vector.multi_reduction <maximumf>, %461, %cst_209 [1] : vector<8x8xf32> to vector<8xf32>
    %463 = vector.shape_cast %462 : vector<8xf32> to vector<8x1xf32>
    %464 = vector.broadcast %463 : vector<8x1xf32> to vector<8x8xf32>
    %465 = arith.subf %461, %464 : vector<8x8xf32>
    %466 = math.exp %465 : vector<8x8xf32>
    %cst_210 = arith.constant dense<0.000000e+00> : vector<8xf32>
    %467 = vector.multi_reduction <add>, %466, %cst_210 [1] : vector<8x8xf32> to vector<8xf32>
    %468 = vector.shape_cast %467 : vector<8xf32> to vector<8x1xf32>
    %469 = tpu.reciprocal %468 {approx = true} : vector<8x1xf32> -> vector<8x1xf32>
    %470 = vector.broadcast %469 : vector<8x1xf32> to vector<8x8xf32>
    %471 = arith.mulf %466, %470 : vector<8x8xf32>
    %cst_211 = arith.constant dense<0.000000e+00> : vector<8x8xf32>
    %472 = tpu.matmul %471, %456, %cst_211 {dimension_numbers = #tpu.dot_dimension_numbers<[1], [0], [0], [1], [0, 0, 1, 1], [], []>} : vector<8x8xf32>, vector<8x8xf32>, vector<8x8xf32> -> vector<8x8xf32>
    %473 = vector.extract_strided_slice %387 {offsets = [16, 0], sizes = [8, 32], strides = [1, 1]} : vector<32x32xf32> to vector<8x32xf32>
    %cst_212 = arith.constant dense<0.000000e+00> : vector<8x32xf32>
    %474 = tpu.matmul %472, %473, %cst_212 {dimension_numbers = #tpu.dot_dimension_numbers<[1], [0], [0], [1], [0, 0, 1, 1], [], []>} : vector<8x8xf32>, vector<8x32xf32>, vector<8x32xf32> -> vector<8x32xf32>
    %475 = arith.addf %453, %474 : vector<8x32xf32>
    %476 = vector.extract_strided_slice %410 {offsets = [0, 24], sizes = [8, 8], strides = [1, 1]} : vector<8x96xf32> to vector<8x8xf32>
    %477 = vector.extract_strided_slice %410 {offsets = [0, 56], sizes = [8, 8], strides = [1, 1]} : vector<8x96xf32> to vector<8x8xf32>
    %478 = vector.extract_strided_slice %410 {offsets = [0, 88], sizes = [8, 8], strides = [1, 1]} : vector<8x96xf32> to vector<8x8xf32>
    %cst_213 = arith.constant dense<0.000000e+00> : vector<8x8xf32>
    %479 = tpu.matmul %476, %477, %cst_213 {dimension_numbers = #tpu.dot_dimension_numbers<[1], [1], [0], [0], [0, 0, 1, 0], [], []>} : vector<8x8xf32>, vector<8x8xf32>, vector<8x8xf32> -> vector<8x8xf32>
    %cst_214 = arith.constant 0.353553385 : f32
    %480 = vector.broadcast %cst_214 : f32 to vector<8x8xf32>
    %481 = arith.mulf %479, %480 : vector<8x8xf32>
    %482 = vector.broadcast %3 : vector<1x8xf32> to vector<8x8xf32>
    %483 = arith.addf %481, %482 : vector<8x8xf32>
    %cst_215 = arith.constant dense<0xFF800000> : vector<8xf32>
    %484 = vector.multi_reduction <maximumf>, %483, %cst_215 [1] : vector<8x8xf32> to vector<8xf32>
    %485 = vector.shape_cast %484 : vector<8xf32> to vector<8x1xf32>
    %486 = vector.broadcast %485 : vector<8x1xf32> to vector<8x8xf32>
    %487 = arith.subf %483, %486 : vector<8x8xf32>
    %488 = math.exp %487 : vector<8x8xf32>
    %cst_216 = arith.constant dense<0.000000e+00> : vector<8xf32>
    %489 = vector.multi_reduction <add>, %488, %cst_216 [1] : vector<8x8xf32> to vector<8xf32>
    %490 = vector.shape_cast %489 : vector<8xf32> to vector<8x1xf32>
    %491 = tpu.reciprocal %490 {approx = true} : vector<8x1xf32> -> vector<8x1xf32>
    %492 = vector.broadcast %491 : vector<8x1xf32> to vector<8x8xf32>
    %493 = arith.mulf %488, %492 : vector<8x8xf32>
    %cst_217 = arith.constant dense<0.000000e+00> : vector<8x8xf32>
    %494 = tpu.matmul %493, %478, %cst_217 {dimension_numbers = #tpu.dot_dimension_numbers<[1], [0], [0], [1], [0, 0, 1, 1], [], []>} : vector<8x8xf32>, vector<8x8xf32>, vector<8x8xf32> -> vector<8x8xf32>
    %495 = vector.extract_strided_slice %387 {offsets = [24, 0], sizes = [8, 32], strides = [1, 1]} : vector<32x32xf32> to vector<8x32xf32>
    %cst_218 = arith.constant dense<0.000000e+00> : vector<8x32xf32>
    %496 = tpu.matmul %494, %495, %cst_218 {dimension_numbers = #tpu.dot_dimension_numbers<[1], [0], [0], [1], [0, 0, 1, 1], [], []>} : vector<8x8xf32>, vector<8x32xf32>, vector<8x32xf32> -> vector<8x32xf32>
    %497 = arith.addf %475, %496 : vector<8x32xf32>
    %498 = arith.addf %383, %497 : vector<8x32xf32>
    %499 = vector.broadcast %395 : vector<1x32xf32> to vector<8x32xf32>
    %500 = arith.addf %498, %499 : vector<8x32xf32>
    %cst_219 = arith.constant dense<0.000000e+00> : vector<8xf32>
    %501 = vector.multi_reduction <add>, %500, %cst_219 [1] : vector<8x32xf32> to vector<8xf32>
    %502 = vector.shape_cast %501 : vector<8xf32> to vector<8x1xf32>
    %cst_220 = arith.constant 3.200000e+01 : f32
    %503 = vector.broadcast %cst_220 : f32 to vector<8x1xf32>
    %504 = arith.divf %502, %503 : vector<8x1xf32>
    %505 = vector.broadcast %504 : vector<8x1xf32> to vector<8x32xf32>
    %506 = arith.subf %500, %505 : vector<8x32xf32>
    %507 = arith.mulf %506, %506 : vector<8x32xf32>
    %cst_221 = arith.constant dense<0.000000e+00> : vector<8xf32>
    %508 = vector.multi_reduction <add>, %507, %cst_221 [1] : vector<8x32xf32> to vector<8xf32>
    %509 = vector.shape_cast %508 : vector<8xf32> to vector<8x1xf32>
    %cst_222 = arith.constant 3.200000e+01 : f32
    %510 = vector.broadcast %cst_222 : f32 to vector<8x1xf32>
    %511 = arith.divf %509, %510 : vector<8x1xf32>
    %512 = vector.broadcast %504 : vector<8x1xf32> to vector<8x32xf32>
    %513 = arith.subf %500, %512 : vector<8x32xf32>
    %cst_223 = arith.constant 9.99999996E-13 : f32
    %514 = vector.broadcast %cst_223 : f32 to vector<8x1xf32>
    %515 = arith.addf %511, %514 : vector<8x1xf32>
    %516 = math.rsqrt %515 : vector<8x1xf32>
    %517 = vector.broadcast %516 : vector<8x1xf32> to vector<8x32xf32>
    %518 = arith.mulf %513, %517 : vector<8x32xf32>
    %519 = vector.broadcast %397 : vector<1x32xf32> to vector<8x32xf32>
    %520 = arith.mulf %518, %519 : vector<8x32xf32>
    %521 = vector.broadcast %399 : vector<1x32xf32> to vector<8x32xf32>
    %522 = arith.addf %520, %521 : vector<8x32xf32>
    %cst_224 = arith.constant dense<0.000000e+00> : vector<8x64xf32>
    %523 = tpu.matmul %522, %389, %cst_224 {dimension_numbers = #tpu.dot_dimension_numbers<[1], [0], [0], [1], [0, 0, 1, 1], [], []>} : vector<8x32xf32>, vector<32x64xf32>, vector<8x64xf32> -> vector<8x64xf32>
    %524 = vector.broadcast %401 : vector<1x64xf32> to vector<8x64xf32>
    %525 = arith.addf %523, %524 : vector<8x64xf32>
    %cst_225 = arith.constant 5.000000e-01 : f32
    %526 = vector.broadcast %cst_225 : f32 to vector<8x64xf32>
    %527 = arith.mulf %526, %525 : vector<8x64xf32>
    %cst_226 = arith.constant 2.000000e+00 : f32
    %528 = math.sqrt %cst_226 : f32
    %cst_227 = arith.constant 1.000000e+00 : f32
    %529 = arith.divf %cst_227, %528 : f32
    %530 = vector.broadcast %529 : f32 to vector<8x64xf32>
    %531 = arith.mulf %525, %530 : vector<8x64xf32>
    %532 = math.erf %531 : vector<8x64xf32>
    %cst_228 = arith.constant 1.000000e+00 : f32
    %533 = vector.broadcast %cst_228 : f32 to vector<8x64xf32>
    %534 = arith.addf %533, %532 : vector<8x64xf32>
    %535 = arith.mulf %527, %534 : vector<8x64xf32>
    %cst_229 = arith.constant dense<0.000000e+00> : vector<8x32xf32>
    %536 = tpu.matmul %535, %391, %cst_229 {dimension_numbers = #tpu.dot_dimension_numbers<[1], [0], [0], [1], [0, 0, 1, 1], [], []>} : vector<8x64xf32>, vector<64x32xf32>, vector<8x32xf32> -> vector<8x32xf32>
    %537 = vector.broadcast %403 : vector<1x32xf32> to vector<8x32xf32>
    %538 = arith.addf %536, %537 : vector<8x32xf32>
    %539 = arith.addf %522, %538 : vector<8x32xf32>
    %cst_230 = arith.constant dense<0.000000e+00> : vector<8xf32>
    %540 = vector.multi_reduction <add>, %539, %cst_230 [1] : vector<8x32xf32> to vector<8xf32>
    %541 = vector.shape_cast %540 : vector<8xf32> to vector<8x1xf32>
    %cst_231 = arith.constant 3.200000e+01 : f32
    %542 = vector.broadcast %cst_231 : f32 to vector<8x1xf32>
    %543 = arith.divf %541, %542 : vector<8x1xf32>
    %544 = vector.broadcast %543 : vector<8x1xf32> to vector<8x32xf32>
    %545 = arith.subf %539, %544 : vector<8x32xf32>
    %546 = arith.mulf %545, %545 : vector<8x32xf32>
    %cst_232 = arith.constant dense<0.000000e+00> : vector<8xf32>
    %547 = vector.multi_reduction <add>, %546, %cst_232 [1] : vector<8x32xf32> to vector<8xf32>
    %548 = vector.shape_cast %547 : vector<8xf32> to vector<8x1xf32>
    %cst_233 = arith.constant 3.200000e+01 : f32
    %549 = vector.broadcast %cst_233 : f32 to vector<8x1xf32>
    %550 = arith.divf %548, %549 : vector<8x1xf32>
    %551 = vector.broadcast %543 : vector<8x1xf32> to vector<8x32xf32>
    %552 = arith.subf %539, %551 : vector<8x32xf32>
    %cst_234 = arith.constant 9.99999996E-13 : f32
    %553 = vector.broadcast %cst_234 : f32 to vector<8x1xf32>
    %554 = arith.addf %550, %553 : vector<8x1xf32>
    %555 = math.rsqrt %554 : vector<8x1xf32>
    %556 = vector.broadcast %555 : vector<8x1xf32> to vector<8x32xf32>
    %557 = arith.mulf %552, %556 : vector<8x32xf32>
    %558 = vector.broadcast %405 : vector<1x32xf32> to vector<8x32xf32>
    %559 = arith.mulf %557, %558 : vector<8x32xf32>
    %560 = vector.broadcast %407 : vector<1x32xf32> to vector<8x32xf32>
    %561 = arith.addf %559, %560 : vector<8x32xf32>
    %c3 = arith.constant 3 : index
    %c0_235 = arith.constant 0 : index
    %c0_236 = arith.constant 0 : index
    %562 = vector.load %arg3[%c3, %c0_235, %c0_236] : memref<6x32x384xf32, #tpu.memory_space<vmem>>, vector<1x32x96xf32>
    %563 = vector.shape_cast %562 : vector<1x32x96xf32> to vector<32x96xf32>
    %c3_237 = arith.constant 3 : index
    %c0_238 = arith.constant 0 : index
    %c128_239 = arith.constant 128 : index
    %564 = vector.load %arg3[%c3_237, %c0_238, %c128_239] : memref<6x32x384xf32, #tpu.memory_space<vmem>>, vector<1x32x32xf32>
    %565 = vector.shape_cast %564 : vector<1x32x32xf32> to vector<32x32xf32>
    %c3_240 = arith.constant 3 : index
    %c0_241 = arith.constant 0 : index
    %c256_242 = arith.constant 256 : index
    %566 = vector.load %arg3[%c3_240, %c0_241, %c256_242] : memref<6x32x384xf32, #tpu.memory_space<vmem>>, vector<1x32x64xf32>
    %567 = vector.shape_cast %566 : vector<1x32x64xf32> to vector<32x64xf32>
    %c3_243 = arith.constant 3 : index
    %c0_244 = arith.constant 0 : index
    %c0_245 = arith.constant 0 : index
    %568 = vector.load %arg4[%c3_243, %c0_244, %c0_245] : memref<6x64x32xf32, #tpu.memory_space<vmem>>, vector<1x64x32xf32>
    %569 = vector.shape_cast %568 : vector<1x64x32xf32> to vector<64x32xf32>
    %c3_246 = arith.constant 3 : index
    %c0_247 = arith.constant 0 : index
    %c0_248 = arith.constant 0 : index
    %570 = vector.load %arg5[%c3_246, %c0_247, %c0_248] : memref<6x1x1024xf32, #tpu.memory_space<vmem>>, vector<1x1x96xf32>
    %571 = vector.shape_cast %570 : vector<1x1x96xf32> to vector<1x96xf32>
    %c3_249 = arith.constant 3 : index
    %c0_250 = arith.constant 0 : index
    %c128_251 = arith.constant 128 : index
    %572 = vector.load %arg5[%c3_249, %c0_250, %c128_251] : memref<6x1x1024xf32, #tpu.memory_space<vmem>>, vector<1x1x32xf32>
    %573 = vector.shape_cast %572 : vector<1x1x32xf32> to vector<1x32xf32>
    %c3_252 = arith.constant 3 : index
    %c0_253 = arith.constant 0 : index
    %c256_254 = arith.constant 256 : index
    %574 = vector.load %arg5[%c3_252, %c0_253, %c256_254] : memref<6x1x1024xf32, #tpu.memory_space<vmem>>, vector<1x1x32xf32>
    %575 = vector.shape_cast %574 : vector<1x1x32xf32> to vector<1x32xf32>
    %c3_255 = arith.constant 3 : index
    %c0_256 = arith.constant 0 : index
    %c384_257 = arith.constant 384 : index
    %576 = vector.load %arg5[%c3_255, %c0_256, %c384_257] : memref<6x1x1024xf32, #tpu.memory_space<vmem>>, vector<1x1x32xf32>
    %577 = vector.shape_cast %576 : vector<1x1x32xf32> to vector<1x32xf32>
    %c3_258 = arith.constant 3 : index
    %c0_259 = arith.constant 0 : index
    %c512_260 = arith.constant 512 : index
    %578 = vector.load %arg5[%c3_258, %c0_259, %c512_260] : memref<6x1x1024xf32, #tpu.memory_space<vmem>>, vector<1x1x64xf32>
    %579 = vector.shape_cast %578 : vector<1x1x64xf32> to vector<1x64xf32>
    %c3_261 = arith.constant 3 : index
    %c0_262 = arith.constant 0 : index
    %c640_263 = arith.constant 640 : index
    %580 = vector.load %arg5[%c3_261, %c0_262, %c640_263] : memref<6x1x1024xf32, #tpu.memory_space<vmem>>, vector<1x1x32xf32>
    %581 = vector.shape_cast %580 : vector<1x1x32xf32> to vector<1x32xf32>
    %c3_264 = arith.constant 3 : index
    %c0_265 = arith.constant 0 : index
    %c768_266 = arith.constant 768 : index
    %582 = vector.load %arg5[%c3_264, %c0_265, %c768_266] : memref<6x1x1024xf32, #tpu.memory_space<vmem>>, vector<1x1x32xf32>
    %583 = vector.shape_cast %582 : vector<1x1x32xf32> to vector<1x32xf32>
    %c3_267 = arith.constant 3 : index
    %c0_268 = arith.constant 0 : index
    %c896_269 = arith.constant 896 : index
    %584 = vector.load %arg5[%c3_267, %c0_268, %c896_269] : memref<6x1x1024xf32, #tpu.memory_space<vmem>>, vector<1x1x32xf32>
    %585 = vector.shape_cast %584 : vector<1x1x32xf32> to vector<1x32xf32>
    %cst_270 = arith.constant dense<0.000000e+00> : vector<8x96xf32>
    %586 = tpu.matmul %561, %563, %cst_270 {dimension_numbers = #tpu.dot_dimension_numbers<[1], [0], [0], [1], [0, 0, 1, 1], [], []>} : vector<8x32xf32>, vector<32x96xf32>, vector<8x96xf32> -> vector<8x96xf32>
    %587 = vector.broadcast %571 : vector<1x96xf32> to vector<8x96xf32>
    %588 = arith.addf %586, %587 : vector<8x96xf32>
    %589 = vector.extract_strided_slice %588 {offsets = [0, 0], sizes = [8, 8], strides = [1, 1]} : vector<8x96xf32> to vector<8x8xf32>
    %590 = vector.extract_strided_slice %588 {offsets = [0, 32], sizes = [8, 8], strides = [1, 1]} : vector<8x96xf32> to vector<8x8xf32>
    %591 = vector.extract_strided_slice %588 {offsets = [0, 64], sizes = [8, 8], strides = [1, 1]} : vector<8x96xf32> to vector<8x8xf32>
    %cst_271 = arith.constant dense<0.000000e+00> : vector<8x8xf32>
    %592 = tpu.matmul %589, %590, %cst_271 {dimension_numbers = #tpu.dot_dimension_numbers<[1], [1], [0], [0], [0, 0, 1, 0], [], []>} : vector<8x8xf32>, vector<8x8xf32>, vector<8x8xf32> -> vector<8x8xf32>
    %cst_272 = arith.constant 0.353553385 : f32
    %593 = vector.broadcast %cst_272 : f32 to vector<8x8xf32>
    %594 = arith.mulf %592, %593 : vector<8x8xf32>
    %595 = vector.broadcast %3 : vector<1x8xf32> to vector<8x8xf32>
    %596 = arith.addf %594, %595 : vector<8x8xf32>
    %cst_273 = arith.constant dense<0xFF800000> : vector<8xf32>
    %597 = vector.multi_reduction <maximumf>, %596, %cst_273 [1] : vector<8x8xf32> to vector<8xf32>
    %598 = vector.shape_cast %597 : vector<8xf32> to vector<8x1xf32>
    %599 = vector.broadcast %598 : vector<8x1xf32> to vector<8x8xf32>
    %600 = arith.subf %596, %599 : vector<8x8xf32>
    %601 = math.exp %600 : vector<8x8xf32>
    %cst_274 = arith.constant dense<0.000000e+00> : vector<8xf32>
    %602 = vector.multi_reduction <add>, %601, %cst_274 [1] : vector<8x8xf32> to vector<8xf32>
    %603 = vector.shape_cast %602 : vector<8xf32> to vector<8x1xf32>
    %604 = tpu.reciprocal %603 {approx = true} : vector<8x1xf32> -> vector<8x1xf32>
    %605 = vector.broadcast %604 : vector<8x1xf32> to vector<8x8xf32>
    %606 = arith.mulf %601, %605 : vector<8x8xf32>
    %cst_275 = arith.constant dense<0.000000e+00> : vector<8x8xf32>
    %607 = tpu.matmul %606, %591, %cst_275 {dimension_numbers = #tpu.dot_dimension_numbers<[1], [0], [0], [1], [0, 0, 1, 1], [], []>} : vector<8x8xf32>, vector<8x8xf32>, vector<8x8xf32> -> vector<8x8xf32>
    %608 = vector.extract_strided_slice %565 {offsets = [0, 0], sizes = [8, 32], strides = [1, 1]} : vector<32x32xf32> to vector<8x32xf32>
    %cst_276 = arith.constant dense<0.000000e+00> : vector<8x32xf32>
    %609 = tpu.matmul %607, %608, %cst_276 {dimension_numbers = #tpu.dot_dimension_numbers<[1], [0], [0], [1], [0, 0, 1, 1], [], []>} : vector<8x8xf32>, vector<8x32xf32>, vector<8x32xf32> -> vector<8x32xf32>
    %610 = vector.extract_strided_slice %588 {offsets = [0, 8], sizes = [8, 8], strides = [1, 1]} : vector<8x96xf32> to vector<8x8xf32>
    %611 = vector.extract_strided_slice %588 {offsets = [0, 40], sizes = [8, 8], strides = [1, 1]} : vector<8x96xf32> to vector<8x8xf32>
    %612 = vector.extract_strided_slice %588 {offsets = [0, 72], sizes = [8, 8], strides = [1, 1]} : vector<8x96xf32> to vector<8x8xf32>
    %cst_277 = arith.constant dense<0.000000e+00> : vector<8x8xf32>
    %613 = tpu.matmul %610, %611, %cst_277 {dimension_numbers = #tpu.dot_dimension_numbers<[1], [1], [0], [0], [0, 0, 1, 0], [], []>} : vector<8x8xf32>, vector<8x8xf32>, vector<8x8xf32> -> vector<8x8xf32>
    %cst_278 = arith.constant 0.353553385 : f32
    %614 = vector.broadcast %cst_278 : f32 to vector<8x8xf32>
    %615 = arith.mulf %613, %614 : vector<8x8xf32>
    %616 = vector.broadcast %3 : vector<1x8xf32> to vector<8x8xf32>
    %617 = arith.addf %615, %616 : vector<8x8xf32>
    %cst_279 = arith.constant dense<0xFF800000> : vector<8xf32>
    %618 = vector.multi_reduction <maximumf>, %617, %cst_279 [1] : vector<8x8xf32> to vector<8xf32>
    %619 = vector.shape_cast %618 : vector<8xf32> to vector<8x1xf32>
    %620 = vector.broadcast %619 : vector<8x1xf32> to vector<8x8xf32>
    %621 = arith.subf %617, %620 : vector<8x8xf32>
    %622 = math.exp %621 : vector<8x8xf32>
    %cst_280 = arith.constant dense<0.000000e+00> : vector<8xf32>
    %623 = vector.multi_reduction <add>, %622, %cst_280 [1] : vector<8x8xf32> to vector<8xf32>
    %624 = vector.shape_cast %623 : vector<8xf32> to vector<8x1xf32>
    %625 = tpu.reciprocal %624 {approx = true} : vector<8x1xf32> -> vector<8x1xf32>
    %626 = vector.broadcast %625 : vector<8x1xf32> to vector<8x8xf32>
    %627 = arith.mulf %622, %626 : vector<8x8xf32>
    %cst_281 = arith.constant dense<0.000000e+00> : vector<8x8xf32>
    %628 = tpu.matmul %627, %612, %cst_281 {dimension_numbers = #tpu.dot_dimension_numbers<[1], [0], [0], [1], [0, 0, 1, 1], [], []>} : vector<8x8xf32>, vector<8x8xf32>, vector<8x8xf32> -> vector<8x8xf32>
    %629 = vector.extract_strided_slice %565 {offsets = [8, 0], sizes = [8, 32], strides = [1, 1]} : vector<32x32xf32> to vector<8x32xf32>
    %cst_282 = arith.constant dense<0.000000e+00> : vector<8x32xf32>
    %630 = tpu.matmul %628, %629, %cst_282 {dimension_numbers = #tpu.dot_dimension_numbers<[1], [0], [0], [1], [0, 0, 1, 1], [], []>} : vector<8x8xf32>, vector<8x32xf32>, vector<8x32xf32> -> vector<8x32xf32>
    %631 = arith.addf %609, %630 : vector<8x32xf32>
    %632 = vector.extract_strided_slice %588 {offsets = [0, 16], sizes = [8, 8], strides = [1, 1]} : vector<8x96xf32> to vector<8x8xf32>
    %633 = vector.extract_strided_slice %588 {offsets = [0, 48], sizes = [8, 8], strides = [1, 1]} : vector<8x96xf32> to vector<8x8xf32>
    %634 = vector.extract_strided_slice %588 {offsets = [0, 80], sizes = [8, 8], strides = [1, 1]} : vector<8x96xf32> to vector<8x8xf32>
    %cst_283 = arith.constant dense<0.000000e+00> : vector<8x8xf32>
    %635 = tpu.matmul %632, %633, %cst_283 {dimension_numbers = #tpu.dot_dimension_numbers<[1], [1], [0], [0], [0, 0, 1, 0], [], []>} : vector<8x8xf32>, vector<8x8xf32>, vector<8x8xf32> -> vector<8x8xf32>
    %cst_284 = arith.constant 0.353553385 : f32
    %636 = vector.broadcast %cst_284 : f32 to vector<8x8xf32>
    %637 = arith.mulf %635, %636 : vector<8x8xf32>
    %638 = vector.broadcast %3 : vector<1x8xf32> to vector<8x8xf32>
    %639 = arith.addf %637, %638 : vector<8x8xf32>
    %cst_285 = arith.constant dense<0xFF800000> : vector<8xf32>
    %640 = vector.multi_reduction <maximumf>, %639, %cst_285 [1] : vector<8x8xf32> to vector<8xf32>
    %641 = vector.shape_cast %640 : vector<8xf32> to vector<8x1xf32>
    %642 = vector.broadcast %641 : vector<8x1xf32> to vector<8x8xf32>
    %643 = arith.subf %639, %642 : vector<8x8xf32>
    %644 = math.exp %643 : vector<8x8xf32>
    %cst_286 = arith.constant dense<0.000000e+00> : vector<8xf32>
    %645 = vector.multi_reduction <add>, %644, %cst_286 [1] : vector<8x8xf32> to vector<8xf32>
    %646 = vector.shape_cast %645 : vector<8xf32> to vector<8x1xf32>
    %647 = tpu.reciprocal %646 {approx = true} : vector<8x1xf32> -> vector<8x1xf32>
    %648 = vector.broadcast %647 : vector<8x1xf32> to vector<8x8xf32>
    %649 = arith.mulf %644, %648 : vector<8x8xf32>
    %cst_287 = arith.constant dense<0.000000e+00> : vector<8x8xf32>
    %650 = tpu.matmul %649, %634, %cst_287 {dimension_numbers = #tpu.dot_dimension_numbers<[1], [0], [0], [1], [0, 0, 1, 1], [], []>} : vector<8x8xf32>, vector<8x8xf32>, vector<8x8xf32> -> vector<8x8xf32>
    %651 = vector.extract_strided_slice %565 {offsets = [16, 0], sizes = [8, 32], strides = [1, 1]} : vector<32x32xf32> to vector<8x32xf32>
    %cst_288 = arith.constant dense<0.000000e+00> : vector<8x32xf32>
    %652 = tpu.matmul %650, %651, %cst_288 {dimension_numbers = #tpu.dot_dimension_numbers<[1], [0], [0], [1], [0, 0, 1, 1], [], []>} : vector<8x8xf32>, vector<8x32xf32>, vector<8x32xf32> -> vector<8x32xf32>
    %653 = arith.addf %631, %652 : vector<8x32xf32>
    %654 = vector.extract_strided_slice %588 {offsets = [0, 24], sizes = [8, 8], strides = [1, 1]} : vector<8x96xf32> to vector<8x8xf32>
    %655 = vector.extract_strided_slice %588 {offsets = [0, 56], sizes = [8, 8], strides = [1, 1]} : vector<8x96xf32> to vector<8x8xf32>
    %656 = vector.extract_strided_slice %588 {offsets = [0, 88], sizes = [8, 8], strides = [1, 1]} : vector<8x96xf32> to vector<8x8xf32>
    %cst_289 = arith.constant dense<0.000000e+00> : vector<8x8xf32>
    %657 = tpu.matmul %654, %655, %cst_289 {dimension_numbers = #tpu.dot_dimension_numbers<[1], [1], [0], [0], [0, 0, 1, 0], [], []>} : vector<8x8xf32>, vector<8x8xf32>, vector<8x8xf32> -> vector<8x8xf32>
    %cst_290 = arith.constant 0.353553385 : f32
    %658 = vector.broadcast %cst_290 : f32 to vector<8x8xf32>
    %659 = arith.mulf %657, %658 : vector<8x8xf32>
    %660 = vector.broadcast %3 : vector<1x8xf32> to vector<8x8xf32>
    %661 = arith.addf %659, %660 : vector<8x8xf32>
    %cst_291 = arith.constant dense<0xFF800000> : vector<8xf32>
    %662 = vector.multi_reduction <maximumf>, %661, %cst_291 [1] : vector<8x8xf32> to vector<8xf32>
    %663 = vector.shape_cast %662 : vector<8xf32> to vector<8x1xf32>
    %664 = vector.broadcast %663 : vector<8x1xf32> to vector<8x8xf32>
    %665 = arith.subf %661, %664 : vector<8x8xf32>
    %666 = math.exp %665 : vector<8x8xf32>
    %cst_292 = arith.constant dense<0.000000e+00> : vector<8xf32>
    %667 = vector.multi_reduction <add>, %666, %cst_292 [1] : vector<8x8xf32> to vector<8xf32>
    %668 = vector.shape_cast %667 : vector<8xf32> to vector<8x1xf32>
    %669 = tpu.reciprocal %668 {approx = true} : vector<8x1xf32> -> vector<8x1xf32>
    %670 = vector.broadcast %669 : vector<8x1xf32> to vector<8x8xf32>
    %671 = arith.mulf %666, %670 : vector<8x8xf32>
    %cst_293 = arith.constant dense<0.000000e+00> : vector<8x8xf32>
    %672 = tpu.matmul %671, %656, %cst_293 {dimension_numbers = #tpu.dot_dimension_numbers<[1], [0], [0], [1], [0, 0, 1, 1], [], []>} : vector<8x8xf32>, vector<8x8xf32>, vector<8x8xf32> -> vector<8x8xf32>
    %673 = vector.extract_strided_slice %565 {offsets = [24, 0], sizes = [8, 32], strides = [1, 1]} : vector<32x32xf32> to vector<8x32xf32>
    %cst_294 = arith.constant dense<0.000000e+00> : vector<8x32xf32>
    %674 = tpu.matmul %672, %673, %cst_294 {dimension_numbers = #tpu.dot_dimension_numbers<[1], [0], [0], [1], [0, 0, 1, 1], [], []>} : vector<8x8xf32>, vector<8x32xf32>, vector<8x32xf32> -> vector<8x32xf32>
    %675 = arith.addf %653, %674 : vector<8x32xf32>
    %676 = arith.addf %561, %675 : vector<8x32xf32>
    %677 = vector.broadcast %573 : vector<1x32xf32> to vector<8x32xf32>
    %678 = arith.addf %676, %677 : vector<8x32xf32>
    %cst_295 = arith.constant dense<0.000000e+00> : vector<8xf32>
    %679 = vector.multi_reduction <add>, %678, %cst_295 [1] : vector<8x32xf32> to vector<8xf32>
    %680 = vector.shape_cast %679 : vector<8xf32> to vector<8x1xf32>
    %cst_296 = arith.constant 3.200000e+01 : f32
    %681 = vector.broadcast %cst_296 : f32 to vector<8x1xf32>
    %682 = arith.divf %680, %681 : vector<8x1xf32>
    %683 = vector.broadcast %682 : vector<8x1xf32> to vector<8x32xf32>
    %684 = arith.subf %678, %683 : vector<8x32xf32>
    %685 = arith.mulf %684, %684 : vector<8x32xf32>
    %cst_297 = arith.constant dense<0.000000e+00> : vector<8xf32>
    %686 = vector.multi_reduction <add>, %685, %cst_297 [1] : vector<8x32xf32> to vector<8xf32>
    %687 = vector.shape_cast %686 : vector<8xf32> to vector<8x1xf32>
    %cst_298 = arith.constant 3.200000e+01 : f32
    %688 = vector.broadcast %cst_298 : f32 to vector<8x1xf32>
    %689 = arith.divf %687, %688 : vector<8x1xf32>
    %690 = vector.broadcast %682 : vector<8x1xf32> to vector<8x32xf32>
    %691 = arith.subf %678, %690 : vector<8x32xf32>
    %cst_299 = arith.constant 9.99999996E-13 : f32
    %692 = vector.broadcast %cst_299 : f32 to vector<8x1xf32>
    %693 = arith.addf %689, %692 : vector<8x1xf32>
    %694 = math.rsqrt %693 : vector<8x1xf32>
    %695 = vector.broadcast %694 : vector<8x1xf32> to vector<8x32xf32>
    %696 = arith.mulf %691, %695 : vector<8x32xf32>
    %697 = vector.broadcast %575 : vector<1x32xf32> to vector<8x32xf32>
    %698 = arith.mulf %696, %697 : vector<8x32xf32>
    %699 = vector.broadcast %577 : vector<1x32xf32> to vector<8x32xf32>
    %700 = arith.addf %698, %699 : vector<8x32xf32>
    %cst_300 = arith.constant dense<0.000000e+00> : vector<8x64xf32>
    %701 = tpu.matmul %700, %567, %cst_300 {dimension_numbers = #tpu.dot_dimension_numbers<[1], [0], [0], [1], [0, 0, 1, 1], [], []>} : vector<8x32xf32>, vector<32x64xf32>, vector<8x64xf32> -> vector<8x64xf32>
    %702 = vector.broadcast %579 : vector<1x64xf32> to vector<8x64xf32>
    %703 = arith.addf %701, %702 : vector<8x64xf32>
    %cst_301 = arith.constant 5.000000e-01 : f32
    %704 = vector.broadcast %cst_301 : f32 to vector<8x64xf32>
    %705 = arith.mulf %704, %703 : vector<8x64xf32>
    %cst_302 = arith.constant 2.000000e+00 : f32
    %706 = math.sqrt %cst_302 : f32
    %cst_303 = arith.constant 1.000000e+00 : f32
    %707 = arith.divf %cst_303, %706 : f32
    %708 = vector.broadcast %707 : f32 to vector<8x64xf32>
    %709 = arith.mulf %703, %708 : vector<8x64xf32>
    %710 = math.erf %709 : vector<8x64xf32>
    %cst_304 = arith.constant 1.000000e+00 : f32
    %711 = vector.broadcast %cst_304 : f32 to vector<8x64xf32>
    %712 = arith.addf %711, %710 : vector<8x64xf32>
    %713 = arith.mulf %705, %712 : vector<8x64xf32>
    %cst_305 = arith.constant dense<0.000000e+00> : vector<8x32xf32>
    %714 = tpu.matmul %713, %569, %cst_305 {dimension_numbers = #tpu.dot_dimension_numbers<[1], [0], [0], [1], [0, 0, 1, 1], [], []>} : vector<8x64xf32>, vector<64x32xf32>, vector<8x32xf32> -> vector<8x32xf32>
    %715 = vector.broadcast %581 : vector<1x32xf32> to vector<8x32xf32>
    %716 = arith.addf %714, %715 : vector<8x32xf32>
    %717 = arith.addf %700, %716 : vector<8x32xf32>
    %cst_306 = arith.constant dense<0.000000e+00> : vector<8xf32>
    %718 = vector.multi_reduction <add>, %717, %cst_306 [1] : vector<8x32xf32> to vector<8xf32>
    %719 = vector.shape_cast %718 : vector<8xf32> to vector<8x1xf32>
    %cst_307 = arith.constant 3.200000e+01 : f32
    %720 = vector.broadcast %cst_307 : f32 to vector<8x1xf32>
    %721 = arith.divf %719, %720 : vector<8x1xf32>
    %722 = vector.broadcast %721 : vector<8x1xf32> to vector<8x32xf32>
    %723 = arith.subf %717, %722 : vector<8x32xf32>
    %724 = arith.mulf %723, %723 : vector<8x32xf32>
    %cst_308 = arith.constant dense<0.000000e+00> : vector<8xf32>
    %725 = vector.multi_reduction <add>, %724, %cst_308 [1] : vector<8x32xf32> to vector<8xf32>
    %726 = vector.shape_cast %725 : vector<8xf32> to vector<8x1xf32>
    %cst_309 = arith.constant 3.200000e+01 : f32
    %727 = vector.broadcast %cst_309 : f32 to vector<8x1xf32>
    %728 = arith.divf %726, %727 : vector<8x1xf32>
    %729 = vector.broadcast %721 : vector<8x1xf32> to vector<8x32xf32>
    %730 = arith.subf %717, %729 : vector<8x32xf32>
    %cst_310 = arith.constant 9.99999996E-13 : f32
    %731 = vector.broadcast %cst_310 : f32 to vector<8x1xf32>
    %732 = arith.addf %728, %731 : vector<8x1xf32>
    %733 = math.rsqrt %732 : vector<8x1xf32>
    %734 = vector.broadcast %733 : vector<8x1xf32> to vector<8x32xf32>
    %735 = arith.mulf %730, %734 : vector<8x32xf32>
    %736 = vector.broadcast %583 : vector<1x32xf32> to vector<8x32xf32>
    %737 = arith.mulf %735, %736 : vector<8x32xf32>
    %738 = vector.broadcast %585 : vector<1x32xf32> to vector<8x32xf32>
    %739 = arith.addf %737, %738 : vector<8x32xf32>
    %c4 = arith.constant 4 : index
    %c0_311 = arith.constant 0 : index
    %c0_312 = arith.constant 0 : index
    %740 = vector.load %arg3[%c4, %c0_311, %c0_312] : memref<6x32x384xf32, #tpu.memory_space<vmem>>, vector<1x32x96xf32>
    %741 = vector.shape_cast %740 : vector<1x32x96xf32> to vector<32x96xf32>
    %c4_313 = arith.constant 4 : index
    %c0_314 = arith.constant 0 : index
    %c128_315 = arith.constant 128 : index
    %742 = vector.load %arg3[%c4_313, %c0_314, %c128_315] : memref<6x32x384xf32, #tpu.memory_space<vmem>>, vector<1x32x32xf32>
    %743 = vector.shape_cast %742 : vector<1x32x32xf32> to vector<32x32xf32>
    %c4_316 = arith.constant 4 : index
    %c0_317 = arith.constant 0 : index
    %c256_318 = arith.constant 256 : index
    %744 = vector.load %arg3[%c4_316, %c0_317, %c256_318] : memref<6x32x384xf32, #tpu.memory_space<vmem>>, vector<1x32x64xf32>
    %745 = vector.shape_cast %744 : vector<1x32x64xf32> to vector<32x64xf32>
    %c4_319 = arith.constant 4 : index
    %c0_320 = arith.constant 0 : index
    %c0_321 = arith.constant 0 : index
    %746 = vector.load %arg4[%c4_319, %c0_320, %c0_321] : memref<6x64x32xf32, #tpu.memory_space<vmem>>, vector<1x64x32xf32>
    %747 = vector.shape_cast %746 : vector<1x64x32xf32> to vector<64x32xf32>
    %c4_322 = arith.constant 4 : index
    %c0_323 = arith.constant 0 : index
    %c0_324 = arith.constant 0 : index
    %748 = vector.load %arg5[%c4_322, %c0_323, %c0_324] : memref<6x1x1024xf32, #tpu.memory_space<vmem>>, vector<1x1x96xf32>
    %749 = vector.shape_cast %748 : vector<1x1x96xf32> to vector<1x96xf32>
    %c4_325 = arith.constant 4 : index
    %c0_326 = arith.constant 0 : index
    %c128_327 = arith.constant 128 : index
    %750 = vector.load %arg5[%c4_325, %c0_326, %c128_327] : memref<6x1x1024xf32, #tpu.memory_space<vmem>>, vector<1x1x32xf32>
    %751 = vector.shape_cast %750 : vector<1x1x32xf32> to vector<1x32xf32>
    %c4_328 = arith.constant 4 : index
    %c0_329 = arith.constant 0 : index
    %c256_330 = arith.constant 256 : index
    %752 = vector.load %arg5[%c4_328, %c0_329, %c256_330] : memref<6x1x1024xf32, #tpu.memory_space<vmem>>, vector<1x1x32xf32>
    %753 = vector.shape_cast %752 : vector<1x1x32xf32> to vector<1x32xf32>
    %c4_331 = arith.constant 4 : index
    %c0_332 = arith.constant 0 : index
    %c384_333 = arith.constant 384 : index
    %754 = vector.load %arg5[%c4_331, %c0_332, %c384_333] : memref<6x1x1024xf32, #tpu.memory_space<vmem>>, vector<1x1x32xf32>
    %755 = vector.shape_cast %754 : vector<1x1x32xf32> to vector<1x32xf32>
    %c4_334 = arith.constant 4 : index
    %c0_335 = arith.constant 0 : index
    %c512_336 = arith.constant 512 : index
    %756 = vector.load %arg5[%c4_334, %c0_335, %c512_336] : memref<6x1x1024xf32, #tpu.memory_space<vmem>>, vector<1x1x64xf32>
    %757 = vector.shape_cast %756 : vector<1x1x64xf32> to vector<1x64xf32>
    %c4_337 = arith.constant 4 : index
    %c0_338 = arith.constant 0 : index
    %c640_339 = arith.constant 640 : index
    %758 = vector.load %arg5[%c4_337, %c0_338, %c640_339] : memref<6x1x1024xf32, #tpu.memory_space<vmem>>, vector<1x1x32xf32>
    %759 = vector.shape_cast %758 : vector<1x1x32xf32> to vector<1x32xf32>
    %c4_340 = arith.constant 4 : index
    %c0_341 = arith.constant 0 : index
    %c768_342 = arith.constant 768 : index
    %760 = vector.load %arg5[%c4_340, %c0_341, %c768_342] : memref<6x1x1024xf32, #tpu.memory_space<vmem>>, vector<1x1x32xf32>
    %761 = vector.shape_cast %760 : vector<1x1x32xf32> to vector<1x32xf32>
    %c4_343 = arith.constant 4 : index
    %c0_344 = arith.constant 0 : index
    %c896_345 = arith.constant 896 : index
    %762 = vector.load %arg5[%c4_343, %c0_344, %c896_345] : memref<6x1x1024xf32, #tpu.memory_space<vmem>>, vector<1x1x32xf32>
    %763 = vector.shape_cast %762 : vector<1x1x32xf32> to vector<1x32xf32>
    %cst_346 = arith.constant dense<0.000000e+00> : vector<8x96xf32>
    %764 = tpu.matmul %739, %741, %cst_346 {dimension_numbers = #tpu.dot_dimension_numbers<[1], [0], [0], [1], [0, 0, 1, 1], [], []>} : vector<8x32xf32>, vector<32x96xf32>, vector<8x96xf32> -> vector<8x96xf32>
    %765 = vector.broadcast %749 : vector<1x96xf32> to vector<8x96xf32>
    %766 = arith.addf %764, %765 : vector<8x96xf32>
    %767 = vector.extract_strided_slice %766 {offsets = [0, 0], sizes = [8, 8], strides = [1, 1]} : vector<8x96xf32> to vector<8x8xf32>
    %768 = vector.extract_strided_slice %766 {offsets = [0, 32], sizes = [8, 8], strides = [1, 1]} : vector<8x96xf32> to vector<8x8xf32>
    %769 = vector.extract_strided_slice %766 {offsets = [0, 64], sizes = [8, 8], strides = [1, 1]} : vector<8x96xf32> to vector<8x8xf32>
    %cst_347 = arith.constant dense<0.000000e+00> : vector<8x8xf32>
    %770 = tpu.matmul %767, %768, %cst_347 {dimension_numbers = #tpu.dot_dimension_numbers<[1], [1], [0], [0], [0, 0, 1, 0], [], []>} : vector<8x8xf32>, vector<8x8xf32>, vector<8x8xf32> -> vector<8x8xf32>
    %cst_348 = arith.constant 0.353553385 : f32
    %771 = vector.broadcast %cst_348 : f32 to vector<8x8xf32>
    %772 = arith.mulf %770, %771 : vector<8x8xf32>
    %773 = vector.broadcast %3 : vector<1x8xf32> to vector<8x8xf32>
    %774 = arith.addf %772, %773 : vector<8x8xf32>
    %cst_349 = arith.constant dense<0xFF800000> : vector<8xf32>
    %775 = vector.multi_reduction <maximumf>, %774, %cst_349 [1] : vector<8x8xf32> to vector<8xf32>
    %776 = vector.shape_cast %775 : vector<8xf32> to vector<8x1xf32>
    %777 = vector.broadcast %776 : vector<8x1xf32> to vector<8x8xf32>
    %778 = arith.subf %774, %777 : vector<8x8xf32>
    %779 = math.exp %778 : vector<8x8xf32>
    %cst_350 = arith.constant dense<0.000000e+00> : vector<8xf32>
    %780 = vector.multi_reduction <add>, %779, %cst_350 [1] : vector<8x8xf32> to vector<8xf32>
    %781 = vector.shape_cast %780 : vector<8xf32> to vector<8x1xf32>
    %782 = tpu.reciprocal %781 {approx = true} : vector<8x1xf32> -> vector<8x1xf32>
    %783 = vector.broadcast %782 : vector<8x1xf32> to vector<8x8xf32>
    %784 = arith.mulf %779, %783 : vector<8x8xf32>
    %cst_351 = arith.constant dense<0.000000e+00> : vector<8x8xf32>
    %785 = tpu.matmul %784, %769, %cst_351 {dimension_numbers = #tpu.dot_dimension_numbers<[1], [0], [0], [1], [0, 0, 1, 1], [], []>} : vector<8x8xf32>, vector<8x8xf32>, vector<8x8xf32> -> vector<8x8xf32>
    %786 = vector.extract_strided_slice %743 {offsets = [0, 0], sizes = [8, 32], strides = [1, 1]} : vector<32x32xf32> to vector<8x32xf32>
    %cst_352 = arith.constant dense<0.000000e+00> : vector<8x32xf32>
    %787 = tpu.matmul %785, %786, %cst_352 {dimension_numbers = #tpu.dot_dimension_numbers<[1], [0], [0], [1], [0, 0, 1, 1], [], []>} : vector<8x8xf32>, vector<8x32xf32>, vector<8x32xf32> -> vector<8x32xf32>
    %788 = vector.extract_strided_slice %766 {offsets = [0, 8], sizes = [8, 8], strides = [1, 1]} : vector<8x96xf32> to vector<8x8xf32>
    %789 = vector.extract_strided_slice %766 {offsets = [0, 40], sizes = [8, 8], strides = [1, 1]} : vector<8x96xf32> to vector<8x8xf32>
    %790 = vector.extract_strided_slice %766 {offsets = [0, 72], sizes = [8, 8], strides = [1, 1]} : vector<8x96xf32> to vector<8x8xf32>
    %cst_353 = arith.constant dense<0.000000e+00> : vector<8x8xf32>
    %791 = tpu.matmul %788, %789, %cst_353 {dimension_numbers = #tpu.dot_dimension_numbers<[1], [1], [0], [0], [0, 0, 1, 0], [], []>} : vector<8x8xf32>, vector<8x8xf32>, vector<8x8xf32> -> vector<8x8xf32>
    %cst_354 = arith.constant 0.353553385 : f32
    %792 = vector.broadcast %cst_354 : f32 to vector<8x8xf32>
    %793 = arith.mulf %791, %792 : vector<8x8xf32>
    %794 = vector.broadcast %3 : vector<1x8xf32> to vector<8x8xf32>
    %795 = arith.addf %793, %794 : vector<8x8xf32>
    %cst_355 = arith.constant dense<0xFF800000> : vector<8xf32>
    %796 = vector.multi_reduction <maximumf>, %795, %cst_355 [1] : vector<8x8xf32> to vector<8xf32>
    %797 = vector.shape_cast %796 : vector<8xf32> to vector<8x1xf32>
    %798 = vector.broadcast %797 : vector<8x1xf32> to vector<8x8xf32>
    %799 = arith.subf %795, %798 : vector<8x8xf32>
    %800 = math.exp %799 : vector<8x8xf32>
    %cst_356 = arith.constant dense<0.000000e+00> : vector<8xf32>
    %801 = vector.multi_reduction <add>, %800, %cst_356 [1] : vector<8x8xf32> to vector<8xf32>
    %802 = vector.shape_cast %801 : vector<8xf32> to vector<8x1xf32>
    %803 = tpu.reciprocal %802 {approx = true} : vector<8x1xf32> -> vector<8x1xf32>
    %804 = vector.broadcast %803 : vector<8x1xf32> to vector<8x8xf32>
    %805 = arith.mulf %800, %804 : vector<8x8xf32>
    %cst_357 = arith.constant dense<0.000000e+00> : vector<8x8xf32>
    %806 = tpu.matmul %805, %790, %cst_357 {dimension_numbers = #tpu.dot_dimension_numbers<[1], [0], [0], [1], [0, 0, 1, 1], [], []>} : vector<8x8xf32>, vector<8x8xf32>, vector<8x8xf32> -> vector<8x8xf32>
    %807 = vector.extract_strided_slice %743 {offsets = [8, 0], sizes = [8, 32], strides = [1, 1]} : vector<32x32xf32> to vector<8x32xf32>
    %cst_358 = arith.constant dense<0.000000e+00> : vector<8x32xf32>
    %808 = tpu.matmul %806, %807, %cst_358 {dimension_numbers = #tpu.dot_dimension_numbers<[1], [0], [0], [1], [0, 0, 1, 1], [], []>} : vector<8x8xf32>, vector<8x32xf32>, vector<8x32xf32> -> vector<8x32xf32>
    %809 = arith.addf %787, %808 : vector<8x32xf32>
    %810 = vector.extract_strided_slice %766 {offsets = [0, 16], sizes = [8, 8], strides = [1, 1]} : vector<8x96xf32> to vector<8x8xf32>
    %811 = vector.extract_strided_slice %766 {offsets = [0, 48], sizes = [8, 8], strides = [1, 1]} : vector<8x96xf32> to vector<8x8xf32>
    %812 = vector.extract_strided_slice %766 {offsets = [0, 80], sizes = [8, 8], strides = [1, 1]} : vector<8x96xf32> to vector<8x8xf32>
    %cst_359 = arith.constant dense<0.000000e+00> : vector<8x8xf32>
    %813 = tpu.matmul %810, %811, %cst_359 {dimension_numbers = #tpu.dot_dimension_numbers<[1], [1], [0], [0], [0, 0, 1, 0], [], []>} : vector<8x8xf32>, vector<8x8xf32>, vector<8x8xf32> -> vector<8x8xf32>
    %cst_360 = arith.constant 0.353553385 : f32
    %814 = vector.broadcast %cst_360 : f32 to vector<8x8xf32>
    %815 = arith.mulf %813, %814 : vector<8x8xf32>
    %816 = vector.broadcast %3 : vector<1x8xf32> to vector<8x8xf32>
    %817 = arith.addf %815, %816 : vector<8x8xf32>
    %cst_361 = arith.constant dense<0xFF800000> : vector<8xf32>
    %818 = vector.multi_reduction <maximumf>, %817, %cst_361 [1] : vector<8x8xf32> to vector<8xf32>
    %819 = vector.shape_cast %818 : vector<8xf32> to vector<8x1xf32>
    %820 = vector.broadcast %819 : vector<8x1xf32> to vector<8x8xf32>
    %821 = arith.subf %817, %820 : vector<8x8xf32>
    %822 = math.exp %821 : vector<8x8xf32>
    %cst_362 = arith.constant dense<0.000000e+00> : vector<8xf32>
    %823 = vector.multi_reduction <add>, %822, %cst_362 [1] : vector<8x8xf32> to vector<8xf32>
    %824 = vector.shape_cast %823 : vector<8xf32> to vector<8x1xf32>
    %825 = tpu.reciprocal %824 {approx = true} : vector<8x1xf32> -> vector<8x1xf32>
    %826 = vector.broadcast %825 : vector<8x1xf32> to vector<8x8xf32>
    %827 = arith.mulf %822, %826 : vector<8x8xf32>
    %cst_363 = arith.constant dense<0.000000e+00> : vector<8x8xf32>
    %828 = tpu.matmul %827, %812, %cst_363 {dimension_numbers = #tpu.dot_dimension_numbers<[1], [0], [0], [1], [0, 0, 1, 1], [], []>} : vector<8x8xf32>, vector<8x8xf32>, vector<8x8xf32> -> vector<8x8xf32>
    %829 = vector.extract_strided_slice %743 {offsets = [16, 0], sizes = [8, 32], strides = [1, 1]} : vector<32x32xf32> to vector<8x32xf32>
    %cst_364 = arith.constant dense<0.000000e+00> : vector<8x32xf32>
    %830 = tpu.matmul %828, %829, %cst_364 {dimension_numbers = #tpu.dot_dimension_numbers<[1], [0], [0], [1], [0, 0, 1, 1], [], []>} : vector<8x8xf32>, vector<8x32xf32>, vector<8x32xf32> -> vector<8x32xf32>
    %831 = arith.addf %809, %830 : vector<8x32xf32>
    %832 = vector.extract_strided_slice %766 {offsets = [0, 24], sizes = [8, 8], strides = [1, 1]} : vector<8x96xf32> to vector<8x8xf32>
    %833 = vector.extract_strided_slice %766 {offsets = [0, 56], sizes = [8, 8], strides = [1, 1]} : vector<8x96xf32> to vector<8x8xf32>
    %834 = vector.extract_strided_slice %766 {offsets = [0, 88], sizes = [8, 8], strides = [1, 1]} : vector<8x96xf32> to vector<8x8xf32>
    %cst_365 = arith.constant dense<0.000000e+00> : vector<8x8xf32>
    %835 = tpu.matmul %832, %833, %cst_365 {dimension_numbers = #tpu.dot_dimension_numbers<[1], [1], [0], [0], [0, 0, 1, 0], [], []>} : vector<8x8xf32>, vector<8x8xf32>, vector<8x8xf32> -> vector<8x8xf32>
    %cst_366 = arith.constant 0.353553385 : f32
    %836 = vector.broadcast %cst_366 : f32 to vector<8x8xf32>
    %837 = arith.mulf %835, %836 : vector<8x8xf32>
    %838 = vector.broadcast %3 : vector<1x8xf32> to vector<8x8xf32>
    %839 = arith.addf %837, %838 : vector<8x8xf32>
    %cst_367 = arith.constant dense<0xFF800000> : vector<8xf32>
    %840 = vector.multi_reduction <maximumf>, %839, %cst_367 [1] : vector<8x8xf32> to vector<8xf32>
    %841 = vector.shape_cast %840 : vector<8xf32> to vector<8x1xf32>
    %842 = vector.broadcast %841 : vector<8x1xf32> to vector<8x8xf32>
    %843 = arith.subf %839, %842 : vector<8x8xf32>
    %844 = math.exp %843 : vector<8x8xf32>
    %cst_368 = arith.constant dense<0.000000e+00> : vector<8xf32>
    %845 = vector.multi_reduction <add>, %844, %cst_368 [1] : vector<8x8xf32> to vector<8xf32>
    %846 = vector.shape_cast %845 : vector<8xf32> to vector<8x1xf32>
    %847 = tpu.reciprocal %846 {approx = true} : vector<8x1xf32> -> vector<8x1xf32>
    %848 = vector.broadcast %847 : vector<8x1xf32> to vector<8x8xf32>
    %849 = arith.mulf %844, %848 : vector<8x8xf32>
    %cst_369 = arith.constant dense<0.000000e+00> : vector<8x8xf32>
    %850 = tpu.matmul %849, %834, %cst_369 {dimension_numbers = #tpu.dot_dimension_numbers<[1], [0], [0], [1], [0, 0, 1, 1], [], []>} : vector<8x8xf32>, vector<8x8xf32>, vector<8x8xf32> -> vector<8x8xf32>
    %851 = vector.extract_strided_slice %743 {offsets = [24, 0], sizes = [8, 32], strides = [1, 1]} : vector<32x32xf32> to vector<8x32xf32>
    %cst_370 = arith.constant dense<0.000000e+00> : vector<8x32xf32>
    %852 = tpu.matmul %850, %851, %cst_370 {dimension_numbers = #tpu.dot_dimension_numbers<[1], [0], [0], [1], [0, 0, 1, 1], [], []>} : vector<8x8xf32>, vector<8x32xf32>, vector<8x32xf32> -> vector<8x32xf32>
    %853 = arith.addf %831, %852 : vector<8x32xf32>
    %854 = arith.addf %739, %853 : vector<8x32xf32>
    %855 = vector.broadcast %751 : vector<1x32xf32> to vector<8x32xf32>
    %856 = arith.addf %854, %855 : vector<8x32xf32>
    %cst_371 = arith.constant dense<0.000000e+00> : vector<8xf32>
    %857 = vector.multi_reduction <add>, %856, %cst_371 [1] : vector<8x32xf32> to vector<8xf32>
    %858 = vector.shape_cast %857 : vector<8xf32> to vector<8x1xf32>
    %cst_372 = arith.constant 3.200000e+01 : f32
    %859 = vector.broadcast %cst_372 : f32 to vector<8x1xf32>
    %860 = arith.divf %858, %859 : vector<8x1xf32>
    %861 = vector.broadcast %860 : vector<8x1xf32> to vector<8x32xf32>
    %862 = arith.subf %856, %861 : vector<8x32xf32>
    %863 = arith.mulf %862, %862 : vector<8x32xf32>
    %cst_373 = arith.constant dense<0.000000e+00> : vector<8xf32>
    %864 = vector.multi_reduction <add>, %863, %cst_373 [1] : vector<8x32xf32> to vector<8xf32>
    %865 = vector.shape_cast %864 : vector<8xf32> to vector<8x1xf32>
    %cst_374 = arith.constant 3.200000e+01 : f32
    %866 = vector.broadcast %cst_374 : f32 to vector<8x1xf32>
    %867 = arith.divf %865, %866 : vector<8x1xf32>
    %868 = vector.broadcast %860 : vector<8x1xf32> to vector<8x32xf32>
    %869 = arith.subf %856, %868 : vector<8x32xf32>
    %cst_375 = arith.constant 9.99999996E-13 : f32
    %870 = vector.broadcast %cst_375 : f32 to vector<8x1xf32>
    %871 = arith.addf %867, %870 : vector<8x1xf32>
    %872 = math.rsqrt %871 : vector<8x1xf32>
    %873 = vector.broadcast %872 : vector<8x1xf32> to vector<8x32xf32>
    %874 = arith.mulf %869, %873 : vector<8x32xf32>
    %875 = vector.broadcast %753 : vector<1x32xf32> to vector<8x32xf32>
    %876 = arith.mulf %874, %875 : vector<8x32xf32>
    %877 = vector.broadcast %755 : vector<1x32xf32> to vector<8x32xf32>
    %878 = arith.addf %876, %877 : vector<8x32xf32>
    %cst_376 = arith.constant dense<0.000000e+00> : vector<8x64xf32>
    %879 = tpu.matmul %878, %745, %cst_376 {dimension_numbers = #tpu.dot_dimension_numbers<[1], [0], [0], [1], [0, 0, 1, 1], [], []>} : vector<8x32xf32>, vector<32x64xf32>, vector<8x64xf32> -> vector<8x64xf32>
    %880 = vector.broadcast %757 : vector<1x64xf32> to vector<8x64xf32>
    %881 = arith.addf %879, %880 : vector<8x64xf32>
    %cst_377 = arith.constant 5.000000e-01 : f32
    %882 = vector.broadcast %cst_377 : f32 to vector<8x64xf32>
    %883 = arith.mulf %882, %881 : vector<8x64xf32>
    %cst_378 = arith.constant 2.000000e+00 : f32
    %884 = math.sqrt %cst_378 : f32
    %cst_379 = arith.constant 1.000000e+00 : f32
    %885 = arith.divf %cst_379, %884 : f32
    %886 = vector.broadcast %885 : f32 to vector<8x64xf32>
    %887 = arith.mulf %881, %886 : vector<8x64xf32>
    %888 = math.erf %887 : vector<8x64xf32>
    %cst_380 = arith.constant 1.000000e+00 : f32
    %889 = vector.broadcast %cst_380 : f32 to vector<8x64xf32>
    %890 = arith.addf %889, %888 : vector<8x64xf32>
    %891 = arith.mulf %883, %890 : vector<8x64xf32>
    %cst_381 = arith.constant dense<0.000000e+00> : vector<8x32xf32>
    %892 = tpu.matmul %891, %747, %cst_381 {dimension_numbers = #tpu.dot_dimension_numbers<[1], [0], [0], [1], [0, 0, 1, 1], [], []>} : vector<8x64xf32>, vector<64x32xf32>, vector<8x32xf32> -> vector<8x32xf32>
    %893 = vector.broadcast %759 : vector<1x32xf32> to vector<8x32xf32>
    %894 = arith.addf %892, %893 : vector<8x32xf32>
    %895 = arith.addf %878, %894 : vector<8x32xf32>
    %cst_382 = arith.constant dense<0.000000e+00> : vector<8xf32>
    %896 = vector.multi_reduction <add>, %895, %cst_382 [1] : vector<8x32xf32> to vector<8xf32>
    %897 = vector.shape_cast %896 : vector<8xf32> to vector<8x1xf32>
    %cst_383 = arith.constant 3.200000e+01 : f32
    %898 = vector.broadcast %cst_383 : f32 to vector<8x1xf32>
    %899 = arith.divf %897, %898 : vector<8x1xf32>
    %900 = vector.broadcast %899 : vector<8x1xf32> to vector<8x32xf32>
    %901 = arith.subf %895, %900 : vector<8x32xf32>
    %902 = arith.mulf %901, %901 : vector<8x32xf32>
    %cst_384 = arith.constant dense<0.000000e+00> : vector<8xf32>
    %903 = vector.multi_reduction <add>, %902, %cst_384 [1] : vector<8x32xf32> to vector<8xf32>
    %904 = vector.shape_cast %903 : vector<8xf32> to vector<8x1xf32>
    %cst_385 = arith.constant 3.200000e+01 : f32
    %905 = vector.broadcast %cst_385 : f32 to vector<8x1xf32>
    %906 = arith.divf %904, %905 : vector<8x1xf32>
    %907 = vector.broadcast %899 : vector<8x1xf32> to vector<8x32xf32>
    %908 = arith.subf %895, %907 : vector<8x32xf32>
    %cst_386 = arith.constant 9.99999996E-13 : f32
    %909 = vector.broadcast %cst_386 : f32 to vector<8x1xf32>
    %910 = arith.addf %906, %909 : vector<8x1xf32>
    %911 = math.rsqrt %910 : vector<8x1xf32>
    %912 = vector.broadcast %911 : vector<8x1xf32> to vector<8x32xf32>
    %913 = arith.mulf %908, %912 : vector<8x32xf32>
    %914 = vector.broadcast %761 : vector<1x32xf32> to vector<8x32xf32>
    %915 = arith.mulf %913, %914 : vector<8x32xf32>
    %916 = vector.broadcast %763 : vector<1x32xf32> to vector<8x32xf32>
    %917 = arith.addf %915, %916 : vector<8x32xf32>
    %c5 = arith.constant 5 : index
    %c0_387 = arith.constant 0 : index
    %c0_388 = arith.constant 0 : index
    %918 = vector.load %arg3[%c5, %c0_387, %c0_388] : memref<6x32x384xf32, #tpu.memory_space<vmem>>, vector<1x32x96xf32>
    %919 = vector.shape_cast %918 : vector<1x32x96xf32> to vector<32x96xf32>
    %c5_389 = arith.constant 5 : index
    %c0_390 = arith.constant 0 : index
    %c128_391 = arith.constant 128 : index
    %920 = vector.load %arg3[%c5_389, %c0_390, %c128_391] : memref<6x32x384xf32, #tpu.memory_space<vmem>>, vector<1x32x32xf32>
    %921 = vector.shape_cast %920 : vector<1x32x32xf32> to vector<32x32xf32>
    %c5_392 = arith.constant 5 : index
    %c0_393 = arith.constant 0 : index
    %c256_394 = arith.constant 256 : index
    %922 = vector.load %arg3[%c5_392, %c0_393, %c256_394] : memref<6x32x384xf32, #tpu.memory_space<vmem>>, vector<1x32x64xf32>
    %923 = vector.shape_cast %922 : vector<1x32x64xf32> to vector<32x64xf32>
    %c5_395 = arith.constant 5 : index
    %c0_396 = arith.constant 0 : index
    %c0_397 = arith.constant 0 : index
    %924 = vector.load %arg4[%c5_395, %c0_396, %c0_397] : memref<6x64x32xf32, #tpu.memory_space<vmem>>, vector<1x64x32xf32>
    %925 = vector.shape_cast %924 : vector<1x64x32xf32> to vector<64x32xf32>
    %c5_398 = arith.constant 5 : index
    %c0_399 = arith.constant 0 : index
    %c0_400 = arith.constant 0 : index
    %926 = vector.load %arg5[%c5_398, %c0_399, %c0_400] : memref<6x1x1024xf32, #tpu.memory_space<vmem>>, vector<1x1x96xf32>
    %927 = vector.shape_cast %926 : vector<1x1x96xf32> to vector<1x96xf32>
    %c5_401 = arith.constant 5 : index
    %c0_402 = arith.constant 0 : index
    %c128_403 = arith.constant 128 : index
    %928 = vector.load %arg5[%c5_401, %c0_402, %c128_403] : memref<6x1x1024xf32, #tpu.memory_space<vmem>>, vector<1x1x32xf32>
    %929 = vector.shape_cast %928 : vector<1x1x32xf32> to vector<1x32xf32>
    %c5_404 = arith.constant 5 : index
    %c0_405 = arith.constant 0 : index
    %c256_406 = arith.constant 256 : index
    %930 = vector.load %arg5[%c5_404, %c0_405, %c256_406] : memref<6x1x1024xf32, #tpu.memory_space<vmem>>, vector<1x1x32xf32>
    %931 = vector.shape_cast %930 : vector<1x1x32xf32> to vector<1x32xf32>
    %c5_407 = arith.constant 5 : index
    %c0_408 = arith.constant 0 : index
    %c384_409 = arith.constant 384 : index
    %932 = vector.load %arg5[%c5_407, %c0_408, %c384_409] : memref<6x1x1024xf32, #tpu.memory_space<vmem>>, vector<1x1x32xf32>
    %933 = vector.shape_cast %932 : vector<1x1x32xf32> to vector<1x32xf32>
    %c5_410 = arith.constant 5 : index
    %c0_411 = arith.constant 0 : index
    %c512_412 = arith.constant 512 : index
    %934 = vector.load %arg5[%c5_410, %c0_411, %c512_412] : memref<6x1x1024xf32, #tpu.memory_space<vmem>>, vector<1x1x64xf32>
    %935 = vector.shape_cast %934 : vector<1x1x64xf32> to vector<1x64xf32>
    %c5_413 = arith.constant 5 : index
    %c0_414 = arith.constant 0 : index
    %c640_415 = arith.constant 640 : index
    %936 = vector.load %arg5[%c5_413, %c0_414, %c640_415] : memref<6x1x1024xf32, #tpu.memory_space<vmem>>, vector<1x1x32xf32>
    %937 = vector.shape_cast %936 : vector<1x1x32xf32> to vector<1x32xf32>
    %c5_416 = arith.constant 5 : index
    %c0_417 = arith.constant 0 : index
    %c768_418 = arith.constant 768 : index
    %938 = vector.load %arg5[%c5_416, %c0_417, %c768_418] : memref<6x1x1024xf32, #tpu.memory_space<vmem>>, vector<1x1x32xf32>
    %939 = vector.shape_cast %938 : vector<1x1x32xf32> to vector<1x32xf32>
    %c5_419 = arith.constant 5 : index
    %c0_420 = arith.constant 0 : index
    %c896_421 = arith.constant 896 : index
    %940 = vector.load %arg5[%c5_419, %c0_420, %c896_421] : memref<6x1x1024xf32, #tpu.memory_space<vmem>>, vector<1x1x32xf32>
    %941 = vector.shape_cast %940 : vector<1x1x32xf32> to vector<1x32xf32>
    %cst_422 = arith.constant dense<0.000000e+00> : vector<8x96xf32>
    %942 = tpu.matmul %917, %919, %cst_422 {dimension_numbers = #tpu.dot_dimension_numbers<[1], [0], [0], [1], [0, 0, 1, 1], [], []>} : vector<8x32xf32>, vector<32x96xf32>, vector<8x96xf32> -> vector<8x96xf32>
    %943 = vector.broadcast %927 : vector<1x96xf32> to vector<8x96xf32>
    %944 = arith.addf %942, %943 : vector<8x96xf32>
    %945 = vector.extract_strided_slice %944 {offsets = [0, 0], sizes = [8, 8], strides = [1, 1]} : vector<8x96xf32> to vector<8x8xf32>
    %946 = vector.extract_strided_slice %944 {offsets = [0, 32], sizes = [8, 8], strides = [1, 1]} : vector<8x96xf32> to vector<8x8xf32>
    %947 = vector.extract_strided_slice %944 {offsets = [0, 64], sizes = [8, 8], strides = [1, 1]} : vector<8x96xf32> to vector<8x8xf32>
    %cst_423 = arith.constant dense<0.000000e+00> : vector<8x8xf32>
    %948 = tpu.matmul %945, %946, %cst_423 {dimension_numbers = #tpu.dot_dimension_numbers<[1], [1], [0], [0], [0, 0, 1, 0], [], []>} : vector<8x8xf32>, vector<8x8xf32>, vector<8x8xf32> -> vector<8x8xf32>
    %cst_424 = arith.constant 0.353553385 : f32
    %949 = vector.broadcast %cst_424 : f32 to vector<8x8xf32>
    %950 = arith.mulf %948, %949 : vector<8x8xf32>
    %951 = vector.broadcast %3 : vector<1x8xf32> to vector<8x8xf32>
    %952 = arith.addf %950, %951 : vector<8x8xf32>
    %cst_425 = arith.constant dense<0xFF800000> : vector<8xf32>
    %953 = vector.multi_reduction <maximumf>, %952, %cst_425 [1] : vector<8x8xf32> to vector<8xf32>
    %954 = vector.shape_cast %953 : vector<8xf32> to vector<8x1xf32>
    %955 = vector.broadcast %954 : vector<8x1xf32> to vector<8x8xf32>
    %956 = arith.subf %952, %955 : vector<8x8xf32>
    %957 = math.exp %956 : vector<8x8xf32>
    %cst_426 = arith.constant dense<0.000000e+00> : vector<8xf32>
    %958 = vector.multi_reduction <add>, %957, %cst_426 [1] : vector<8x8xf32> to vector<8xf32>
    %959 = vector.shape_cast %958 : vector<8xf32> to vector<8x1xf32>
    %960 = tpu.reciprocal %959 {approx = true} : vector<8x1xf32> -> vector<8x1xf32>
    %961 = vector.broadcast %960 : vector<8x1xf32> to vector<8x8xf32>
    %962 = arith.mulf %957, %961 : vector<8x8xf32>
    %cst_427 = arith.constant dense<0.000000e+00> : vector<8x8xf32>
    %963 = tpu.matmul %962, %947, %cst_427 {dimension_numbers = #tpu.dot_dimension_numbers<[1], [0], [0], [1], [0, 0, 1, 1], [], []>} : vector<8x8xf32>, vector<8x8xf32>, vector<8x8xf32> -> vector<8x8xf32>
    %964 = vector.extract_strided_slice %921 {offsets = [0, 0], sizes = [8, 32], strides = [1, 1]} : vector<32x32xf32> to vector<8x32xf32>
    %cst_428 = arith.constant dense<0.000000e+00> : vector<8x32xf32>
    %965 = tpu.matmul %963, %964, %cst_428 {dimension_numbers = #tpu.dot_dimension_numbers<[1], [0], [0], [1], [0, 0, 1, 1], [], []>} : vector<8x8xf32>, vector<8x32xf32>, vector<8x32xf32> -> vector<8x32xf32>
    %966 = vector.extract_strided_slice %944 {offsets = [0, 8], sizes = [8, 8], strides = [1, 1]} : vector<8x96xf32> to vector<8x8xf32>
    %967 = vector.extract_strided_slice %944 {offsets = [0, 40], sizes = [8, 8], strides = [1, 1]} : vector<8x96xf32> to vector<8x8xf32>
    %968 = vector.extract_strided_slice %944 {offsets = [0, 72], sizes = [8, 8], strides = [1, 1]} : vector<8x96xf32> to vector<8x8xf32>
    %cst_429 = arith.constant dense<0.000000e+00> : vector<8x8xf32>
    %969 = tpu.matmul %966, %967, %cst_429 {dimension_numbers = #tpu.dot_dimension_numbers<[1], [1], [0], [0], [0, 0, 1, 0], [], []>} : vector<8x8xf32>, vector<8x8xf32>, vector<8x8xf32> -> vector<8x8xf32>
    %cst_430 = arith.constant 0.353553385 : f32
    %970 = vector.broadcast %cst_430 : f32 to vector<8x8xf32>
    %971 = arith.mulf %969, %970 : vector<8x8xf32>
    %972 = vector.broadcast %3 : vector<1x8xf32> to vector<8x8xf32>
    %973 = arith.addf %971, %972 : vector<8x8xf32>
    %cst_431 = arith.constant dense<0xFF800000> : vector<8xf32>
    %974 = vector.multi_reduction <maximumf>, %973, %cst_431 [1] : vector<8x8xf32> to vector<8xf32>
    %975 = vector.shape_cast %974 : vector<8xf32> to vector<8x1xf32>
    %976 = vector.broadcast %975 : vector<8x1xf32> to vector<8x8xf32>
    %977 = arith.subf %973, %976 : vector<8x8xf32>
    %978 = math.exp %977 : vector<8x8xf32>
    %cst_432 = arith.constant dense<0.000000e+00> : vector<8xf32>
    %979 = vector.multi_reduction <add>, %978, %cst_432 [1] : vector<8x8xf32> to vector<8xf32>
    %980 = vector.shape_cast %979 : vector<8xf32> to vector<8x1xf32>
    %981 = tpu.reciprocal %980 {approx = true} : vector<8x1xf32> -> vector<8x1xf32>
    %982 = vector.broadcast %981 : vector<8x1xf32> to vector<8x8xf32>
    %983 = arith.mulf %978, %982 : vector<8x8xf32>
    %cst_433 = arith.constant dense<0.000000e+00> : vector<8x8xf32>
    %984 = tpu.matmul %983, %968, %cst_433 {dimension_numbers = #tpu.dot_dimension_numbers<[1], [0], [0], [1], [0, 0, 1, 1], [], []>} : vector<8x8xf32>, vector<8x8xf32>, vector<8x8xf32> -> vector<8x8xf32>
    %985 = vector.extract_strided_slice %921 {offsets = [8, 0], sizes = [8, 32], strides = [1, 1]} : vector<32x32xf32> to vector<8x32xf32>
    %cst_434 = arith.constant dense<0.000000e+00> : vector<8x32xf32>
    %986 = tpu.matmul %984, %985, %cst_434 {dimension_numbers = #tpu.dot_dimension_numbers<[1], [0], [0], [1], [0, 0, 1, 1], [], []>} : vector<8x8xf32>, vector<8x32xf32>, vector<8x32xf32> -> vector<8x32xf32>
    %987 = arith.addf %965, %986 : vector<8x32xf32>
    %988 = vector.extract_strided_slice %944 {offsets = [0, 16], sizes = [8, 8], strides = [1, 1]} : vector<8x96xf32> to vector<8x8xf32>
    %989 = vector.extract_strided_slice %944 {offsets = [0, 48], sizes = [8, 8], strides = [1, 1]} : vector<8x96xf32> to vector<8x8xf32>
    %990 = vector.extract_strided_slice %944 {offsets = [0, 80], sizes = [8, 8], strides = [1, 1]} : vector<8x96xf32> to vector<8x8xf32>
    %cst_435 = arith.constant dense<0.000000e+00> : vector<8x8xf32>
    %991 = tpu.matmul %988, %989, %cst_435 {dimension_numbers = #tpu.dot_dimension_numbers<[1], [1], [0], [0], [0, 0, 1, 0], [], []>} : vector<8x8xf32>, vector<8x8xf32>, vector<8x8xf32> -> vector<8x8xf32>
    %cst_436 = arith.constant 0.353553385 : f32
    %992 = vector.broadcast %cst_436 : f32 to vector<8x8xf32>
    %993 = arith.mulf %991, %992 : vector<8x8xf32>
    %994 = vector.broadcast %3 : vector<1x8xf32> to vector<8x8xf32>
    %995 = arith.addf %993, %994 : vector<8x8xf32>
    %cst_437 = arith.constant dense<0xFF800000> : vector<8xf32>
    %996 = vector.multi_reduction <maximumf>, %995, %cst_437 [1] : vector<8x8xf32> to vector<8xf32>
    %997 = vector.shape_cast %996 : vector<8xf32> to vector<8x1xf32>
    %998 = vector.broadcast %997 : vector<8x1xf32> to vector<8x8xf32>
    %999 = arith.subf %995, %998 : vector<8x8xf32>
    %1000 = math.exp %999 : vector<8x8xf32>
    %cst_438 = arith.constant dense<0.000000e+00> : vector<8xf32>
    %1001 = vector.multi_reduction <add>, %1000, %cst_438 [1] : vector<8x8xf32> to vector<8xf32>
    %1002 = vector.shape_cast %1001 : vector<8xf32> to vector<8x1xf32>
    %1003 = tpu.reciprocal %1002 {approx = true} : vector<8x1xf32> -> vector<8x1xf32>
    %1004 = vector.broadcast %1003 : vector<8x1xf32> to vector<8x8xf32>
    %1005 = arith.mulf %1000, %1004 : vector<8x8xf32>
    %cst_439 = arith.constant dense<0.000000e+00> : vector<8x8xf32>
    %1006 = tpu.matmul %1005, %990, %cst_439 {dimension_numbers = #tpu.dot_dimension_numbers<[1], [0], [0], [1], [0, 0, 1, 1], [], []>} : vector<8x8xf32>, vector<8x8xf32>, vector<8x8xf32> -> vector<8x8xf32>
    %1007 = vector.extract_strided_slice %921 {offsets = [16, 0], sizes = [8, 32], strides = [1, 1]} : vector<32x32xf32> to vector<8x32xf32>
    %cst_440 = arith.constant dense<0.000000e+00> : vector<8x32xf32>
    %1008 = tpu.matmul %1006, %1007, %cst_440 {dimension_numbers = #tpu.dot_dimension_numbers<[1], [0], [0], [1], [0, 0, 1, 1], [], []>} : vector<8x8xf32>, vector<8x32xf32>, vector<8x32xf32> -> vector<8x32xf32>
    %1009 = arith.addf %987, %1008 : vector<8x32xf32>
    %1010 = vector.extract_strided_slice %944 {offsets = [0, 24], sizes = [8, 8], strides = [1, 1]} : vector<8x96xf32> to vector<8x8xf32>
    %1011 = vector.extract_strided_slice %944 {offsets = [0, 56], sizes = [8, 8], strides = [1, 1]} : vector<8x96xf32> to vector<8x8xf32>
    %1012 = vector.extract_strided_slice %944 {offsets = [0, 88], sizes = [8, 8], strides = [1, 1]} : vector<8x96xf32> to vector<8x8xf32>
    %cst_441 = arith.constant dense<0.000000e+00> : vector<8x8xf32>
    %1013 = tpu.matmul %1010, %1011, %cst_441 {dimension_numbers = #tpu.dot_dimension_numbers<[1], [1], [0], [0], [0, 0, 1, 0], [], []>} : vector<8x8xf32>, vector<8x8xf32>, vector<8x8xf32> -> vector<8x8xf32>
    %cst_442 = arith.constant 0.353553385 : f32
    %1014 = vector.broadcast %cst_442 : f32 to vector<8x8xf32>
    %1015 = arith.mulf %1013, %1014 : vector<8x8xf32>
    %1016 = vector.broadcast %3 : vector<1x8xf32> to vector<8x8xf32>
    %1017 = arith.addf %1015, %1016 : vector<8x8xf32>
    %cst_443 = arith.constant dense<0xFF800000> : vector<8xf32>
    %1018 = vector.multi_reduction <maximumf>, %1017, %cst_443 [1] : vector<8x8xf32> to vector<8xf32>
    %1019 = vector.shape_cast %1018 : vector<8xf32> to vector<8x1xf32>
    %1020 = vector.broadcast %1019 : vector<8x1xf32> to vector<8x8xf32>
    %1021 = arith.subf %1017, %1020 : vector<8x8xf32>
    %1022 = math.exp %1021 : vector<8x8xf32>
    %cst_444 = arith.constant dense<0.000000e+00> : vector<8xf32>
    %1023 = vector.multi_reduction <add>, %1022, %cst_444 [1] : vector<8x8xf32> to vector<8xf32>
    %1024 = vector.shape_cast %1023 : vector<8xf32> to vector<8x1xf32>
    %1025 = tpu.reciprocal %1024 {approx = true} : vector<8x1xf32> -> vector<8x1xf32>
    %1026 = vector.broadcast %1025 : vector<8x1xf32> to vector<8x8xf32>
    %1027 = arith.mulf %1022, %1026 : vector<8x8xf32>
    %cst_445 = arith.constant dense<0.000000e+00> : vector<8x8xf32>
    %1028 = tpu.matmul %1027, %1012, %cst_445 {dimension_numbers = #tpu.dot_dimension_numbers<[1], [0], [0], [1], [0, 0, 1, 1], [], []>} : vector<8x8xf32>, vector<8x8xf32>, vector<8x8xf32> -> vector<8x8xf32>
    %1029 = vector.extract_strided_slice %921 {offsets = [24, 0], sizes = [8, 32], strides = [1, 1]} : vector<32x32xf32> to vector<8x32xf32>
    %cst_446 = arith.constant dense<0.000000e+00> : vector<8x32xf32>
    %1030 = tpu.matmul %1028, %1029, %cst_446 {dimension_numbers = #tpu.dot_dimension_numbers<[1], [0], [0], [1], [0, 0, 1, 1], [], []>} : vector<8x8xf32>, vector<8x32xf32>, vector<8x32xf32> -> vector<8x32xf32>
    %1031 = arith.addf %1009, %1030 : vector<8x32xf32>
    %1032 = arith.addf %917, %1031 : vector<8x32xf32>
    %1033 = vector.broadcast %929 : vector<1x32xf32> to vector<8x32xf32>
    %1034 = arith.addf %1032, %1033 : vector<8x32xf32>
    %cst_447 = arith.constant dense<0.000000e+00> : vector<8xf32>
    %1035 = vector.multi_reduction <add>, %1034, %cst_447 [1] : vector<8x32xf32> to vector<8xf32>
    %1036 = vector.shape_cast %1035 : vector<8xf32> to vector<8x1xf32>
    %cst_448 = arith.constant 3.200000e+01 : f32
    %1037 = vector.broadcast %cst_448 : f32 to vector<8x1xf32>
    %1038 = arith.divf %1036, %1037 : vector<8x1xf32>
    %1039 = vector.broadcast %1038 : vector<8x1xf32> to vector<8x32xf32>
    %1040 = arith.subf %1034, %1039 : vector<8x32xf32>
    %1041 = arith.mulf %1040, %1040 : vector<8x32xf32>
    %cst_449 = arith.constant dense<0.000000e+00> : vector<8xf32>
    %1042 = vector.multi_reduction <add>, %1041, %cst_449 [1] : vector<8x32xf32> to vector<8xf32>
    %1043 = vector.shape_cast %1042 : vector<8xf32> to vector<8x1xf32>
    %cst_450 = arith.constant 3.200000e+01 : f32
    %1044 = vector.broadcast %cst_450 : f32 to vector<8x1xf32>
    %1045 = arith.divf %1043, %1044 : vector<8x1xf32>
    %1046 = vector.broadcast %1038 : vector<8x1xf32> to vector<8x32xf32>
    %1047 = arith.subf %1034, %1046 : vector<8x32xf32>
    %cst_451 = arith.constant 9.99999996E-13 : f32
    %1048 = vector.broadcast %cst_451 : f32 to vector<8x1xf32>
    %1049 = arith.addf %1045, %1048 : vector<8x1xf32>
    %1050 = math.rsqrt %1049 : vector<8x1xf32>
    %1051 = vector.broadcast %1050 : vector<8x1xf32> to vector<8x32xf32>
    %1052 = arith.mulf %1047, %1051 : vector<8x32xf32>
    %1053 = vector.broadcast %931 : vector<1x32xf32> to vector<8x32xf32>
    %1054 = arith.mulf %1052, %1053 : vector<8x32xf32>
    %1055 = vector.broadcast %933 : vector<1x32xf32> to vector<8x32xf32>
    %1056 = arith.addf %1054, %1055 : vector<8x32xf32>
    %cst_452 = arith.constant dense<0.000000e+00> : vector<8x64xf32>
    %1057 = tpu.matmul %1056, %923, %cst_452 {dimension_numbers = #tpu.dot_dimension_numbers<[1], [0], [0], [1], [0, 0, 1, 1], [], []>} : vector<8x32xf32>, vector<32x64xf32>, vector<8x64xf32> -> vector<8x64xf32>
    %1058 = vector.broadcast %935 : vector<1x64xf32> to vector<8x64xf32>
    %1059 = arith.addf %1057, %1058 : vector<8x64xf32>
    %cst_453 = arith.constant 5.000000e-01 : f32
    %1060 = vector.broadcast %cst_453 : f32 to vector<8x64xf32>
    %1061 = arith.mulf %1060, %1059 : vector<8x64xf32>
    %cst_454 = arith.constant 2.000000e+00 : f32
    %1062 = math.sqrt %cst_454 : f32
    %cst_455 = arith.constant 1.000000e+00 : f32
    %1063 = arith.divf %cst_455, %1062 : f32
    %1064 = vector.broadcast %1063 : f32 to vector<8x64xf32>
    %1065 = arith.mulf %1059, %1064 : vector<8x64xf32>
    %1066 = math.erf %1065 : vector<8x64xf32>
    %cst_456 = arith.constant 1.000000e+00 : f32
    %1067 = vector.broadcast %cst_456 : f32 to vector<8x64xf32>
    %1068 = arith.addf %1067, %1066 : vector<8x64xf32>
    %1069 = arith.mulf %1061, %1068 : vector<8x64xf32>
    %cst_457 = arith.constant dense<0.000000e+00> : vector<8x32xf32>
    %1070 = tpu.matmul %1069, %925, %cst_457 {dimension_numbers = #tpu.dot_dimension_numbers<[1], [0], [0], [1], [0, 0, 1, 1], [], []>} : vector<8x64xf32>, vector<64x32xf32>, vector<8x32xf32> -> vector<8x32xf32>
    %1071 = vector.broadcast %937 : vector<1x32xf32> to vector<8x32xf32>
    %1072 = arith.addf %1070, %1071 : vector<8x32xf32>
    %1073 = arith.addf %1056, %1072 : vector<8x32xf32>
    %cst_458 = arith.constant dense<0.000000e+00> : vector<8xf32>
    %1074 = vector.multi_reduction <add>, %1073, %cst_458 [1] : vector<8x32xf32> to vector<8xf32>
    %1075 = vector.shape_cast %1074 : vector<8xf32> to vector<8x1xf32>
    %cst_459 = arith.constant 3.200000e+01 : f32
    %1076 = vector.broadcast %cst_459 : f32 to vector<8x1xf32>
    %1077 = arith.divf %1075, %1076 : vector<8x1xf32>
    %1078 = vector.broadcast %1077 : vector<8x1xf32> to vector<8x32xf32>
    %1079 = arith.subf %1073, %1078 : vector<8x32xf32>
    %1080 = arith.mulf %1079, %1079 : vector<8x32xf32>
    %cst_460 = arith.constant dense<0.000000e+00> : vector<8xf32>
    %1081 = vector.multi_reduction <add>, %1080, %cst_460 [1] : vector<8x32xf32> to vector<8xf32>
    %1082 = vector.shape_cast %1081 : vector<8xf32> to vector<8x1xf32>
    %cst_461 = arith.constant 3.200000e+01 : f32
    %1083 = vector.broadcast %cst_461 : f32 to vector<8x1xf32>
    %1084 = arith.divf %1082, %1083 : vector<8x1xf32>
    %1085 = vector.broadcast %1077 : vector<8x1xf32> to vector<8x32xf32>
    %1086 = arith.subf %1073, %1085 : vector<8x32xf32>
    %cst_462 = arith.constant 9.99999996E-13 : f32
    %1087 = vector.broadcast %cst_462 : f32 to vector<8x1xf32>
    %1088 = arith.addf %1084, %1087 : vector<8x1xf32>
    %1089 = math.rsqrt %1088 : vector<8x1xf32>
    %1090 = vector.broadcast %1089 : vector<8x1xf32> to vector<8x32xf32>
    %1091 = arith.mulf %1086, %1090 : vector<8x32xf32>
    %1092 = vector.broadcast %939 : vector<1x32xf32> to vector<8x32xf32>
    %1093 = arith.mulf %1091, %1092 : vector<8x32xf32>
    %1094 = vector.broadcast %941 : vector<1x32xf32> to vector<8x32xf32>
    %1095 = arith.addf %1093, %1094 : vector<8x32xf32>
    %1096 = vector.extract_strided_slice %1095 {offsets = [0, 0], sizes = [1, 32], strides = [1, 1]} : vector<8x32xf32> to vector<1x32xf32>
    %c0_463 = arith.constant 0 : index
    %c0_464 = arith.constant 0 : index
    %1097 = vector.load %arg6[%c0_463, %c0_464] : memref<32x256xf32, #tpu.memory_space<vmem>>, vector<32x32xf32>
    %c0_465 = arith.constant 0 : index
    %c128_466 = arith.constant 128 : index
    %1098 = vector.load %arg6[%c0_465, %c128_466] : memref<32x256xf32, #tpu.memory_space<vmem>>, vector<32x128xf32>
    %c0_467 = arith.constant 0 : index
    %c0_468 = arith.constant 0 : index
    %1099 = vector.load %arg7[%c0_467, %c0_468] : memref<1x512xf32, #tpu.memory_space<vmem>>, vector<1x32xf32>
    %c0_469 = arith.constant 0 : index
    %c128_470 = arith.constant 128 : index
    %1100 = vector.load %arg7[%c0_469, %c128_470] : memref<1x512xf32, #tpu.memory_space<vmem>>, vector<1x128xf32>
    %cst_471 = arith.constant dense<0.000000e+00> : vector<1x32xf32>
    %1101 = tpu.matmul %1096, %1097, %cst_471 {dimension_numbers = #tpu.dot_dimension_numbers<[1], [0], [0], [1], [0, 0, 1, 1], [], []>} : vector<1x32xf32>, vector<32x32xf32>, vector<1x32xf32> -> vector<1x32xf32>
    %1102 = arith.addf %1101, %1099 : vector<1x32xf32>
    %1103 = math.tanh %1102 : vector<1x32xf32>
    %cst_472 = arith.constant dense<0.000000e+00> : vector<1x128xf32>
    %1104 = tpu.matmul %1103, %1098, %cst_472 {dimension_numbers = #tpu.dot_dimension_numbers<[1], [0], [0], [1], [0, 0, 1, 1], [], []>} : vector<1x32xf32>, vector<32x128xf32>, vector<1x128xf32> -> vector<1x128xf32>
    %1105 = arith.addf %1104, %1100 : vector<1x128xf32>
    %c0_473 = arith.constant 0 : index
    %c0_474 = arith.constant 0 : index
    %c0_475 = arith.constant 0 : index
    %1106 = vector.load %arg8[%c0_473, %c0_474, %c0_475] : memref<1x1x128xf32, #tpu.memory_space<vmem>>, vector<1x1x128xf32>
    %1107 = vector.shape_cast %1106 : vector<1x1x128xf32> to vector<1x128xf32>
    %1108 = vector.shape_cast %1105 : vector<1x128xf32> to vector<1x1x128xf32>
    tpu.vector_store %arg8[%c0_473, %c0_474, %c0_475], %1108 {strides = array<i32>} : memref<1x1x128xf32, #tpu.memory_space<vmem>>, vector<1x1x128xf32>,
    return
  }
  func.func @transform_0(%arg0: i32) -> (i32, i32, i32) {
    %c0_i32 = arith.constant 0 : i32
    %c0_i32_0 = arith.constant 0 : i32
    %c0_i32_1 = arith.constant 0 : i32
    return %arg0, %c0_i32, %c0_i32_0 : i32, i32, i32
  }
  func.func @transform_1(%arg0: i32) -> (i32, i32, i32) {
    %c0_i32 = arith.constant 0 : i32
    %c0_i32_0 = arith.constant 0 : i32
    %c0_i32_1 = arith.constant 0 : i32
    return %arg0, %c0_i32, %c0_i32_0 : i32, i32, i32
  }
  func.func @transform_2(%arg0: i32) -> (i32, i32, i32) {
    %c0_i32 = arith.constant 0 : i32
    %c0_i32_0 = arith.constant 0 : i32
    %c0_i32_1 = arith.constant 0 : i32
    %c0_i32_2 = arith.constant 0 : i32
    return %c0_i32, %c0_i32_0, %c0_i32_1 : i32, i32, i32
  }
  func.func @transform_3(%arg0: i32) -> (i32, i32, i32) {
    %c0_i32 = arith.constant 0 : i32
    %c0_i32_0 = arith.constant 0 : i32
    %c0_i32_1 = arith.constant 0 : i32
    %c0_i32_2 = arith.constant 0 : i32
    return %c0_i32, %c0_i32_0, %c0_i32_1 : i32, i32, i32
  }
  func.func @transform_4(%arg0: i32) -> (i32, i32, i32) {
    %c0_i32 = arith.constant 0 : i32
    %c0_i32_0 = arith.constant 0 : i32
    %c0_i32_1 = arith.constant 0 : i32
    %c0_i32_2 = arith.constant 0 : i32
    return %c0_i32, %c0_i32_0, %c0_i32_1 : i32, i32, i32
  }
  func.func @transform_5(%arg0: i32) -> (i32, i32) {
    %c0_i32 = arith.constant 0 : i32
    %c0_i32_0 = arith.constant 0 : i32
    %c0_i32_1 = arith.constant 0 : i32
    return %c0_i32, %c0_i32_0 : i32, i32
  }
  func.func @transform_6(%arg0: i32) -> (i32, i32) {
    %c0_i32 = arith.constant 0 : i32
    %c0_i32_0 = arith.constant 0 : i32
    %c0_i32_1 = arith.constant 0 : i32
    return %c0_i32, %c0_i32_0 : i32, i32
  }
  func.func @transform_7(%arg0: i32) -> (i32, i32, i32) {
    %c0_i32 = arith.constant 0 : i32
    %c0_i32_0 = arith.constant 0 : i32
    %c0_i32_1 = arith.constant 0 : i32
    return %arg0, %c0_i32, %c0_i32_0 : i32, i32, i32
  }
}

</mosaic_0001>

<bundles_post_ra>
// kernel: roberta_forward.1
= control target key start
LH: loop header
LB: loop body
LE: loop exit
PB: predicated region body
PF: predicated region fallthrough
CT: control target
= control target key end

     0   :  { %s5667_s0 = inlined_call_operand.vmem [shape: f32[2,8,32], index: 0, kind: input, shape index: {}]   ;;  %s5668_s1 = inlined_call_operand.vmem [shape: f32[2,1,8], index: 1, kind: input, shape index: {}]   ;;  %s5669_s2 = inlined_call_operand.vmem [shape: f32[6,32,384], index: 2, kind: input, shape index: {}]   ;;  %s5670_s3 = inlined_call_operand.vmem [shape: f32[6,64,32], index: 3, kind: input, shape index: {}]   ;;  %s5671_s4 = inlined_call_operand.vmem [shape: f32[6,1,1024], index: 4, kind: input, shape index: {}]   ;;  %s5672_s5 = inlined_call_operand.vmem [shape: f32[32,256], index: 5, kind: input, shape index: {}]   ;;  %s5673_s6 = inlined_call_operand.vmem [shape: f32[1,512], index: 6, kind: input, shape index: {}]   ;;  %s5674_s7 = inlined_call_operand.hbm [shape: f32[2,1,128], index: 7, kind: output, shape index: {}]  }
   0x1   :  { %5701 = sst [smem:[#allocation9_spill]] %s5667_s0 }
   0x2   :  { %5702 = sst [smem:[#allocation10_spill]] %s5668_s1 }
   0x3   :  { %12 = vsyncpa [#allocation3], 0 }
   0x4   :  { %14 = vsyncpa [#allocation3 + $0x1], 0  ;;  %s4573_s24 = smov 0   ;;  %s4575_s25 = smov 0  }
   0x5   :  { %s4577_s26 = smov 0   ;;  %s4579_s27 = smov 0  }
   0x6 LB: > { %5703 = sst [smem:[#allocation5_spill]] %s4515_s26  ;;  %s4594_s28 = sadd.s32 4294967295, %s4519_s27   ;;  %s4519_s27 = sphi %s4579_s27, %s5723_s27   ;;  %s4515_s26 = sphi %s4577_s26, %s5725_s26   ;;  %s4511_s25 = sphi %s4575_s25, %s5727_s25   ;;  %s4507_s24 = sphi %s4573_s24, %s5726_s24  }
   0x7   : > { %s3946_s29 = sadd.s32 4294967294, %s4519_s27   ;;  %s4598_s30 = sadd.s32 1, %s4519_s27  }
   0x8   : > { %5704 = sst [smem:[#allocation6_spill]] %s4598_s30  ;;  %s184_s8 = sadd.s32 1, %s4515_s26 }
   0x9   : > { %s181_s9 = ssub.s32 %s4519_s27, %s4598_s30  ;;  %p194_p0 = scmp.ne.s32.totalorder %s4515_s26, %s4511_s25 }
   0xa   : > { %p182_p1 = scmp.eq.s32.totalorder %s181_s9, 0  ;;  %p195_p2 = scmp.eq.s32.totalorder %s4594_s28, 1 }
   0xb   : > { %p200_p3 = scmp.ne.s32.totalorder %s4511_s25, %s4507_s24  ;;  %p201_p4 = scmp.eq.s32.totalorder %s3946_s29, 1 }
   0xc   : > { %s4609_s10 = scalar_select %p182_p1, %s4515_s26, %s184_s8  }
   0xd   : > { %p4611_p5 = por %p195_p2, %p194_p0  ;;  %p4615_p6 = por %p201_p4, %p200_p3 }
   0xe   : > { %5705 = sst [smem:[#allocation7_spill]] %s4609_s10  ;;  %p3949_p7 = scmp.ge.s32.totalorder %s4519_s27, 1 }
   0xf   : > { %s5707_s12 = scalar_select %p4615_p6, 1, 0 }
  0x10   : > { %p247_p8 = scmp.lt.s32.totalorder %s4519_s27, 3 }
  0x11   : > { %5708 = sst [smem:[#allocation8_spill]] %s5707_s12 }
  0x12   : > { %p248_p9 = pnand %p3949_p7, %p247_p8 }
  0x13   : > { %p280_p10 = scmp.lt.s32.totalorder (!%p248_p9), %s4594_s28, 1  ;;  %s5709_s1 = sld [smem:[#allocation10_spill]] (!%p248_p9) }
  0x14   : > { %251 = sbr.rel (%p248_p9) target bundleno = 14212 (0x3784), region = 48  ;;  %s5710_s0 = sld [smem:[#allocation9_spill]] (!%p248_p9) }
  0x15   : > { %s5689_s22 = smov (!%p248_p9), 88   ;;  %s5695_s23 = smov (!%p248_p9), 96  }
  0x16   : > { %s5685_s29 = smov (!%p248_p9), 72   ;;  %s5681_s8 = smov (!%p248_p9), 80  }
  0x17   : > { %s5691_s9 = smov (!%p248_p9), 64   ;;  %s5687_s15 = smov (!%p248_p9), 112  }
  0x18   : > { %s5677_s19 = smov (!%p248_p9), 48   ;;  %s5675_s21 = smov (!%p248_p9), 40  }
  0x19   : > { %s281_s13 = scalar_select %p280_p10, %s4594_s28, 1  ;;  %vm291_vm0 = vcmask 261120   ;;  %v4521_v2 = vmov 32.0   ;;  %v332_v14 = vld [vmem:[%s5669_s2 + $0x48] sm:$0xff]  ;;  %v331_v15 = vld [vmem:[%s5669_s2 + $0x30] sm:$0xff]  ;;  %v330_v16 = vld [vmem:[%s5669_s2 + $0x18] sm:$0xff] }
  0x1a   : > { %4317 = vrcp.f32 %v4521_v2  ;;  %375 = vmatpush.msra.mxu0 %v332_v14  ;;  %v329_v17 = vld [vmem:[%s5669_s2] sm:$0xff]  ;;  %vm386_vm5 = vcmask 64512   ;;  %v333_v50 = vld [vmem:[%s5669_s2 + $0x8] sm:$0xff]  ;;  %vm856_vm13 = vcmask 523264   ;;  %s5715_s16 = smov 48   ;;  %s5717_s18 = smov 96  }
  0x1b   : > { %s3950_s14 = sshll.u32 %s281_s13, 3  ;;  %s4626_s17 = scalar_lea.vmem %s5709_s1, %s281_s13  ;;  %v4267_v27 = vld [vmem:[%s5673_s6 + $0x2] ss:$0 sm:$0xff]  ;;  %v4268_v30 = vld [vmem:[%s5673_s6 + $0x3] ss:$0 sm:$0xff] }
  0x1c   : > { %s283_s20 = scalar_lea.vmem %s5710_s0, %s3950_s14  ;;  %376 = vmatpush.msra.mxu0 %v331_v15  ;;  %v4269_v33 = vld [vmem:[%s5671_s4] ss:$0 sm:$0xff]  ;;  %s5693_s13 = smov 120  }
  0x1d   : > { %v287_v0 = vld [vmem:[%s283_s20] sm:$0xff]  ;;  %s5683_s14 = smov 104   ;;  %s5679_s20 = smov 56  }
  0x1e   : > { %v292_v1 = vsel %vm291_vm0, %v287_v0, 0.0  ;;  %377 = vmatpush.msra.mxu0 %v330_v16  ;;  %v4678_v40 = vld [vmem:[%s4626_s17] ss:$0 sm:$0xff]  ;;  %s5719_s0 = smov 64  }
  0x1f   : > { %293 = vadd.xlane.f32.xlu0 %v292_v1 }
  0x20   : > { %v4318_v3 = vpop.eup %4317  ;;  %378 = vmatpush.msra.mxu0 %v329_v17 }
  0x21   : > { %v296_v4 = vmul.f32 32.0, %v4318_v3  ;;  %vm300_vm1 = vweird.f32 %v4318_v3 }
  0x23   : > { %v297_v5 = vsub.f32 1.0, %v296_v4 }
  0x25   : > { %v298_v6 = vmul.f32 %v4318_v3, %v297_v5 }
  0x27   : > { %v299_v7 = vadd.f32 %v4318_v3, %v298_v6 }
  0x29   : > { %v4632_v8 = vsel %vm300_vm1, %v4318_v3, %v299_v7 }
  0x92   : > { %v294_v9 = vpop.xlane.xlu0 %293 }
  0x93   : > { %v302_v10 = vmul.f32 %v4632_v8, %v294_v9 }
  0x95   : > { %v303_v11 = vsub.f32 %v287_v0, %v302_v10 }
  0x97   : > { %v304_v12 = vmul.f32 %v303_v11, %v303_v11 }
  0x99   : > { %v305_v13 = vsel %vm291_vm0, %v304_v12, 0.0 }
  0x9a   : > { %306 = vadd.xlane.f32.xlu0 %v305_v13 }
 0x10d   : > { %v307_v18 = vpop.xlane.xlu0 %306 }
 0x10e   : > { %v308_v19 = vmul.f32 %v307_v18, %v4632_v8 }
 0x110   : > { %v309_v20 = vadd.f32 1e-12, %v308_v19 }
 0x112   : > { %4319 = vrsqrt.f32 %v309_v20  ;;  %vm316_vm3 = vweird.f32 %v309_v20 }
 0x118   : > { %v4320_v21 = vpop.eup %4319 }
 0x119   : > { %v311_v22 = vmul.f32 %v4320_v21, %v309_v20  ;;  %vm317_vm2 = vweird.f32 %v4320_v21 }
 0x11a   : > { %vm318_vm4 = vmor %vm316_vm3, %vm317_vm2 }
 0x11b   : > { %v312_v23 = vmul.f32 %v4320_v21, %v311_v22 }
 0x11d   : > { %v313_v24 = vmul.f32 0.5, %v312_v23 }
 0x11f   : > { %v314_v25 = vsub.f32 1.5, %v313_v24 }
 0x121   : > { %v315_v26 = vmul.f32 %v4320_v21, %v314_v25 }
 0x123   : > { %v319_v28 = vsel %vm318_vm4, %v4320_v21, %v315_v26 }
 0x124   : > { %v320_v29 = vmul.f32 %v319_v28, %v303_v11 }
 0x126   : > { %v324_v31 = vmul.f32 %v4267_v27, %v320_v29 }
 0x128   : > { %v4655_v32 = vadd.f32 %v4268_v30, %v324_v31 }
 0x12a   : > { %3951 = vmatmul.msk.f32.vlgmr.msra.gmra.mxu0 %vm291_vm0, %v4655_v32 }
 0x1a7   : > { %v380_v34 = vpop.f32.mrf.mxu0 }
 0x1a8   : > { %v4662_v35 = vadd.f32 %v4269_v33, %v380_v34 }
 0x1aa   : > { %455 = vrot.lane.b32.xlu0 %v4662_v35, %s5689_s22  ;;  %384 = vrot.lane.b32.xlu1 %v4662_v35, %s5695_s23 }
 0x1b2   : > { %659 = vrot.lane.b32.xlu0 %v4662_v35, %s5685_s29  ;;  %s5713_s29 = smov 80  }
 0x1ba   : > { %568 = vrot.lane.b32.xlu0 %v4662_v35, %s5681_s8  ;;  %s5718_s8 = smov 120  }
 0x21c   : > { %v456_v36 = vpop.permute.xlu0 %455  ;;  %v385_v37 = vpop.permute.xlu1 %384 }
 0x21d   : > { %3952 = vmatpush.xpose.msk.msra.mxu1 %vm386_vm5, %v385_v37  ;;  %3955 = vmatpush.xpose.msk.msra.mxu3 %vm386_vm5, %v456_v36 }
 0x220   : > { %3953 = vmatmul.msk.f32.vlgmr.msra.gmra.mxu1 %vm386_vm5, %v4662_v35 }
 0x221   : > { %561 = vmatpush.msrb.mxu3 %v333_v50  ;;  %v4270_v50 = vld [vmem:[%s5671_s4 + $0x1] ss:$0 sm:$0xff] }
 0x224   : > { %v660_v38 = vpop.permute.xlu0 %659 }
 0x22c   : > { %v569_v39 = vpop.permute.xlu0 %568 }
 0x22d   : > { %3960 = vmatpush.xpose.msk.msrb.mxu0 %vm386_vm5, %v569_v39 }
 0x29d   : > { %v408_v41 = vpop.f32.mrf.mxu1 }
 0x29e   : > { %v411_v42 = vmul.f32 0.35355338, %v408_v41 }
 0x2a0   : > { %v415_v43 = vadd.f32 %v4678_v40, %v411_v42  ;;  %v336_v42 = vld [vmem:[%s5669_s2 + $0x50] sm:$0xff] }
 0x2a2   : > { %v416_v44 = vsel %vm386_vm5, %v415_v43, -inf }
 0x2a3   : > { %417 = vmax.xlane.f32.xlu1 %v416_v44 }
 0x316   : > { %v418_v45 = vpop.xlane.xlu1 %417 }
 0x317   : > { %v419_v46 = vsub.f32 %v415_v43, %v418_v45 }
 0x319   : > { %v420_v47 = vmul.f32 1.442695, %v419_v46 }
 0x31b   : > { %4321 = vpow2.f32 %v420_v47 }
 0x321   : > { %v4322_v48 = vpop.eup %4321 }
 0x322   : > { %v422_v49 = vsel %vm386_vm5, %v4322_v48, 0.0 }
 0x323   : > { %423 = vadd.xlane.f32.xlu2 %v422_v49 }
 0x33b   : > { %427 = vrot.lane.b32.xlu2 %v4662_v35, %s5691_s9 }
 0x343   : > { %453 = vrot.lane.b32.xlu2 %v4662_v35, %s5693_s13 }
 0x34b   : > { %657 = vrot.lane.b32.xlu2 %v4662_v35, %s5683_s14  ;;  %s5714_s14 = smov 56  }
 0x353   : > { %566 = vrot.lane.b32.xlu2 %v4662_v35, %s5687_s15 }
 0x396   : > { %v424_v51 = vpop.xlane.xlu2 %423 }
 0x397   : > { %4323 = vrcp.f32 %v424_v51 }
 0x39d   : > { %v4324_v52 = vpop.eup %4323 }
 0x39e   : > { %v428_v53 = vpop.permute.xlu2 %427  ;;  %v426_v54 = vmul.f32 %v4324_v52, %v4322_v48 }
 0x39f   : > { %448 = vmatpush.msra.mxu2 %v428_v53 }
 0x3a0   : > { %3954 = vmatmul.msk.f32.vlgmr.msra.gmra.mxu2 %vm386_vm5, %v426_v54 }
 0x3a6   : > { %v454_v55 = vpop.permute.xlu2 %453 }
 0x3a7   : > { %3956 = vmatmul.msk.f32.vlgmr.msra.gmra.mxu3 %vm386_vm5, %v454_v55 }
 0x3a8   : > { %3964 = vmatpush.xpose.msk.msra.mxu3 %vm386_vm5, %v660_v38  ;;  %v335_v38 = vld [vmem:[%s5669_s2 + $0x38] sm:$0xff] }
 0x3ae   : > { %v658_v56 = vpop.permute.xlu2 %657 }
 0x3b6   : > { %v567_v57 = vpop.permute.xlu2 %566 }
 0x3b7   : > { %3961 = vmatmul.msk.f32.vlgmr.msrb.gmra.mxu0 %vm386_vm5, %v567_v57 }
 0x423   : > { %v450_v58 = vpop.f32.mrf.mxu2 }
 0x424   : > { %3959 = vmatmul.msk.f32.vlgmr.msrb.gmra.mxu3 %vm386_vm5, %v450_v58 }
 0x42a   : > { %v478_v59 = vpop.f32.mrf.mxu3 }
 0x42b   : > { %v481_v60 = vmul.f32 0.35355338, %v478_v59  ;;  %v340_v59 = vld [vmem:[%s5669_s2 + $0x58] sm:$0xff] }
 0x42c   : > { %3965 = vmatmul.msk.f32.vlgmr.msra.gmra.mxu3 %vm386_vm5, %v658_v56 }
 0x42d   : > { %v482_v61 = vadd.f32 %v4678_v40, %v481_v60  ;;  %v338_v60 = vld [vmem:[%s5669_s2 + $0x28] sm:$0xff] }
 0x42f   : > { %v483_v62 = vsel %vm386_vm5, %v482_v61, -inf }
 0x430   : > { %484 = vmax.xlane.f32.xlu1 %v483_v62 }
 0x434   : > { %v591_v63 = vpop.f32.mrf.mxu0 }
 0x435   : > { %v594_v0 = vmul.f32 0.35355338, %v591_v63 }
 0x437   : > { %v595_v1 = vadd.f32 %v4678_v40, %v594_v0 }
 0x439   : > { %v596_v2 = vsel %vm386_vm5, %v595_v1, -inf }
 0x43a   : > { %597 = vmax.xlane.f32.xlu0 %v596_v2 }
 0x4a3   : > { %v485_v3 = vpop.xlane.xlu1 %484 }
 0x4a4   : > { %v486_v4 = vsub.f32 %v482_v61, %v485_v3  ;;  %v337_v61 = vld [vmem:[%s5669_s2 + $0x10] sm:$0xff] }
 0x4a6   : > { %v487_v5 = vmul.f32 1.442695, %v486_v4 }
 0x4a7   : > { %v4704_v6 = vpop.f32.mrf.mxu3 }
 0x4a8   : > { %4325 = vpow2.f32 %v487_v5 }
 0x4ad   : > { %v598_v7 = vpop.xlane.xlu0 %597 }
 0x4ae   : > { %v4326_v9 = vpop.eup %4325  ;;  %v599_v10 = vsub.f32 %v595_v1, %v598_v7  ;;  %v4271_v7 = vld [vmem:[%s5671_s4 + $0x2] ss:$0 sm:$0xff] }
 0x4af   : > { %v682_v11 = vpop.f32.mrf.mxu3  ;;  %v489_v12 = vsel %vm386_vm5, %v4326_v9, 0.0 }
 0x4b0   : > { %v600_v13 = vmul.f32 1.442695, %v599_v10  ;;  %v685_v14 = vmul.f32 0.35355338, %v682_v11  ;;  %490 = vadd.xlane.f32.xlu1 %v489_v12  ;;  %v4272_v11 = vld [vmem:[%s5671_s4 + $0x3] ss:$0 sm:$0xff] }
 0x4b2   : > { %4327 = vpow2.f32 %v600_v13  ;;  %v686_v15 = vadd.f32 %v4678_v40, %v685_v14  ;;  %v4273_v14 = vld [vmem:[%s5671_s4 + $0x4] ss:$0 sm:$0xff] }
 0x4b4   : > { %v687_v16 = vsel %vm386_vm5, %v686_v15, -inf }
 0x4b5   : > { %688 = vmax.xlane.f32.xlu2 %v687_v16 }
 0x4b8   : > { %v4328_v17 = vpop.eup %4327 }
 0x4b9   : > { %v602_v18 = vsel %vm386_vm5, %v4328_v17, 0.0 }
 0x4ba   : > { %603 = vadd.xlane.f32.xlu1 %v602_v18 }
 0x4cd   : > { %607 = vrot.lane.b32.xlu2 %v4662_v35, %s5677_s19  ;;  %s5711_s19 = smov 72  }
 0x4d3   : > { %494 = vrot.lane.b32.xlu1 %v4662_v35, %s5679_s20  ;;  %s5716_s20 = smov 40  }
 0x4db   : > { %698 = vrot.lane.b32.xlu1 %v4662_v35, %s5675_s21  ;;  %v334_v35 = vld [vmem:[%s5669_s2 + $0x20] sm:$0xff]  ;;  %s5712_s21 = smov 104  }
 0x4dc   : > { %538 = vmatpush.msrb.mxu1 %v334_v35  ;;  %v343_v35 = vld [vmem:[%s5670_s3 + $0x10] sm:$0xff] }
 0x4de   : > { %651 = vmatpush.msra.mxu1 %v335_v38 }
 0x523   : > { %v491_v24 = vpop.xlane.xlu1 %490 }
 0x528   : > { %v689_v19 = vpop.xlane.xlu2 %688 }
 0x529   : > { %v690_v20 = vsub.f32 %v686_v15, %v689_v19 }
 0x52b   : > { %v691_v21 = vmul.f32 1.442695, %v690_v20  ;;  %v348_v20 = vld [vmem:[%s5670_s3 + $0x38] sm:$0xff] }
 0x52c   : > { %868 = vmatpush.msrb.mxu3 %v348_v20 }
 0x52d   : > { %4329 = vpow2.f32 %v691_v21  ;;  %v604_v25 = vpop.xlane.xlu1 %603 }
 0x52e   : > { %4331 = vrcp.f32 %v491_v24 }
 0x52f   : > { %4333 = vrcp.f32 %v604_v25 }
 0x530   : > { %v608_v29 = vpop.permute.xlu2 %607 }
 0x533   : > { %v4330_v22 = vpop.eup %4329 }
 0x534   : > { %v693_v23 = vsel %vm386_vm5, %v4330_v22, 0.0  ;;  %v4332_v26 = vpop.eup %4331 }
 0x535   : > { %694 = vadd.xlane.f32.xlu0 %v693_v23  ;;  %v493_v28 = vmul.f32 %v4332_v26, %v4326_v9  ;;  %v4334_v30 = vpop.eup %4333  ;;  %v347_v23 = vld [vmem:[%s5670_s3 + $0x30] sm:$0xff]  ;;  %v346_v26 = vld [vmem:[%s5670_s3 + $0x28] sm:$0xff] }
 0x536   : > { %v606_v31 = vmul.f32 %v4334_v30, %v4328_v17  ;;  %869 = vmatpush.msrb.mxu3 %v347_v23 }
 0x538   : > { %870 = vmatpush.msrb.mxu3 %v346_v26 }
 0x545   : > { %v495_v27 = vpop.permute.xlu1 %494 }
 0x546   : > { %515 = vmatpush.msrb.mxu2 %v495_v27 }
 0x547   : > { %3957 = vmatmul.msk.f32.vlgmr.msrb.gmra.mxu2 %vm386_vm5, %v493_v28 }
 0x548   : > { %628 = vmatpush.msra.mxu2 %v608_v29  ;;  %v345_v29 = vld [vmem:[%s5670_s3 + $0x20] sm:$0xff] }
 0x549   : > { %871 = vmatpush.msrb.mxu3 %v345_v29 }
 0x54a   : > { %742 = vmatpush.msrb.mxu2 %v336_v42 }
 0x54d   : > { %v699_v33 = vpop.permute.xlu1 %698 }
 0x54e   : > { %719 = vmatpush.msra.mxu0 %v699_v33 }
 0x54f   : > { %3962 = vmatmul.msk.f32.vlgmr.msra.gmra.mxu2 %vm386_vm5, %v606_v31  ;;  %v344_v31 = vld [vmem:[%s5670_s3 + $0x18] sm:$0xff] }
 0x550   : > { %872 = vmatpush.msrb.mxu3 %v344_v31  ;;  %v4277_v31 = vld [vmem:[%s5671_s4 + $0x8] ss:$0 sm:$0xff] }
 0x552   : > { %873 = vmatpush.msrb.mxu3 %v343_v35 }
 0x5a8   : > { %v695_v34 = vpop.xlane.xlu0 %694 }
 0x5a9   : > { %4335 = vrcp.f32 %v695_v34 }
 0x5af   : > { %v4336_v36 = vpop.eup %4335 }
 0x5b0   : > { %v697_v37 = vmul.f32 %v4336_v36, %v4330_v22 }
 0x5b2   : > { %3966 = vmatmul.msk.f32.vlgmr.msra.gmra.mxu0 %vm386_vm5, %v697_v37  ;;  %v342_v37 = vld [vmem:[%s5670_s3 + $0x8] sm:$0xff] }
 0x5b3   : > { %874 = vmatpush.msrb.mxu3 %v342_v37 }
 0x5ca   : > { %v517_v39 = vpop.f32.mrf.mxu2 }
 0x5cb   : > { %3958 = vmatmul.msk.f32.vlgmr.msrb.gmra.mxu1 %vm386_vm5, %v517_v39  ;;  %v341_v39 = vld [vmem:[%s5670_s3] sm:$0xff] }
 0x5cc   : > { %801 = vmatpush.msrb.mxu1 %v340_v59  ;;  %875 = vmatpush.msrb.mxu3 %v341_v39 }
 0x5d2   : > { %v630_v41 = vpop.f32.mrf.mxu2 }
 0x5d3   : > { %3963 = vmatmul.msk.f32.vlgmr.msra.gmra.mxu1 %vm386_vm5, %v630_v41 }
 0x62f   : > { %v721_v43 = vpop.f32.mrf.mxu0 }
 0x630   : > { %3967 = vmatmul.msk.f32.vlgmr.msrb.gmra.mxu2 %vm386_vm5, %v721_v43 }
 0x648   : > { %v540_v44 = vpop.f32.mrf.mxu1 }
 0x649   : > { %v564_v46 = vadd.f32 %v4704_v6, %v540_v44 }
 0x650   : > { %v653_v45 = vpop.f32.mrf.mxu1 }
 0x651   : > { %v656_v47 = vadd.f32 %v653_v45, %v564_v46 }
 0x6b3   : > { %v744_v48 = vpop.f32.mrf.mxu2 }
 0x6b4   : > { %v747_v49 = vadd.f32 %v744_v48, %v656_v47 }
 0x6b6   : > { %v748_v51 = vadd.f32 %v747_v49, %v4655_v32  ;;  %v339_v32 = vld [vmem:[%s5669_s2 + $0x40] sm:$0xff] }
 0x6b7   : > { %802 = vmatpush.msrb.mxu1 %v339_v32 }
 0x6b8   : > { %v752_v52 = vadd.f32 %v4270_v50, %v748_v51 }
 0x6b9   : > { %803 = vmatpush.msrb.mxu1 %v338_v60 }
 0x6ba   : > { %v753_v53 = vsel %vm291_vm0, %v752_v52, 0.0 }
 0x6bb   : > { %754 = vadd.xlane.f32.xlu0 %v753_v53  ;;  %804 = vmatpush.msrb.mxu1 %v337_v61 }
 0x72e   : > { %v755_v54 = vpop.xlane.xlu0 %754 }
 0x72f   : > { %v756_v55 = vmul.f32 %v755_v54, %v4632_v8 }
 0x731   : > { %v757_v56 = vsub.f32 %v752_v52, %v756_v55 }
 0x733   : > { %v758_v57 = vmul.f32 %v757_v56, %v757_v56 }
 0x735   : > { %v759_v58 = vsel %vm291_vm0, %v758_v57, 0.0 }
 0x736   : > { %760 = vadd.xlane.f32.xlu1 %v759_v58 }
 0x7a9   : > { %v761_v62 = vpop.xlane.xlu1 %760 }
 0x7aa   : > { %v762_v63 = vmul.f32 %v761_v62, %v4632_v8 }
 0x7ac   : > { %v763_v0 = vadd.f32 1e-12, %v762_v63 }
 0x7ae   : > { %4337 = vrsqrt.f32 %v763_v0  ;;  %vm770_vm7 = vweird.f32 %v763_v0 }
 0x7b4   : > { %v4338_v1 = vpop.eup %4337 }
 0x7b5   : > { %v765_v2 = vmul.f32 %v4338_v1, %v763_v0  ;;  %vm771_vm6 = vweird.f32 %v4338_v1 }
 0x7b6   : > { %vm772_vm8 = vmor %vm770_vm7, %vm771_vm6 }
 0x7b7   : > { %v766_v3 = vmul.f32 %v4338_v1, %v765_v2 }
 0x7b9   : > { %v767_v4 = vmul.f32 0.5, %v766_v3 }
 0x7bb   : > { %v768_v5 = vsub.f32 1.5, %v767_v4 }
 0x7bd   : > { %v769_v6 = vmul.f32 %v4338_v1, %v768_v5 }
 0x7bf   : > { %v773_v9 = vsel %vm772_vm8, %v4338_v1, %v769_v6  ;;  %v4274_v1 = vld [vmem:[%s5671_s4 + $0x5] ss:$0 sm:$0xff] }
 0x7c0   : > { %v774_v10 = vmul.f32 %v773_v9, %v757_v56 }
 0x7c2   : > { %v778_v12 = vmul.f32 %v4271_v7, %v774_v10 }
 0x7c4   : > { %v4759_v13 = vadd.f32 %v4272_v11, %v778_v12  ;;  %v3974_v12 = vld [vmem:[%s5669_s2 + $0xa8] sm:$0xff] }
 0x7c5   : > { %960 = vmatpush.msrb.mxu0 %v3974_v12 }
 0x7c6   : > { %3968 = vmatmul.msk.f32.vlgmr.msrb.gmra.mxu1 %vm291_vm0, %v4759_v13 }
 0x843   : > { %v806_v15 = vpop.f32.mrf.mxu1 }
 0x844   : > { %v807_v16 = vadd.f32 %v4273_v14, %v806_v15  ;;  %v3972_v14 = vld [vmem:[%s5669_s2 + $0x78] sm:$0xff]  ;;  %v3971_v15 = vld [vmem:[%s5669_s2 + $0x60] sm:$0xff] }
 0x846   : > { %v810_v17 = vmul.f32 0.70710677, %v807_v16  ;;  %v809_v62 = vmul.f32 0.5, %v807_v16 }
 0x848   : > { %v811_v18 = vmul.f32 %v810_v17, %v810_v17 }
 0x84a   : > { %v812_v19 = vmin.f32 %v811_v18, 16.0 }
 0x84c   : > { %v813_v21 = vmul.f32 2.1237322e-06, %v812_v19  ;;  %v824_v22 = vmul.f32 3.8918573e-05, %v812_v19 }
 0x84e   : > { %v814_v24 = vadd.f32 0.00028619796, %v813_v21  ;;  %v825_v25 = vadd.f32 0.001143296, %v824_v22 }
 0x850   : > { %v815_v27 = vmul.f32 %v814_v24, %v812_v19  ;;  %v826_v28 = vmul.f32 %v825_v25, %v812_v19  ;;  %v4275_v25 = vld [vmem:[%s5671_s4 + $0x6] ss:$0 sm:$0xff] }
 0x852   : > { %v827_v30 = vadd.f32 0.014752088, %v826_v28  ;;  %v816_v33 = vadd.f32 0.0036580483, %v815_v27  ;;  %v4276_v28 = vld [vmem:[%s5671_s4 + $0x7] ss:$0 sm:$0xff] }
 0x854   : > { %v828_v34 = vmul.f32 %v827_v30, %v812_v19  ;;  %v817_v38 = vmul.f32 %v816_v33, %v812_v19 }
 0x856   : > { %v829_v36 = vadd.f32 0.112945676, %v828_v34  ;;  %v818_v43 = vadd.f32 0.05243302, %v817_v38 }
 0x858   : > { %v830_v41 = vmul.f32 %v829_v36, %v812_v19  ;;  %v819_v46 = vmul.f32 %v818_v43, %v812_v19 }
 0x85a   : > { %v831_v42 = vadd.f32 0.4994258, %v830_v41  ;;  %v820_v47 = vadd.f32 0.18741608, %v819_v46 }
 0x85c   : > { %v832_v44 = vmul.f32 %v831_v42, %v812_v19  ;;  %v821_v49 = vmul.f32 %v820_v47, %v812_v19  ;;  %v3975_v42 = vld [vmem:[%s5669_s2 + $0x68] sm:$0xff] }
 0x85d   : > { %1142 = vmatpush.msra.mxu3 %v3975_v42 }
 0x85e   : > { %v833_v45 = vadd.f32 1.0, %v832_v44  ;;  %v822_v53 = vadd.f32 1.1283791, %v821_v49 }
 0x860   : > { %4339 = vrcp.f32 %v833_v45  ;;  %v845_v52 = vand.u32 2147483648, %v833_v45  ;;  %v843_v55 = vand.u32 2147483647, %v833_v45  ;;  %vm839_vm10 = vweird.f32 %v833_v45 }
 0x861   : > { %v823_v58 = vmul.f32 %v822_v53, %v810_v17 }
 0x862   : > { %v846_v57 = vor.u32 1.1754944e-38, %v845_v52  ;;  %vm844_vm12 = vcmp.eq.f32.partialorder %v843_v55, 8.507059e+37 }
 0x866   : > { %v4340_v48 = vpop.eup %4339 }
 0x867   : > { %v835_v50 = vmul.f32 %v4340_v48, %v833_v45  ;;  %vm840_vm9 = vweird.f32 %v4340_v48 }
 0x868   : > { %vm841_vm11 = vmor %vm839_vm10, %vm840_vm9 }
 0x869   : > { %v836_v51 = vsub.f32 1.0, %v835_v50 }
 0x86b   : > { %v837_v54 = vmul.f32 %v4340_v48, %v836_v51 }
 0x86d   : > { %v838_v56 = vadd.f32 %v4340_v48, %v837_v54 }
 0x86f   : > { %v842_v59 = vsel %vm841_vm11, %v4340_v48, %v838_v56 }
 0x870   : > { %v847_v32 = vsel %vm844_vm12, %v846_v57, %v842_v59 }
 0x871   : > { %v848_v60 = vmul.f32 %v847_v32, %v823_v58 }
 0x873   : > { %v3969_v61 = vclamps-f32 %v848_v60, 1.0 }
 0x875   : > { %v851_v63 = vadd.f32 1.0, %v3969_v61 }
 0x877   : > { %v852_v0 = vmul.f32 %v851_v63, %v809_v62 }
 0x879   : > { %3970 = vmatmul.msk.f32.vlgmr.msrb.gmra.mxu3 %vm856_vm13, %v852_v0 }
 0x8fc   : > { %v877_v2 = vpop.f32.mrf.mxu3 }
 0x8fd   : > { %v878_v3 = vadd.f32 %v4274_v1, %v877_v2 }
 0x8ff   : > { %v880_v4 = vadd.f32 %v878_v3, %v4759_v13  ;;  %v3973_v13 = vld [vmem:[%s5669_s2 + $0x90] sm:$0xff] }
 0x900   : > { %961 = vmatpush.msrb.mxu0 %v3973_v13 }
 0x901   : > { %v881_v5 = vsel %vm291_vm0, %v880_v4, 0.0 }
 0x902   : > { %882 = vadd.xlane.f32.xlu0 %v881_v5  ;;  %962 = vmatpush.msrb.mxu0 %v3972_v14 }
 0x904   : > { %963 = vmatpush.msrb.mxu0 %v3971_v15 }
 0x975   : > { %v883_v6 = vpop.xlane.xlu0 %882 }
 0x976   : > { %v884_v7 = vmul.f32 %v883_v6, %v4632_v8 }
 0x978   : > { %v885_v9 = vsub.f32 %v880_v4, %v884_v7 }
 0x97a   : > { %v886_v10 = vmul.f32 %v885_v9, %v885_v9 }
 0x97c   : > { %v887_v11 = vsel %vm291_vm0, %v886_v10, 0.0 }
 0x97d   : > { %888 = vadd.xlane.f32.xlu0 %v887_v11 }
 0x9f0   : > { %v889_v16 = vpop.xlane.xlu0 %888 }
 0x9f1   : > { %v890_v17 = vmul.f32 %v889_v16, %v4632_v8 }
 0x9f3   : > { %v891_v18 = vadd.f32 1e-12, %v890_v17 }
 0x9f5   : > { %4341 = vrsqrt.f32 %v891_v18  ;;  %vm898_vm15 = vweird.f32 %v891_v18 }
 0x9fb   : > { %v4342_v19 = vpop.eup %4341 }
 0x9fc   : > { %v893_v20 = vmul.f32 %v4342_v19, %v891_v18  ;;  %vm899_vm14 = vweird.f32 %v4342_v19 }
 0x9fd   : > { %vm900_vm1 = vmor %vm898_vm15, %vm899_vm14 }
 0x9fe   : > { %v894_v21 = vmul.f32 %v4342_v19, %v893_v20 }
 0xa00   : > { %v895_v22 = vmul.f32 0.5, %v894_v21 }
 0xa02   : > { %v896_v23 = vsub.f32 1.5, %v895_v22  ;;  %v3976_v22 = vld [vmem:[%s5669_s2 + $0x80] sm:$0xff] }
 0xa04   : > { %v897_v24 = vmul.f32 %v4342_v19, %v896_v23 }
 0xa06   : > { %v901_v26 = vsel %vm900_vm1, %v4342_v19, %v897_v24 }
 0xa07   : > { %v902_v27 = vmul.f32 %v901_v26, %v885_v9 }
 0xa09   : > { %v906_v29 = vmul.f32 %v4275_v25, %v902_v27 }
 0xa0b   : > { %v4817_v30 = vadd.f32 %v4276_v28, %v906_v29 }
 0xa0d   : > { %3999 = vmatmul.msk.f32.vlgmr.msrb.gmra.mxu0 %vm291_vm0, %v4817_v30 }
 0xa8a   : > { %v965_v33 = vpop.f32.mrf.mxu0 }
 0xa8b   : > { %v4824_v34 = vadd.f32 %v4277_v31, %v965_v33  ;;  %v3977_v33 = vld [vmem:[%s5669_s2 + $0x98] sm:$0xff] }
 0xa8d   : > { %1036 = vrot.lane.b32.xlu1 %v4824_v34, %s5689_s22  ;;  %969 = vrot.lane.b32.xlu2 %v4824_v34, %s5695_s23  ;;  %s5720_s23 = smov 88   ;;  %s5721_s22 = smov 112  }
 0xa95   : > { %1147 = vrot.lane.b32.xlu1 %v4824_v34, %s5687_s15 }
 0xae7   : > { %v970_v35 = vpop.permute.xlu2 %969 }
 0xae8   : > { %4000 = vmatpush.xpose.msk.msra.mxu2 %vm386_vm5, %v970_v35 }
 0xaeb   : > { %4001 = vmatmul.msk.f32.vlgmr.msra.gmra.mxu2 %vm386_vm5, %v4824_v34 }
 0xaff   : > { %v1037_v36 = vpop.permute.xlu1 %1036 }
 0xb00   : > { %4003 = vmatpush.xpose.msk.msra.mxu0 %vm386_vm5, %v1037_v36 }
 0xb07   : > { %v1148_v55 = vpop.permute.xlu1 %1147 }
 0xb6e   : > { %v992_v37 = vpop.f32.mrf.mxu2 }
 0xb6f   : > { %v995_v38 = vmul.f32 0.35355338, %v992_v37 }
 0xb71   : > { %v996_v39 = vadd.f32 %v4678_v40, %v995_v38 }
 0xb73   : > { %v997_v41 = vsel %vm386_vm5, %v996_v39, -inf }
 0xb74   : > { %998 = vmax.xlane.f32.xlu0 %v997_v41 }
 0xb88   : > { %1008 = vrot.lane.b32.xlu0 %v4824_v34, %s5691_s9  ;;  %s4477_s9 = scalar_lea.hbm %s5674_s7, 2 }
 0xb90   : > { %1034 = vrot.lane.b32.xlu0 %v4824_v34, %s5693_s13 }
 0xb98   : > { %1240 = vrot.lane.b32.xlu0 %v4824_v34, %s5711_s19 }
 0xba0   : > { %1238 = vrot.lane.b32.xlu0 %v4824_v34, %s5712_s21 }
 0xbe7   : > { %v999_v43 = vpop.xlane.xlu0 %998 }
 0xbe8   : > { %v1000_v44 = vsub.f32 %v996_v39, %v999_v43 }
 0xbea   : > { %v1001_v45 = vmul.f32 1.442695, %v1000_v44 }
 0xbec   : > { %4343 = vpow2.f32 %v1001_v45 }
 0xbf2   : > { %v4344_v46 = vpop.eup %4343 }
 0xbf3   : > { %v1003_v47 = vsel %vm386_vm5, %v4344_v46, 0.0 }
 0xbf4   : > { %1004 = vadd.xlane.f32.xlu2 %v1003_v47 }
 0xbfa   : > { %v1009_v48 = vpop.permute.xlu0 %1008 }
 0xbfb   : > { %1029 = vmatpush.msra.mxu1 %v1009_v48  ;;  %v4278_v48 = vld [vmem:[%s5671_s4 + $0x9] ss:$0 sm:$0xff] }
 0xbfd   : > { %1119 = vmatpush.msrb.mxu1 %v3976_v22 }
 0xc02   : > { %v1035_v49 = vpop.permute.xlu0 %1034 }
 0xc03   : > { %4004 = vmatmul.msk.f32.vlgmr.msra.gmra.mxu0 %vm386_vm5, %v1035_v49 }
 0xc0a   : > { %v1241_v50 = vpop.permute.xlu0 %1240 }
 0xc0b   : > { %4012 = vmatpush.xpose.msk.msrb.mxu3 %vm386_vm5, %v1241_v50 }
 0xc0c   : > { %1149 = vrot.lane.b32.xlu2 %v4824_v34, %s5713_s29 }
 0xc12   : > { %v1239_v61 = vpop.permute.xlu0 %1238 }
 0xc67   : > { %v1005_v51 = vpop.xlane.xlu2 %1004 }
 0xc68   : > { %4345 = vrcp.f32 %v1005_v51 }
 0xc6e   : > { %v4346_v52 = vpop.eup %4345 }
 0xc6f   : > { %v1007_v53 = vmul.f32 %v4346_v52, %v4344_v46  ;;  %v1150_v54 = vpop.permute.xlu2 %1149 }
 0xc70   : > { %4008 = vmatpush.xpose.msk.msrb.mxu0 %vm386_vm5, %v1150_v54 }
 0xc71   : > { %4002 = vmatmul.msk.f32.vlgmr.msra.gmra.mxu1 %vm386_vm5, %v1007_v53 }
 0xc72   : > { %1232 = vmatpush.msra.mxu1 %v3977_v33 }
 0xc73   : > { %4009 = vmatmul.msk.f32.vlgmr.msrb.gmra.mxu0 %vm386_vm5, %v1148_v55 }
 0xc80   : > { %v1059_v56 = vpop.f32.mrf.mxu0 }
 0xc81   : > { %v1062_v57 = vmul.f32 0.35355338, %v1059_v56 }
 0xc83   : > { %v1063_v58 = vadd.f32 %v4678_v40, %v1062_v57  ;;  %v3982_v57 = vld [vmem:[%s5669_s2 + $0xb8] sm:$0xff] }
 0xc85   : > { %v1064_v59 = vsel %vm386_vm5, %v1063_v58, -inf }
 0xc86   : > { %1065 = vmax.xlane.f32.xlu0 %v1064_v59  ;;  %v3979_v59 = vld [vmem:[%s5669_s2 + $0x70] sm:$0xff] }
 0xcee   : > { %v1031_v32 = vpop.f32.mrf.mxu1 }
 0xcef   : > { %4007 = vmatmul.msk.f32.vlgmr.msra.gmra.mxu3 %vm386_vm5, %v1031_v32 }
 0xcf0   : > { %v1172_v60 = vpop.f32.mrf.mxu0 }
 0xcf1   : > { %v1175_v62 = vmul.f32 0.35355338, %v1172_v60 }
 0xcf3   : > { %v1176_v63 = vadd.f32 %v4678_v40, %v1175_v62 }
 0xcf5   : > { %v1177_v0 = vsel %vm386_vm5, %v1176_v63, -inf }
 0xcf6   : > { %1178 = vmax.xlane.f32.xlu1 %v1177_v0 }
 0xcf7   : > { %4013 = vmatmul.msk.f32.vlgmr.msrb.gmra.mxu3 %vm386_vm5, %v1239_v61 }
 0xcf9   : > { %v1066_v1 = vpop.xlane.xlu0 %1065 }
 0xcfa   : > { %v1067_v2 = vsub.f32 %v1063_v58, %v1066_v1  ;;  %v3980_v58 = vld [vmem:[%s5669_s2 + $0x88] sm:$0xff] }
 0xcfc   : > { %v1068_v3 = vmul.f32 1.442695, %v1067_v2 }
 0xcfe   : > { %4347 = vpow2.f32 %v1068_v3 }
 0xd04   : > { %v4348_v4 = vpop.eup %4347 }
 0xd05   : > { %v1070_v5 = vsel %vm386_vm5, %v4348_v4, 0.0 }
 0xd06   : > { %1071 = vadd.xlane.f32.xlu0 %v1070_v5 }
 0xd1a   : > { %1075 = vrot.lane.b32.xlu0 %v4824_v34, %s5714_s14 }
 0xd69   : > { %v1179_v6 = vpop.xlane.xlu1 %1178 }
 0xd6a   : > { %v1180_v7 = vsub.f32 %v1176_v63, %v1179_v6 }
 0xd6c   : > { %v1181_v9 = vmul.f32 1.442695, %v1180_v7  ;;  %v4280_v7 = vld [vmem:[%s5671_s4 + $0xb] ss:$0 sm:$0xff] }
 0xd6e   : > { %4349 = vpow2.f32 %v1181_v9 }
 0xd72   : > { %v1144_v10 = vpop.f32.mrf.mxu3 }
 0xd74   : > { %v4350_v11 = vpop.eup %4349 }
 0xd75   : > { %v1183_v12 = vsel %vm386_vm5, %v4350_v11, 0.0 }
 0xd76   : > { %1184 = vadd.xlane.f32.xlu1 %v1183_v12 }
 0xd79   : > { %v1072_v17 = vpop.xlane.xlu0 %1071 }
 0xd7a   : > { %v1263_v13 = vpop.f32.mrf.mxu3  ;;  %4351 = vrcp.f32 %v1072_v17  ;;  %v3990_v17 = vld [vmem:[%s5670_s3 + $0x78] sm:$0xff] }
 0xd7b   : > { %v1266_v14 = vmul.f32 0.35355338, %v1263_v13  ;;  %1448 = vmatpush.msra.mxu3 %v3990_v17 }
 0xd7d   : > { %v1267_v15 = vadd.f32 %v4678_v40, %v1266_v14 }
 0xd7f   : > { %v1268_v16 = vsel %vm386_vm5, %v1267_v15, -inf }
 0xd80   : > { %1269 = vmax.xlane.f32.xlu2 %v1268_v16  ;;  %v4352_v18 = vpop.eup %4351 }
 0xd81   : > { %v1074_v19 = vmul.f32 %v4352_v18, %v4348_v4  ;;  %v4279_v4 = vld [vmem:[%s5671_s4 + $0xa] ss:$0 sm:$0xff] }
 0xd8c   : > { %v1076_v20 = vpop.permute.xlu0 %1075 }
 0xd8d   : > { %1096 = vmatpush.msrb.mxu2 %v1076_v20  ;;  %v3989_v20 = vld [vmem:[%s5670_s3 + $0x70] sm:$0xff] }
 0xd8e   : > { %4005 = vmatmul.msk.f32.vlgmr.msrb.gmra.mxu2 %vm386_vm5, %v1074_v19  ;;  %1449 = vmatpush.msra.mxu3 %v3989_v20 }
 0xd98   : > { %1188 = vrot.lane.b32.xlu2 %v4824_v34, %s5715_s16 }
 0xde9   : > { %v1185_v21 = vpop.xlane.xlu1 %1184 }
 0xdea   : > { %4353 = vrcp.f32 %v1185_v21 }
 0xdf0   : > { %v4354_v25 = vpop.eup %4353 }
 0xdf1   : > { %v1187_v26 = vmul.f32 %v4354_v25, %v4350_v11  ;;  %v4281_v11 = vld [vmem:[%s5671_s4 + $0xc] ss:$0 sm:$0xff]  ;;  %v3987_v25 = vld [vmem:[%s5670_s3 + $0x60] sm:$0xff] }
 0xdf3   : > { %v1270_v40 = vpop.xlane.xlu2 %1269 }
 0xdf4   : > { %v1271_v23 = vsub.f32 %v1267_v15, %v1270_v40  ;;  %v3988_v40 = vld [vmem:[%s5670_s3 + $0x68] sm:$0xff] }
 0xdf5   : > { %1450 = vmatpush.msra.mxu3 %v3988_v40 }
 0xdf6   : > { %v1272_v24 = vmul.f32 1.442695, %v1271_v23 }
 0xdf7   : > { %1451 = vmatpush.msra.mxu3 %v3987_v25 }
 0xdf8   : > { %4355 = vpow2.f32 %v1272_v24 }
 0xdfb   : > { %v1189_v27 = vpop.permute.xlu2 %1188 }
 0xdfc   : > { %1209 = vmatpush.msra.mxu2 %v1189_v27  ;;  %v3986_v27 = vld [vmem:[%s5670_s3 + $0x58] sm:$0xff] }
 0xdfd   : > { %4010 = vmatmul.msk.f32.vlgmr.msra.gmra.mxu2 %vm386_vm5, %v1187_v26  ;;  %1452 = vmatpush.msra.mxu3 %v3986_v27 }
 0xdfe   : > { %v4356_v28 = vpop.eup %4355 }
 0xdff   : > { %v1274_v29 = vsel %vm386_vm5, %v4356_v28, 0.0 }
 0xe00   : > { %1275 = vadd.xlane.f32.xlu1 %v1274_v29 }
 0xe11   : > { %v1098_v31 = vpop.f32.mrf.mxu2 }
 0xe12   : > { %4006 = vmatmul.msk.f32.vlgmr.msrb.gmra.mxu1 %vm386_vm5, %v1098_v31  ;;  %v3985_v31 = vld [vmem:[%s5670_s3 + $0x50] sm:$0xff] }
 0xe13   : > { %1382 = vmatpush.msrb.mxu1 %v3982_v57  ;;  %1453 = vmatpush.msra.mxu3 %v3985_v31 }
 0xe19   : > { %1279 = vrot.lane.b32.xlu1 %v4824_v34, %s5716_s20  ;;  %v3978_v34 = vld [vmem:[%s5669_s2 + $0xb0] sm:$0xff] }
 0xe1a   : > { %1323 = vmatpush.msrb.mxu2 %v3978_v34 }
 0xe73   : > { %v1276_v35 = vpop.xlane.xlu1 %1275 }
 0xe74   : > { %4357 = vrcp.f32 %v1276_v35  ;;  %v3984_v35 = vld [vmem:[%s5670_s3 + $0x48] sm:$0xff] }
 0xe75   : > { %1454 = vmatpush.msra.mxu3 %v3984_v35 }
 0xe7a   : > { %v4358_v37 = vpop.eup %4357 }
 0xe7b   : > { %v1278_v38 = vmul.f32 %v4358_v37, %v4356_v28  ;;  %v3983_v37 = vld [vmem:[%s5670_s3 + $0x40] sm:$0xff] }
 0xe7c   : > { %1455 = vmatpush.msra.mxu3 %v3983_v37 }
 0xe80   : > { %v1211_v36 = vpop.f32.mrf.mxu2 }
 0xe81   : > { %4011 = vmatmul.msk.f32.vlgmr.msra.gmra.mxu1 %vm386_vm5, %v1211_v36 }
 0xe8b   : > { %v1280_v39 = vpop.permute.xlu1 %1279 }
 0xe8c   : > { %1300 = vmatpush.msra.mxu0 %v1280_v39 }
 0xe8d   : > { %4014 = vmatmul.msk.f32.vlgmr.msra.gmra.mxu0 %vm386_vm5, %v1278_v38 }
 0xe8f   : > { %v1121_v42 = vpop.f32.mrf.mxu1 }
 0xe90   : > { %v1145_v44 = vadd.f32 %v1144_v10, %v1121_v42 }
 0xefe   : > { %v1234_v43 = vpop.f32.mrf.mxu1 }
 0xeff   : > { %v1237_v45 = vadd.f32 %v1234_v43, %v1145_v44 }
 0xf0a   : > { %v1302_v41 = vpop.f32.mrf.mxu0 }
 0xf0b   : > { %4015 = vmatmul.msk.f32.vlgmr.msrb.gmra.mxu2 %vm386_vm5, %v1302_v41 }
 0xf8e   : > { %v1325_v46 = vpop.f32.mrf.mxu2 }
 0xf8f   : > { %v1328_v47 = vadd.f32 %v1325_v46, %v1237_v45 }
 0xf91   : > { %v1329_v49 = vadd.f32 %v1328_v47, %v4817_v30  ;;  %v3981_v30 = vld [vmem:[%s5669_s2 + $0xa0] sm:$0xff] }
 0xf92   : > { %1383 = vmatpush.msrb.mxu1 %v3981_v30 }
 0xf93   : > { %v1333_v50 = vadd.f32 %v4278_v48, %v1329_v49 }
 0xf94   : > { %1384 = vmatpush.msrb.mxu1 %v3980_v58 }
 0xf95   : > { %v1334_v51 = vsel %vm291_vm0, %v1333_v50, 0.0 }
 0xf96   : > { %1335 = vadd.xlane.f32.xlu0 %v1334_v51  ;;  %1385 = vmatpush.msrb.mxu1 %v3979_v59 }
0x1009   : > { %v1336_v52 = vpop.xlane.xlu0 %1335 }
0x100a   : > { %v1337_v53 = vmul.f32 %v1336_v52, %v4632_v8 }
0x100c   : > { %v1338_v54 = vsub.f32 %v1333_v50, %v1337_v53 }
0x100e   : > { %v1339_v55 = vmul.f32 %v1338_v54, %v1338_v54 }
0x1010   : > { %v1340_v56 = vsel %vm291_vm0, %v1339_v55, 0.0 }
0x1011   : > { %1341 = vadd.xlane.f32.xlu2 %v1340_v56 }
0x1084   : > { %v1342_v32 = vpop.xlane.xlu2 %1341 }
0x1085   : > { %v1343_v60 = vmul.f32 %v1342_v32, %v4632_v8 }
0x1087   : > { %v1344_v61 = vadd.f32 1e-12, %v1343_v60 }
0x1089   : > { %4359 = vrsqrt.f32 %v1344_v61  ;;  %vm1351_vm3 = vweird.f32 %v1344_v61 }
0x108f   : > { %v4360_v62 = vpop.eup %4359 }
0x1090   : > { %v1346_v63 = vmul.f32 %v4360_v62, %v1344_v61  ;;  %vm1352_vm2 = vweird.f32 %v4360_v62  ;;  %v4282_v61 = vld [vmem:[%s5671_s4 + $0xd] ss:$0 sm:$0xff] }
0x1091   : > { %vm1353_vm4 = vmor %vm1351_vm3, %vm1352_vm2 }
0x1092   : > { %v1347_v0 = vmul.f32 %v4360_v62, %v1346_v63 }
0x1094   : > { %v1348_v1 = vmul.f32 0.5, %v1347_v0 }
0x1096   : > { %v1349_v2 = vsub.f32 1.5, %v1348_v1 }
0x1098   : > { %v1350_v3 = vmul.f32 %v4360_v62, %v1349_v2 }
0x109a   : > { %v1354_v5 = vsel %vm1353_vm4, %v4360_v62, %v1350_v3 }
0x109b   : > { %v1355_v6 = vmul.f32 %v1354_v5, %v1338_v54 }
0x109d   : > { %v1359_v9 = vmul.f32 %v4279_v4, %v1355_v6 }
0x109f   : > { %v4915_v10 = vadd.f32 %v4280_v7, %v1359_v9  ;;  %v4022_v7 = vld [vmem:[%s5669_s2 + $0x108] sm:$0xff]  ;;  %v4021_v9 = vld [vmem:[%s5669_s2 + $0xf0] sm:$0xff] }
0x10a0   : > { %1540 = vmatpush.msrb.mxu0 %v4022_v7 }
0x10a1   : > { %4016 = vmatmul.msk.f32.vlgmr.msrb.gmra.mxu1 %vm291_vm0, %v4915_v10 }
0x10a2   : > { %1541 = vmatpush.msrb.mxu0 %v4021_v9 }
0x111e   : > { %v1387_v12 = vpop.f32.mrf.mxu1 }
0x111f   : > { %v1388_v13 = vadd.f32 %v4281_v11, %v1387_v12  ;;  %v4019_v11 = vld [vmem:[%s5669_s2 + $0xc0] sm:$0xff] }
0x1121   : > { %v1391_v14 = vmul.f32 0.70710677, %v1388_v13  ;;  %v1390_v59 = vmul.f32 0.5, %v1388_v13 }
0x1123   : > { %v1392_v15 = vmul.f32 %v1391_v14, %v1391_v14 }
0x1125   : > { %v1393_v16 = vmin.f32 %v1392_v15, 16.0 }
0x1127   : > { %v1394_v18 = vmul.f32 2.1237322e-06, %v1393_v16  ;;  %v1405_v19 = vmul.f32 3.8918573e-05, %v1393_v16 }
0x1129   : > { %v1395_v21 = vadd.f32 0.00028619796, %v1394_v18  ;;  %v1406_v22 = vadd.f32 0.001143296, %v1405_v19 }
0x112b   : > { %v1396_v23 = vmul.f32 %v1395_v21, %v1393_v16  ;;  %v1407_v24 = vmul.f32 %v1406_v22, %v1393_v16  ;;  %v4283_v21 = vld [vmem:[%s5671_s4 + $0xe] ss:$0 sm:$0xff] }
0x112d   : > { %v1408_v26 = vadd.f32 0.014752088, %v1407_v24  ;;  %v1397_v28 = vadd.f32 0.0036580483, %v1396_v23  ;;  %v4284_v23 = vld [vmem:[%s5671_s4 + $0xf] ss:$0 sm:$0xff] }
0x112f   : > { %v1409_v29 = vmul.f32 %v1408_v26, %v1393_v16  ;;  %v1398_v36 = vmul.f32 %v1397_v28, %v1393_v16  ;;  %v4285_v26 = vld [vmem:[%s5671_s4 + $0x10] ss:$0 sm:$0xff] }
0x1131   : > { %v1410_v33 = vadd.f32 0.112945676, %v1409_v29  ;;  %v1399_v34 = vadd.f32 0.05243302, %v1398_v36  ;;  %v4023_v29 = vld [vmem:[%s5669_s2 + $0xc8] sm:$0xff] }
0x1132   : > { %1722 = vmatpush.msrb.mxu3 %v4023_v29 }
0x1133   : > { %v1411_v38 = vmul.f32 %v1410_v33, %v1393_v16  ;;  %v1400_v43 = vmul.f32 %v1399_v34, %v1393_v16 }
0x1135   : > { %v1412_v39 = vadd.f32 0.4994258, %v1411_v38  ;;  %v1401_v44 = vadd.f32 0.18741608, %v1400_v43  ;;  %v4998_v38 = vld [vmem:[%s4626_s17] ss:$0 sm:$0xff] }
0x1137   : > { %v1413_v41 = vmul.f32 %v1412_v39, %v1393_v16  ;;  %v1402_v46 = vmul.f32 %v1401_v44, %v1393_v16 }
0x1139   : > { %v1414_v42 = vadd.f32 1.0, %v1413_v41  ;;  %v1403_v50 = vadd.f32 1.1283791, %v1402_v46 }
0x113b   : > { %4361 = vrcp.f32 %v1414_v42  ;;  %v1426_v49 = vand.u32 2147483648, %v1414_v42  ;;  %v1424_v52 = vand.u32 2147483647, %v1414_v42  ;;  %vm1420_vm7 = vweird.f32 %v1414_v42 }
0x113c   : > { %v1404_v55 = vmul.f32 %v1403_v50, %v1391_v14 }
0x113d   : > { %v1427_v54 = vor.u32 1.1754944e-38, %v1426_v49  ;;  %vm1425_vm9 = vcmp.eq.f32.partialorder %v1424_v52, 8.507059e+37 }
0x1141   : > { %v4362_v45 = vpop.eup %4361 }
0x1142   : > { %v1416_v47 = vmul.f32 %v4362_v45, %v1414_v42  ;;  %vm1421_vm6 = vweird.f32 %v4362_v45 }
0x1143   : > { %vm1422_vm8 = vmor %vm1420_vm7, %vm1421_vm6 }
0x1144   : > { %v1417_v48 = vsub.f32 1.0, %v1416_v47 }
0x1146   : > { %v1418_v51 = vmul.f32 %v4362_v45, %v1417_v48 }
0x1148   : > { %v1419_v53 = vadd.f32 %v4362_v45, %v1418_v51 }
0x114a   : > { %v1423_v56 = vsel %vm1422_vm8, %v4362_v45, %v1419_v53 }
0x114b   : > { %v1428_v57 = vsel %vm1425_vm9, %v1427_v54, %v1423_v56 }
0x114c   : > { %v1429_v30 = vmul.f32 %v1428_v57, %v1404_v55 }
0x114e   : > { %v4017_v58 = vclamps-f32 %v1429_v30, 1.0 }
0x1150   : > { %v1432_v32 = vadd.f32 1.0, %v4017_v58 }
0x1152   : > { %v1433_v60 = vmul.f32 %v1432_v32, %v1390_v59 }
0x1154   : > { %4018 = vmatmul.msk.f32.vlgmr.msra.gmra.mxu3 %vm856_vm13, %v1433_v60 }
0x11d7   : > { %v1457_v62 = vpop.f32.mrf.mxu3 }
0x11d8   : > { %v1458_v63 = vadd.f32 %v4282_v61, %v1457_v62 }
0x11da   : > { %v1460_v0 = vadd.f32 %v1458_v63, %v4915_v10  ;;  %v4020_v10 = vld [vmem:[%s5669_s2 + $0xd8] sm:$0xff] }
0x11db   : > { %1542 = vmatpush.msrb.mxu0 %v4020_v10 }
0x11dc   : > { %v1461_v1 = vsel %vm291_vm0, %v1460_v0, 0.0 }
0x11dd   : > { %1462 = vadd.xlane.f32.xlu1 %v1461_v1  ;;  %1543 = vmatpush.msrb.mxu0 %v4019_v11 }
0x1250   : > { %v1463_v2 = vpop.xlane.xlu1 %1462 }
0x1251   : > { %v1464_v3 = vmul.f32 %v1463_v2, %v4632_v8 }
0x1253   : > { %v1465_v4 = vsub.f32 %v1460_v0, %v1464_v3 }
0x1255   : > { %v1466_v5 = vmul.f32 %v1465_v4, %v1465_v4 }
0x1257   : > { %v1467_v6 = vsel %vm291_vm0, %v1466_v5, 0.0 }
0x1258   : > { %1468 = vadd.xlane.f32.xlu0 %v1467_v6 }
0x12cb   : > { %v1469_v12 = vpop.xlane.xlu0 %1468 }
0x12cc   : > { %v1470_v13 = vmul.f32 %v1469_v12, %v4632_v8 }
0x12ce   : > { %v1471_v14 = vadd.f32 1e-12, %v1470_v13 }
0x12d0   : > { %4363 = vrsqrt.f32 %v1471_v14  ;;  %vm1478_vm11 = vweird.f32 %v1471_v14 }
0x12d6   : > { %v4364_v15 = vpop.eup %4363 }
0x12d7   : > { %v1473_v16 = vmul.f32 %v4364_v15, %v1471_v14  ;;  %vm1479_vm10 = vweird.f32 %v4364_v15 }
0x12d8   : > { %vm1480_vm12 = vmor %vm1478_vm11, %vm1479_vm10 }
0x12d9   : > { %v1474_v17 = vmul.f32 %v4364_v15, %v1473_v16 }
0x12db   : > { %v1475_v18 = vmul.f32 0.5, %v1474_v17 }
0x12dd   : > { %v1476_v19 = vsub.f32 1.5, %v1475_v18 }
0x12df   : > { %v1477_v20 = vmul.f32 %v4364_v15, %v1476_v19 }
0x12e1   : > { %v1481_v22 = vsel %vm1480_vm12, %v4364_v15, %v1477_v20 }
0x12e2   : > { %v1482_v40 = vmul.f32 %v1481_v22, %v1465_v4 }
0x12e4   : > { %v1486_v24 = vmul.f32 %v4283_v21, %v1482_v40 }
0x12e6   : > { %v4973_v25 = vadd.f32 %v4284_v23, %v1486_v24 }
0x12e8   : > { %4047 = vmatmul.msk.f32.vlgmr.msrb.gmra.mxu0 %vm291_vm0, %v4973_v25 }
0x1365   : > { %v1545_v27 = vpop.f32.mrf.mxu0 }
0x1366   : > { %v4980_v28 = vadd.f32 %v4285_v26, %v1545_v27  ;;  %v4024_v26 = vld [vmem:[%s5669_s2 + $0xe0] sm:$0xff]  ;;  %v4025_v27 = vld [vmem:[%s5669_s2 + $0xf8] sm:$0xff] }
0x1368   : > { %1549 = vrot.lane.b32.xlu0 %v4980_v28, %s5717_s18 }
0x1370   : > { %1614 = vrot.lane.b32.xlu0 %v4980_v28, %s5718_s8 }
0x1378   : > { %1820 = vrot.lane.b32.xlu0 %v4980_v28, %s5711_s19 }
0x1380   : > { %1729 = vrot.lane.b32.xlu0 %v4980_v28, %s5713_s29 }
0x13da   : > { %v1550_v31 = vpop.permute.xlu0 %1549 }
0x13db   : > { %4048 = vmatpush.xpose.msk.msra.mxu2 %vm386_vm5, %v1550_v31 }
0x13de   : > { %4049 = vmatmul.msk.f32.vlgmr.msra.gmra.mxu2 %vm386_vm5, %v4980_v28 }
0x13e2   : > { %v1615_v33 = vpop.permute.xlu0 %1614 }
0x13ea   : > { %v1821_v35 = vpop.permute.xlu0 %1820 }
0x13eb   : > { %4060 = vmatpush.xpose.msk.msra.mxu3 %vm386_vm5, %v1821_v35 }
0x13f2   : > { %v1730_v51 = vpop.permute.xlu0 %1729 }
0x1461   : > { %v1572_v36 = vpop.f32.mrf.mxu2 }
0x1462   : > { %v1575_v37 = vmul.f32 0.35355338, %v1572_v36 }
0x1464   : > { %v1576_v39 = vadd.f32 %v4998_v38, %v1575_v37  ;;  %v4026_v37 = vld [vmem:[%s5669_s2 + $0x110] sm:$0xff] }
0x1466   : > { %v1577_v34 = vsel %vm386_vm5, %v1576_v39, -inf }
0x1467   : > { %1578 = vmax.xlane.f32.xlu2 %v1577_v34 }
0x147f   : > { %1588 = vrot.lane.b32.xlu2 %v4980_v28, %s5719_s0 }
0x1487   : > { %1818 = vrot.lane.b32.xlu2 %v4980_v28, %s5712_s21 }
0x14da   : > { %v1579_v41 = vpop.xlane.xlu2 %1578 }
0x14db   : > { %v1580_v42 = vsub.f32 %v1576_v39, %v1579_v41 }
0x14dd   : > { %v1581_v43 = vmul.f32 1.442695, %v1580_v42 }
0x14df   : > { %4365 = vpow2.f32 %v1581_v43 }
0x14e2   : > { %v1589_v44 = vpop.permute.xlu2 %1588 }
0x14e3   : > { %1609 = vmatpush.msra.mxu1 %v1589_v44 }
0x14e5   : > { %v4366_v45 = vpop.eup %4365  ;;  %1699 = vmatpush.msrb.mxu1 %v4024_v26 }
0x14e6   : > { %v1583_v46 = vsel %vm386_vm5, %v4366_v45, 0.0 }
0x14e7   : > { %1584 = vadd.xlane.f32.xlu1 %v1583_v46  ;;  %v4286_v46 = vld [vmem:[%s5671_s4 + $0x11] ss:$0 sm:$0xff] }
0x14ea   : > { %v1819_v54 = vpop.permute.xlu2 %1818 }
0x1500   : > { %1616 = vrot.lane.b32.xlu1 %v4980_v28, %s5720_s23 }
0x1508   : > { %1727 = vrot.lane.b32.xlu1 %v4980_v28, %s5721_s22 }
0x155a   : > { %v1585_v47 = vpop.xlane.xlu1 %1584 }
0x155b   : > { %4367 = vrcp.f32 %v1585_v47 }
0x1561   : > { %v4368_v48 = vpop.eup %4367 }
0x1562   : > { %v1587_v49 = vmul.f32 %v4368_v48, %v4366_v45 }
0x1564   : > { %4050 = vmatmul.msk.f32.vlgmr.msra.gmra.mxu1 %vm386_vm5, %v1587_v49 }
0x1565   : > { %1812 = vmatpush.msra.mxu1 %v4025_v27 }
0x1572   : > { %v1617_v50 = vpop.permute.xlu1 %1616 }
0x1573   : > { %4051 = vmatpush.xpose.msk.msra.mxu0 %vm386_vm5, %v1617_v50 }
0x1576   : > { %4052 = vmatmul.msk.f32.vlgmr.msra.gmra.mxu0 %vm386_vm5, %v1615_v33 }
0x1577   : > { %4056 = vmatpush.xpose.msk.msrb.mxu0 %vm386_vm5, %v1730_v51 }
0x157a   : > { %v1728_v52 = vpop.permute.xlu1 %1727 }
0x157e   : > { %4057 = vmatmul.msk.f32.vlgmr.msrb.gmra.mxu0 %vm386_vm5, %v1728_v52 }
0x15e1   : > { %v1611_v53 = vpop.f32.mrf.mxu1 }
0x15e2   : > { %4055 = vmatmul.msk.f32.vlgmr.msrb.gmra.mxu3 %vm386_vm5, %v1611_v53 }
0x15ea   : > { %4061 = vmatmul.msk.f32.vlgmr.msra.gmra.mxu3 %vm386_vm5, %v1819_v54 }
0x15f3   : > { %v1639_v55 = vpop.f32.mrf.mxu0 }
0x15f4   : > { %v1642_v56 = vmul.f32 0.35355338, %v1639_v55  ;;  %v4030_v55 = vld [vmem:[%s5669_s2 + $0x118] sm:$0xff] }
0x15f6   : > { %v1643_v57 = vadd.f32 %v4998_v38, %v1642_v56  ;;  %v4028_v56 = vld [vmem:[%s5669_s2 + $0xe8] sm:$0xff] }
0x15f8   : > { %v1644_v30 = vsel %vm386_vm5, %v1643_v57, -inf }
0x15f9   : > { %1645 = vmax.xlane.f32.xlu2 %v1644_v30 }
0x15fb   : > { %v1752_v58 = vpop.f32.mrf.mxu0 }
0x15fc   : > { %v1755_v59 = vmul.f32 0.35355338, %v1752_v58 }
0x15fe   : > { %v1756_v32 = vadd.f32 %v4998_v38, %v1755_v59 }
0x1600   : > { %v1757_v60 = vsel %vm386_vm5, %v1756_v32, -inf }
0x1601   : > { %1758 = vmax.xlane.f32.xlu0 %v1757_v60 }
0x1665   : > { %v5022_v61 = vpop.f32.mrf.mxu3 }
0x166c   : > { %v1646_v62 = vpop.xlane.xlu2 %1645 }
0x166d   : > { %v1647_v63 = vsub.f32 %v1643_v57, %v1646_v62  ;;  %v1843_v0 = vpop.f32.mrf.mxu3  ;;  %v4027_v57 = vld [vmem:[%s5669_s2 + $0xd0] sm:$0xff] }
0x166e   : > { %v1846_v1 = vmul.f32 0.35355338, %v1843_v0 }
0x166f   : > { %v1648_v2 = vmul.f32 1.442695, %v1647_v63 }
0x1670   : > { %v1847_v3 = vadd.f32 %v4998_v38, %v1846_v1  ;;  %v4287_v1 = vld [vmem:[%s5671_s4 + $0x12] ss:$0 sm:$0xff] }
0x1671   : > { %4369 = vpow2.f32 %v1648_v2 }
0x1672   : > { %v1848_v4 = vsel %vm386_vm5, %v1847_v3, -inf }
0x1673   : > { %1849 = vmax.xlane.f32.xlu1 %v1848_v4  ;;  %v4288_v4 = vld [vmem:[%s5671_s4 + $0x13] ss:$0 sm:$0xff] }
0x1674   : > { %v1759_v5 = vpop.xlane.xlu0 %1758 }
0x1675   : > { %v1760_v6 = vsub.f32 %v1756_v32, %v1759_v5 }
0x1677   : > { %v4370_v7 = vpop.eup %4369  ;;  %v1761_v9 = vmul.f32 1.442695, %v1760_v6 }
0x1678   : > { %v1650_v10 = vsel %vm386_vm5, %v4370_v7, 0.0 }
0x1679   : > { %4371 = vpow2.f32 %v1761_v9  ;;  %1651 = vadd.xlane.f32.xlu2 %v1650_v10 }
0x167f   : > { %v4372_v11 = vpop.eup %4371 }
0x1680   : > { %v1763_v12 = vsel %vm386_vm5, %v4372_v11, 0.0 }
0x1681   : > { %1764 = vadd.xlane.f32.xlu0 %v1763_v12 }
0x1691   : > { %1655 = vrot.lane.b32.xlu2 %v4980_v28, %s5714_s14 }
0x1695   : > { %1768 = vrot.lane.b32.xlu0 %v4980_v28, %s5715_s16 }
0x16e6   : > { %v1850_v13 = vpop.xlane.xlu1 %1849 }
0x16e7   : > { %v1851_v14 = vsub.f32 %v1847_v3, %v1850_v13 }
0x16e9   : > { %v1852_v15 = vmul.f32 1.442695, %v1851_v14  ;;  %v4038_v14 = vld [vmem:[%s5670_s3 + $0xb8] sm:$0xff] }
0x16ea   : > { %2028 = vmatpush.msrb.mxu3 %v4038_v14 }
0x16eb   : > { %4373 = vpow2.f32 %v1852_v15 }
0x16ec   : > { %v1652_v16 = vpop.xlane.xlu2 %1651 }
0x16ed   : > { %4375 = vrcp.f32 %v1652_v16 }
0x16f1   : > { %v4374_v17 = vpop.eup %4373 }
0x16f2   : > { %v1854_v18 = vsel %vm386_vm5, %v4374_v17, 0.0 }
0x16f3   : > { %v4376_v19 = vpop.eup %4375  ;;  %1855 = vadd.xlane.f32.xlu1 %v1854_v18 }
0x16f4   : > { %v1654_v20 = vmul.f32 %v4376_v19, %v4370_v7  ;;  %v1656_v21 = vpop.permute.xlu2 %1655  ;;  %v1765_v22 = vpop.xlane.xlu0 %1764  ;;  %v4289_v7 = vld [vmem:[%s5671_s4 + $0x14] ss:$0 sm:$0xff] }
0x16f5   : > { %1676 = vmatpush.msrb.mxu2 %v1656_v21  ;;  %4377 = vrcp.f32 %v1765_v22 }
0x16f6   : > { %4053 = vmatmul.msk.f32.vlgmr.msrb.gmra.mxu2 %vm386_vm5, %v1654_v20  ;;  %v4036_v20 = vld [vmem:[%s5670_s3 + $0xa8] sm:$0xff] }
0x16fb   : > { %v4378_v40 = vpop.eup %4377 }
0x16fc   : > { %v1767_v23 = vmul.f32 %v4378_v40, %v4372_v11  ;;  %v4035_v40 = vld [vmem:[%s5670_s3 + $0xa0] sm:$0xff] }
0x1707   : > { %v1769_v24 = vpop.permute.xlu0 %1768 }
0x1708   : > { %1789 = vmatpush.msra.mxu2 %v1769_v24  ;;  %v4034_v24 = vld [vmem:[%s5670_s3 + $0x98] sm:$0xff] }
0x1709   : > { %4058 = vmatmul.msk.f32.vlgmr.msra.gmra.mxu2 %vm386_vm5, %v1767_v23 }
0x170a   : > { %1903 = vmatpush.msrb.mxu2 %v4026_v37 }
0x170c   : > { %1859 = vrot.lane.b32.xlu1 %v4980_v28, %s5716_s20 }
0x1766   : > { %v1856_v29 = vpop.xlane.xlu1 %1855 }
0x1767   : > { %4379 = vrcp.f32 %v1856_v29  ;;  %v4033_v29 = vld [vmem:[%s5670_s3 + $0x90] sm:$0xff] }
0x176d   : > { %v4380_v33 = vpop.eup %4379 }
0x176e   : > { %v1858_v35 = vmul.f32 %v4380_v33, %v4374_v17  ;;  %v4037_v17 = vld [vmem:[%s5670_s3 + $0xb0] sm:$0xff]  ;;  %v4032_v33 = vld [vmem:[%s5670_s3 + $0x88] sm:$0xff] }
0x176f   : > { %2029 = vmatpush.msrb.mxu3 %v4037_v17 }
0x1771   : > { %2030 = vmatpush.msrb.mxu3 %v4036_v20 }
0x1773   : > { %2031 = vmatpush.msrb.mxu3 %v4035_v40 }
0x1775   : > { %2032 = vmatpush.msrb.mxu3 %v4034_v24  ;;  %v4293_v24 = vld [vmem:[%s5671_s4 + $0x18] ss:$0 sm:$0xff] }
0x1777   : > { %2033 = vmatpush.msrb.mxu3 %v4033_v29  ;;  %v4071_v29 = vld [vmem:[%s5669_s2 + $0x128] sm:$0xff] }
0x1779   : > { %v1678_v31 = vpop.f32.mrf.mxu2  ;;  %2034 = vmatpush.msrb.mxu3 %v4032_v33 }
0x177a   : > { %4054 = vmatmul.msk.f32.vlgmr.msrb.gmra.mxu1 %vm386_vm5, %v1678_v31 }
0x177b   : > { %1962 = vmatpush.msrb.mxu1 %v4030_v55 }
0x177e   : > { %v1860_v36 = vpop.permute.xlu1 %1859 }
0x177f   : > { %1880 = vmatpush.msra.mxu0 %v1860_v36  ;;  %v4031_v36 = vld [vmem:[%s5670_s3 + $0x80] sm:$0xff] }
0x1780   : > { %4062 = vmatmul.msk.f32.vlgmr.msra.gmra.mxu0 %vm386_vm5, %v1858_v35  ;;  %2035 = vmatpush.msrb.mxu3 %v4031_v36 }
0x1782   : > { %2302 = vmatpush.msra.mxu3 %v4071_v29 }
0x178c   : > { %v1791_v28 = vpop.f32.mrf.mxu2 }
0x178d   : > { %4059 = vmatmul.msk.f32.vlgmr.msra.gmra.mxu1 %vm386_vm5, %v1791_v28 }
0x17f7   : > { %v1701_v34 = vpop.f32.mrf.mxu1 }
0x17f8   : > { %v1725_v42 = vadd.f32 %v5022_v61, %v1701_v34 }
0x17fd   : > { %v1882_v39 = vpop.f32.mrf.mxu0 }
0x17fe   : > { %4063 = vmatmul.msk.f32.vlgmr.msrb.gmra.mxu2 %vm386_vm5, %v1882_v39 }
0x180a   : > { %v1814_v41 = vpop.f32.mrf.mxu1 }
0x180b   : > { %v1817_v43 = vadd.f32 %v1814_v41, %v1725_v42 }
0x1881   : > { %v1905_v44 = vpop.f32.mrf.mxu2 }
0x1882   : > { %v1908_v45 = vadd.f32 %v1905_v44, %v1817_v43 }
0x1884   : > { %v1909_v47 = vadd.f32 %v1908_v45, %v4973_v25  ;;  %v4029_v25 = vld [vmem:[%s5669_s2 + $0x100] sm:$0xff] }
0x1885   : > { %1963 = vmatpush.msrb.mxu1 %v4029_v25 }
0x1886   : > { %v1913_v48 = vadd.f32 %v4286_v46, %v1909_v47 }
0x1887   : > { %1964 = vmatpush.msrb.mxu1 %v4028_v56 }
0x1888   : > { %v1914_v49 = vsel %vm291_vm0, %v1913_v48, 0.0 }
0x1889   : > { %1915 = vadd.xlane.f32.xlu0 %v1914_v49  ;;  %1965 = vmatpush.msrb.mxu1 %v4027_v57 }
0x18fc   : > { %v1916_v50 = vpop.xlane.xlu0 %1915 }
0x18fd   : > { %v1917_v51 = vmul.f32 %v1916_v50, %v4632_v8 }
0x18ff   : > { %v1918_v52 = vsub.f32 %v1913_v48, %v1917_v51 }
0x1901   : > { %v1919_v53 = vmul.f32 %v1918_v52, %v1918_v52 }
0x1903   : > { %v1920_v54 = vsel %vm291_vm0, %v1919_v53, 0.0 }
0x1904   : > { %1921 = vadd.xlane.f32.xlu2 %v1920_v54 }
0x1977   : > { %v1922_v30 = vpop.xlane.xlu2 %1921 }
0x1978   : > { %v1923_v58 = vmul.f32 %v1922_v30, %v4632_v8 }
0x197a   : > { %v1924_v59 = vadd.f32 1e-12, %v1923_v58 }
0x197c   : > { %4381 = vrsqrt.f32 %v1924_v59  ;;  %vm1931_vm15 = vweird.f32 %v1924_v59 }
0x1982   : > { %v4382_v32 = vpop.eup %4381 }
0x1983   : > { %v1926_v60 = vmul.f32 %v4382_v32, %v1924_v59  ;;  %vm1932_vm14 = vweird.f32 %v4382_v32 }
0x1984   : > { %vm1933_vm1 = vmor %vm1931_vm15, %vm1932_vm14 }
0x1985   : > { %v1927_v61 = vmul.f32 %v4382_v32, %v1926_v60 }
0x1987   : > { %v1928_v62 = vmul.f32 0.5, %v1927_v61 }
0x1989   : > { %v1929_v63 = vsub.f32 1.5, %v1928_v62 }
0x198b   : > { %v1930_v0 = vmul.f32 %v4382_v32, %v1929_v63 }
0x198d   : > { %v1934_v2 = vsel %vm1933_vm1, %v4382_v32, %v1930_v0  ;;  %v4290_v32 = vld [vmem:[%s5671_s4 + $0x15] ss:$0 sm:$0xff] }
0x198e   : > { %v1935_v3 = vmul.f32 %v1934_v2, %v1918_v52 }
0x1990   : > { %v1939_v5 = vmul.f32 %v4287_v1, %v1935_v3 }
0x1992   : > { %v5077_v6 = vadd.f32 %v4288_v4, %v1939_v5  ;;  %v4070_v5 = vld [vmem:[%s5669_s2 + $0x168] sm:$0xff] }
0x1993   : > { %2120 = vmatpush.msrb.mxu0 %v4070_v5 }
0x1994   : > { %4064 = vmatmul.msk.f32.vlgmr.msrb.gmra.mxu1 %vm291_vm0, %v5077_v6 }
0x1a11   : > { %v1967_v9 = vpop.f32.mrf.mxu1 }
0x1a12   : > { %v1968_v10 = vadd.f32 %v4289_v7, %v1967_v9  ;;  %v4068_v7 = vld [vmem:[%s5669_s2 + $0x138] sm:$0xff]  ;;  %v4067_v9 = vld [vmem:[%s5669_s2 + $0x120] sm:$0xff] }
0x1a14   : > { %v1971_v11 = vmul.f32 0.70710677, %v1968_v10  ;;  %v1970_v30 = vmul.f32 0.5, %v1968_v10 }
0x1a16   : > { %v1972_v12 = vmul.f32 %v1971_v11, %v1971_v11 }
0x1a18   : > { %v1973_v13 = vmin.f32 %v1972_v12, 16.0 }
0x1a1a   : > { %v1974_v15 = vmul.f32 2.1237322e-06, %v1973_v13  ;;  %v1985_v16 = vmul.f32 3.8918573e-05, %v1973_v13 }
0x1a1c   : > { %v1975_v18 = vadd.f32 0.00028619796, %v1974_v15  ;;  %v1986_v19 = vadd.f32 0.001143296, %v1985_v16 }
0x1a1e   : > { %v1976_v21 = vmul.f32 %v1975_v18, %v1973_v13  ;;  %v1987_v22 = vmul.f32 %v1986_v19, %v1973_v13  ;;  %v4291_v19 = vld [vmem:[%s5671_s4 + $0x16] ss:$0 sm:$0xff] }
0x1a20   : > { %v1988_v23 = vadd.f32 0.014752088, %v1987_v22  ;;  %v1977_v26 = vadd.f32 0.0036580483, %v1976_v21  ;;  %v4292_v22 = vld [vmem:[%s5671_s4 + $0x17] ss:$0 sm:$0xff] }
0x1a22   : > { %v1989_v27 = vmul.f32 %v1988_v23, %v1973_v13  ;;  %v1978_v35 = vmul.f32 %v1977_v26, %v1973_v13 }
0x1a24   : > { %v1990_v31 = vadd.f32 0.112945676, %v1989_v27  ;;  %v1979_v39 = vadd.f32 0.05243302, %v1978_v35 }
0x1a26   : > { %v1991_v28 = vmul.f32 %v1990_v31, %v1973_v13  ;;  %v1980_v42 = vmul.f32 %v1979_v39, %v1973_v13 }
0x1a28   : > { %v1992_v37 = vadd.f32 0.4994258, %v1991_v28  ;;  %v1981_v43 = vadd.f32 0.18741608, %v1980_v42 }
0x1a2a   : > { %v1993_v34 = vmul.f32 %v1992_v37, %v1973_v13  ;;  %v1982_v45 = vmul.f32 %v1981_v43, %v1973_v13 }
0x1a2c   : > { %v1994_v41 = vadd.f32 1.0, %v1993_v34  ;;  %v1983_v49 = vadd.f32 1.1283791, %v1982_v45 }
0x1a2e   : > { %4383 = vrcp.f32 %v1994_v41  ;;  %v2006_v48 = vand.u32 2147483648, %v1994_v41  ;;  %v2004_v51 = vand.u32 2147483647, %v1994_v41  ;;  %vm2000_vm3 = vweird.f32 %v1994_v41 }
0x1a2f   : > { %v1984_v54 = vmul.f32 %v1983_v49, %v1971_v11 }
0x1a30   : > { %v2007_v53 = vor.u32 1.1754944e-38, %v2006_v48  ;;  %vm2005_vm6 = vcmp.eq.f32.partialorder %v2004_v51, 8.507059e+37 }
0x1a34   : > { %v4384_v44 = vpop.eup %4383 }
0x1a35   : > { %v1996_v46 = vmul.f32 %v4384_v44, %v1994_v41  ;;  %vm2001_vm2 = vweird.f32 %v4384_v44 }
0x1a36   : > { %vm2002_vm4 = vmor %vm2000_vm3, %vm2001_vm2 }
0x1a37   : > { %v1997_v47 = vsub.f32 1.0, %v1996_v46 }
0x1a39   : > { %v1998_v50 = vmul.f32 %v4384_v44, %v1997_v47 }
0x1a3b   : > { %v1999_v52 = vadd.f32 %v4384_v44, %v1998_v50 }
0x1a3d   : > { %v2003_v55 = vsel %vm2002_vm4, %v4384_v44, %v1999_v52 }
0x1a3e   : > { %v2008_v25 = vsel %vm2005_vm6, %v2007_v53, %v2003_v55 }
0x1a3f   : > { %v2009_v56 = vmul.f32 %v2008_v25, %v1984_v54 }
0x1a41   : > { %v4065_v57 = vclamps-f32 %v2009_v56, 1.0 }
0x1a43   : > { %v2012_v58 = vadd.f32 1.0, %v4065_v57 }
0x1a45   : > { %v2013_v59 = vmul.f32 %v2012_v58, %v1970_v30 }
0x1a47   : > { %4066 = vmatmul.msk.f32.vlgmr.msrb.gmra.mxu3 %vm856_vm13, %v2013_v59 }
0x1aca   : > { %v2037_v60 = vpop.f32.mrf.mxu3 }
0x1acb   : > { %v2038_v61 = vadd.f32 %v4290_v32, %v2037_v60 }
0x1acd   : > { %v2040_v62 = vadd.f32 %v2038_v61, %v5077_v6  ;;  %v4069_v6 = vld [vmem:[%s5669_s2 + $0x150] sm:$0xff] }
0x1ace   : > { %2121 = vmatpush.msrb.mxu0 %v4069_v6 }
0x1acf   : > { %v2041_v63 = vsel %vm291_vm0, %v2040_v62, 0.0 }
0x1ad0   : > { %2042 = vadd.xlane.f32.xlu1 %v2041_v63  ;;  %2122 = vmatpush.msrb.mxu0 %v4068_v7 }
0x1ad2   : > { %2123 = vmatpush.msrb.mxu0 %v4067_v9 }
0x1b43   : > { %v2043_v0 = vpop.xlane.xlu1 %2042 }
0x1b44   : > { %v2044_v1 = vmul.f32 %v2043_v0, %v4632_v8 }
0x1b46   : > { %v2045_v2 = vsub.f32 %v2040_v62, %v2044_v1 }
0x1b48   : > { %v2046_v3 = vmul.f32 %v2045_v2, %v2045_v2 }
0x1b4a   : > { %v2047_v4 = vsel %vm291_vm0, %v2046_v3, 0.0 }
0x1b4b   : > { %2048 = vadd.xlane.f32.xlu0 %v2047_v4 }
0x1bbe   : > { %v2049_v10 = vpop.xlane.xlu0 %2048 }
0x1bbf   : > { %v2050_v11 = vmul.f32 %v2049_v10, %v4632_v8 }
0x1bc1   : > { %v2051_v12 = vadd.f32 1e-12, %v2050_v11 }
0x1bc3   : > { %4385 = vrsqrt.f32 %v2051_v12  ;;  %vm2058_vm8 = vweird.f32 %v2051_v12 }
0x1bc9   : > { %v4386_v13 = vpop.eup %4385 }
0x1bca   : > { %v2053_v14 = vmul.f32 %v4386_v13, %v2051_v12  ;;  %vm2059_vm7 = vweird.f32 %v4386_v13 }
0x1bcb   : > { %vm2060_vm9 = vmor %vm2058_vm8, %vm2059_vm7 }
0x1bcc   : > { %v2054_v15 = vmul.f32 %v4386_v13, %v2053_v14 }
0x1bce   : > { %v2055_v16 = vmul.f32 0.5, %v2054_v15 }
0x1bd0   : > { %v2056_v17 = vsub.f32 1.5, %v2055_v16 }
0x1bd2   : > { %v2057_v18 = vmul.f32 %v4386_v13, %v2056_v17 }
0x1bd4   : > { %v2061_v20 = vsel %vm2060_vm9, %v4386_v13, %v2057_v18 }
0x1bd5   : > { %v2062_v21 = vmul.f32 %v2061_v20, %v2045_v2 }
0x1bd7   : > { %v2066_v40 = vmul.f32 %v4291_v19, %v2062_v21 }
0x1bd9   : > { %v5135_v23 = vadd.f32 %v4292_v22, %v2066_v40  ;;  %v4072_v40 = vld [vmem:[%s5669_s2 + $0x140] sm:$0xff] }
0x1bdb   : > { %4095 = vmatmul.msk.f32.vlgmr.msrb.gmra.mxu0 %vm291_vm0, %v5135_v23 }
0x1c58   : > { %v2125_v26 = vpop.f32.mrf.mxu0 }
0x1c59   : > { %v5142_v27 = vadd.f32 %v4293_v24, %v2125_v26  ;;  %v4073_v24 = vld [vmem:[%s5669_s2 + $0x158] sm:$0xff] }
0x1c5b   : > { %2129 = vrot.lane.b32.xlu2 %v5142_v27, %s5717_s18 }
0x1c63   : > { %2194 = vrot.lane.b32.xlu2 %v5142_v27, %s5718_s8 }
0x1c6b   : > { %2400 = vrot.lane.b32.xlu2 %v5142_v27, %s5711_s19 }
0x1c73   : > { %2309 = vrot.lane.b32.xlu2 %v5142_v27, %s5713_s29 }
0x1cb5   : > { %v2130_v31 = vpop.permute.xlu2 %2129 }
0x1cb6   : > { %4096 = vmatpush.xpose.msk.msra.mxu2 %vm386_vm5, %v2130_v31 }
0x1cb9   : > { %4097 = vmatmul.msk.f32.vlgmr.msra.gmra.mxu2 %vm386_vm5, %v5142_v27 }
0x1cbd   : > { %v2195_v33 = vpop.permute.xlu2 %2194 }
0x1cc5   : > { %v2401_v35 = vpop.permute.xlu2 %2400 }
0x1cc6   : > { %4108 = vmatpush.xpose.msk.msrb.mxu3 %vm386_vm5, %v2401_v35 }
0x1ccd   : > { %v2310_v50 = vpop.permute.xlu2 %2309 }
0x1d3c   : > { %v2152_v36 = vpop.f32.mrf.mxu2 }
0x1d3d   : > { %v2155_v28 = vmul.f32 0.35355338, %v2152_v36  ;;  %v4074_v36 = vld [vmem:[%s5669_s2 + $0x170] sm:$0xff] }
0x1d3f   : > { %v2156_v37 = vadd.f32 %v4998_v38, %v2155_v28 }
0x1d41   : > { %v2157_v39 = vsel %vm386_vm5, %v2156_v37, -inf }
0x1d42   : > { %2158 = vmax.xlane.f32.xlu0 %v2157_v39 }
0x1d56   : > { %2168 = vrot.lane.b32.xlu0 %v5142_v27, %s5719_s0 }
0x1d5e   : > { %2398 = vrot.lane.b32.xlu0 %v5142_v27, %s5712_s21 }
0x1d66   : > { %2307 = vrot.lane.b32.xlu0 %v5142_v27, %s5721_s22 }
0x1db5   : > { %v2159_v34 = vpop.xlane.xlu0 %2158 }
0x1db6   : > { %v2160_v41 = vsub.f32 %v2156_v37, %v2159_v34 }
0x1db8   : > { %v2161_v42 = vmul.f32 1.442695, %v2160_v41 }
0x1dba   : > { %4387 = vpow2.f32 %v2161_v42 }
0x1dc0   : > { %v4388_v43 = vpop.eup %4387 }
0x1dc1   : > { %v2163_v44 = vsel %vm386_vm5, %v4388_v43, 0.0 }
0x1dc2   : > { %2164 = vadd.xlane.f32.xlu1 %v2163_v44  ;;  %v4294_v44 = vld [vmem:[%s5671_s4 + $0x19] ss:$0 sm:$0xff] }
0x1dc8   : > { %v2169_v45 = vpop.permute.xlu0 %2168 }
0x1dc9   : > { %2189 = vmatpush.msra.mxu1 %v2169_v45 }
0x1dcb   : > { %2279 = vmatpush.msrb.mxu1 %v4072_v40 }
0x1dd0   : > { %v2399_v51 = vpop.permute.xlu0 %2398 }
0x1dd8   : > { %v2308_v52 = vpop.permute.xlu0 %2307 }
0x1ddb   : > { %2196 = vrot.lane.b32.xlu1 %v5142_v27, %s5720_s23 }
0x1e35   : > { %v2165_v46 = vpop.xlane.xlu1 %2164 }
0x1e36   : > { %4389 = vrcp.f32 %v2165_v46 }
0x1e3c   : > { %v4390_v47 = vpop.eup %4389 }
0x1e3d   : > { %v2167_v48 = vmul.f32 %v4390_v47, %v4388_v43 }
0x1e3f   : > { %4098 = vmatmul.msk.f32.vlgmr.msra.gmra.mxu1 %vm386_vm5, %v2167_v48 }
0x1e40   : > { %2392 = vmatpush.msra.mxu1 %v4073_v24  ;;  %v4081_v24 = vld [vmem:[%s5670_s3 + $0xd0] sm:$0xff] }
0x1e4d   : > { %v2197_v49 = vpop.permute.xlu1 %2196 }
0x1e4e   : > { %4099 = vmatpush.xpose.msk.msra.mxu0 %vm386_vm5, %v2197_v49 }
0x1e51   : > { %4100 = vmatmul.msk.f32.vlgmr.msra.gmra.mxu0 %vm386_vm5, %v2195_v33 }
0x1e52   : > { %4104 = vmatpush.xpose.msk.msrb.mxu0 %vm386_vm5, %v2310_v50 }
0x1e59   : > { %4105 = vmatmul.msk.f32.vlgmr.msrb.gmra.mxu0 %vm386_vm5, %v2308_v52 }
0x1ebc   : > { %v2191_v53 = vpop.f32.mrf.mxu1 }
0x1ebd   : > { %4103 = vmatmul.msk.f32.vlgmr.msra.gmra.mxu3 %vm386_vm5, %v2191_v53  ;;  %v4078_v53 = vld [vmem:[%s5669_s2 + $0x178] sm:$0xff] }
0x1ec5   : > { %4109 = vmatmul.msk.f32.vlgmr.msrb.gmra.mxu3 %vm386_vm5, %v2399_v51 }
0x1ece   : > { %v2219_v54 = vpop.f32.mrf.mxu0 }
0x1ecf   : > { %v2222_v55 = vmul.f32 0.35355338, %v2219_v54  ;;  %v4076_v54 = vld [vmem:[%s5669_s2 + $0x148] sm:$0xff] }
0x1ed1   : > { %v2223_v25 = vadd.f32 %v4998_v38, %v2222_v55  ;;  %v4075_v55 = vld [vmem:[%s5669_s2 + $0x130] sm:$0xff] }
0x1ed3   : > { %v2224_v56 = vsel %vm386_vm5, %v2223_v25, -inf }
0x1ed4   : > { %2225 = vmax.xlane.f32.xlu1 %v2224_v56 }
0x1ed6   : > { %v2332_v57 = vpop.f32.mrf.mxu0 }
0x1ed7   : > { %v2335_v30 = vmul.f32 0.35355338, %v2332_v57 }
0x1ed9   : > { %v2336_v58 = vadd.f32 %v4998_v38, %v2335_v30 }
0x1edb   : > { %v2337_v59 = vsel %vm386_vm5, %v2336_v58, -inf }
0x1edc   : > { %2338 = vmax.xlane.f32.xlu2 %v2337_v59 }
0x1f40   : > { %v5181_v32 = vpop.f32.mrf.mxu3 }
0x1f47   : > { %v2226_v60 = vpop.xlane.xlu1 %2225 }
0x1f48   : > { %v2227_v61 = vsub.f32 %v2223_v25, %v2226_v60  ;;  %v2423_v62 = vpop.f32.mrf.mxu3 }
0x1f49   : > { %v2426_v63 = vmul.f32 0.35355338, %v2423_v62  ;;  %v4295_v62 = vld [vmem:[%s5671_s4 + $0x1a] ss:$0 sm:$0xff] }
0x1f4a   : > { %v2228_v0 = vmul.f32 1.442695, %v2227_v61 }
0x1f4b   : > { %v2427_v1 = vadd.f32 %v4998_v38, %v2426_v63 }
0x1f4c   : > { %4391 = vpow2.f32 %v2228_v0 }
0x1f4d   : > { %v2428_v2 = vsel %vm386_vm5, %v2427_v1, -inf }
0x1f4e   : > { %2429 = vmax.xlane.f32.xlu0 %v2428_v2 }
0x1f4f   : > { %v2339_v3 = vpop.xlane.xlu2 %2338 }
0x1f50   : > { %v2340_v4 = vsub.f32 %v2336_v58, %v2339_v3 }
0x1f52   : > { %v4392_v5 = vpop.eup %4391  ;;  %v2341_v6 = vmul.f32 1.442695, %v2340_v4  ;;  %v4297_v4 = vld [vmem:[%s5671_s4 + $0x1c] ss:$0 sm:$0xff] }
0x1f53   : > { %v2230_v7 = vsel %vm386_vm5, %v4392_v5, 0.0 }
0x1f54   : > { %4393 = vpow2.f32 %v2341_v6  ;;  %2231 = vadd.xlane.f32.xlu1 %v2230_v7 }
0x1f5a   : > { %v4394_v9 = vpop.eup %4393 }
0x1f5b   : > { %v2343_v10 = vsel %vm386_vm5, %v4394_v9, 0.0 }
0x1f5c   : > { %2344 = vadd.xlane.f32.xlu2 %v2343_v10 }
0x1f62   : > { %2235 = vrot.lane.b32.xlu0 %v5142_v27, %s5714_s14 }
0x1f74   : > { %2348 = vrot.lane.b32.xlu2 %v5142_v27, %s5715_s16 }
0x1fc1   : > { %v2430_v38 = vpop.xlane.xlu0 %2429 }
0x1fc2   : > { %v2431_v11 = vsub.f32 %v2427_v1, %v2430_v38  ;;  %v4296_v1 = vld [vmem:[%s5671_s4 + $0x1b] ss:$0 sm:$0xff] }
0x1fc3   : > { %v4086_v38 = vld [vmem:[%s5670_s3 + $0xf8] sm:$0xff] }
0x1fc4   : > { %v2432_v12 = vmul.f32 1.442695, %v2431_v11  ;;  %2608 = vmatpush.msra.mxu3 %v4086_v38 }
0x1fc6   : > { %4395 = vpow2.f32 %v2432_v12 }
0x1fc7   : > { %v2232_v13 = vpop.xlane.xlu1 %2231 }
0x1fc8   : > { %4397 = vrcp.f32 %v2232_v13  ;;  %v4085_v13 = vld [vmem:[%s5670_s3 + $0xf0] sm:$0xff] }
0x1fc9   : > { %2609 = vmatpush.msra.mxu3 %v4085_v13 }
0x1fcc   : > { %v4396_v14 = vpop.eup %4395 }
0x1fcd   : > { %v2434_v15 = vsel %vm386_vm5, %v4396_v14, 0.0 }
0x1fce   : > { %2435 = vadd.xlane.f32.xlu1 %v2434_v15  ;;  %v4398_v17 = vpop.eup %4397 }
0x1fcf   : > { %v2345_v16 = vpop.xlane.xlu2 %2344  ;;  %v2234_v18 = vmul.f32 %v4398_v17, %v4392_v5 }
0x1fd0   : > { %4399 = vrcp.f32 %v2345_v16  ;;  %v4084_v16 = vld [vmem:[%s5670_s3 + $0xe8] sm:$0xff] }
0x1fd1   : > { %2610 = vmatpush.msra.mxu3 %v4084_v16 }
0x1fd4   : > { %v2236_v19 = vpop.permute.xlu0 %2235 }
0x1fd5   : > { %2256 = vmatpush.msrb.mxu2 %v2236_v19  ;;  %v4083_v19 = vld [vmem:[%s5670_s3 + $0xe0] sm:$0xff] }
0x1fd6   : > { %4101 = vmatmul.msk.f32.vlgmr.msrb.gmra.mxu2 %vm386_vm5, %v2234_v18  ;;  %v4400_v21 = vpop.eup %4399  ;;  %2611 = vmatpush.msra.mxu3 %v4083_v19 }
0x1fd7   : > { %v2349_v20 = vpop.permute.xlu2 %2348  ;;  %v2347_v22 = vmul.f32 %v4400_v21, %v4394_v9  ;;  %v4082_v21 = vld [vmem:[%s5670_s3 + $0xd8] sm:$0xff] }
0x1fd8   : > { %2369 = vmatpush.msra.mxu2 %v2349_v20  ;;  %2612 = vmatpush.msra.mxu3 %v4082_v21 }
0x1fda   : > { %2483 = vmatpush.msrb.mxu2 %v4074_v36  ;;  %2613 = vmatpush.msra.mxu3 %v4081_v24 }
0x1fde   : > { %4106 = vmatmul.msk.f32.vlgmr.msra.gmra.mxu2 %vm386_vm5, %v2347_v22 }
0x1fe7   : > { %2439 = vrot.lane.b32.xlu1 %v5142_v27, %s5716_s20 }
0x2041   : > { %v2436_v26 = vpop.xlane.xlu1 %2435 }
0x2042   : > { %4401 = vrcp.f32 %v2436_v26 }
0x2048   : > { %v4402_v29 = vpop.eup %4401 }
0x2049   : > { %v2438_v31 = vmul.f32 %v4402_v29, %v4396_v14  ;;  %v4080_v29 = vld [vmem:[%s5670_s3 + $0xc8] sm:$0xff] }
0x204a   : > { %2614 = vmatpush.msra.mxu3 %v4080_v29  ;;  %v5313_v29 = vld [vmem:[%s4626_s17] ss:$0 sm:$0xff] }
0x2059   : > { %v2440_v33 = vpop.permute.xlu1 %2439  ;;  %v2258_v35 = vpop.f32.mrf.mxu2 }
0x205a   : > { %4102 = vmatmul.msk.f32.vlgmr.msrb.gmra.mxu1 %vm386_vm5, %v2258_v35  ;;  %2460 = vmatpush.msra.mxu0 %v2440_v33  ;;  %v4079_v33 = vld [vmem:[%s5670_s3 + $0xc0] sm:$0xff] }
0x205b   : > { %4110 = vmatmul.msk.f32.vlgmr.msra.gmra.mxu0 %vm386_vm5, %v2438_v31  ;;  %2542 = vmatpush.msrb.mxu1 %v4078_v53 }
0x205c   : > { %2615 = vmatpush.msra.mxu3 %v4079_v33 }
0x2061   : > { %v2371_v27 = vpop.f32.mrf.mxu2 }
0x2062   : > { %4107 = vmatmul.msk.f32.vlgmr.msra.gmra.mxu1 %vm386_vm5, %v2371_v27 }
0x20d7   : > { %v2281_v37 = vpop.f32.mrf.mxu1 }
0x20d8   : > { %v2462_v28 = vpop.f32.mrf.mxu0  ;;  %v2305_v34 = vadd.f32 %v5181_v32, %v2281_v37 }
0x20d9   : > { %4111 = vmatmul.msk.f32.vlgmr.msrb.gmra.mxu2 %vm386_vm5, %v2462_v28 }
0x20df   : > { %v2394_v39 = vpop.f32.mrf.mxu1 }
0x20e0   : > { %v2397_v41 = vadd.f32 %v2394_v39, %v2305_v34 }
0x215c   : > { %v2485_v42 = vpop.f32.mrf.mxu2 }
0x215d   : > { %v2488_v43 = vadd.f32 %v2485_v42, %v2397_v41 }
0x215f   : > { %v2489_v45 = vadd.f32 %v2488_v43, %v5135_v23  ;;  %v4077_v23 = vld [vmem:[%s5669_s2 + $0x160] sm:$0xff] }
0x2160   : > { %2543 = vmatpush.msrb.mxu1 %v4077_v23 }
0x2161   : > { %v2493_v46 = vadd.f32 %v4294_v44, %v2489_v45 }
0x2162   : > { %2544 = vmatpush.msrb.mxu1 %v4076_v54 }
0x2163   : > { %v2494_v47 = vsel %vm291_vm0, %v2493_v46, 0.0 }
0x2164   : > { %2495 = vadd.xlane.f32.xlu0 %v2494_v47  ;;  %2545 = vmatpush.msrb.mxu1 %v4075_v55 }
0x21d7   : > { %v2496_v48 = vpop.xlane.xlu0 %2495 }
0x21d8   : > { %v2497_v49 = vmul.f32 %v2496_v48, %v4632_v8 }
0x21da   : > { %v2498_v50 = vsub.f32 %v2493_v46, %v2497_v49 }
0x21dc   : > { %v2499_v51 = vmul.f32 %v2498_v50, %v2498_v50 }
0x21de   : > { %v2500_v52 = vsel %vm291_vm0, %v2499_v51, 0.0 }
0x21df   : > { %2501 = vadd.xlane.f32.xlu2 %v2500_v52 }
0x2252   : > { %v2502_v25 = vpop.xlane.xlu2 %2501 }
0x2253   : > { %v2503_v56 = vmul.f32 %v2502_v25, %v4632_v8 }
0x2255   : > { %v2504_v57 = vadd.f32 1e-12, %v2503_v56 }
0x2257   : > { %4403 = vrsqrt.f32 %v2504_v57  ;;  %vm2511_vm11 = vweird.f32 %v2504_v57 }
0x225d   : > { %v4404_v30 = vpop.eup %4403 }
0x225e   : > { %v2506_v58 = vmul.f32 %v4404_v30, %v2504_v57  ;;  %vm2512_vm10 = vweird.f32 %v4404_v30  ;;  %v4298_v57 = vld [vmem:[%s5671_s4 + $0x1d] ss:$0 sm:$0xff] }
0x225f   : > { %vm2513_vm12 = vmor %vm2511_vm11, %vm2512_vm10 }
0x2260   : > { %v2507_v59 = vmul.f32 %v4404_v30, %v2506_v58 }
0x2262   : > { %v2508_v32 = vmul.f32 0.5, %v2507_v59 }
0x2264   : > { %v2509_v60 = vsub.f32 1.5, %v2508_v32 }
0x2266   : > { %v2510_v61 = vmul.f32 %v4404_v30, %v2509_v60 }
0x2268   : > { %v2514_v63 = vsel %vm2513_vm12, %v4404_v30, %v2510_v61 }
0x2269   : > { %v2515_v0 = vmul.f32 %v2514_v63, %v2498_v50 }
0x226b   : > { %v2519_v2 = vmul.f32 %v4295_v62, %v2515_v0 }
0x226d   : > { %v5236_v3 = vadd.f32 %v4296_v1, %v2519_v2  ;;  %v4118_v1 = vld [vmem:[%s5669_s2 + $0x1c8] sm:$0xff]  ;;  %v4117_v2 = vld [vmem:[%s5669_s2 + $0x1b0] sm:$0xff] }
0x226e   : > { %2700 = vmatpush.msrb.mxu0 %v4118_v1 }
0x226f   : > { %4112 = vmatmul.msk.f32.vlgmr.msrb.gmra.mxu1 %vm291_vm0, %v5236_v3 }
0x2270   : > { %2701 = vmatpush.msrb.mxu0 %v4117_v2 }
0x22ec   : > { %v2547_v5 = vpop.f32.mrf.mxu1 }
0x22ed   : > { %v2548_v6 = vadd.f32 %v4297_v4, %v2547_v5  ;;  %v4115_v4 = vld [vmem:[%s5669_s2 + $0x180] sm:$0xff] }
0x22ef   : > { %v2551_v7 = vmul.f32 0.70710677, %v2548_v6  ;;  %v2550_v55 = vmul.f32 0.5, %v2548_v6 }
0x22f1   : > { %v2552_v9 = vmul.f32 %v2551_v7, %v2551_v7 }
0x22f3   : > { %v2553_v10 = vmin.f32 %v2552_v9, 16.0 }
0x22f5   : > { %v2554_v11 = vmul.f32 2.1237322e-06, %v2553_v10  ;;  %v2565_v12 = vmul.f32 3.8918573e-05, %v2553_v10 }
0x22f7   : > { %v2555_v14 = vadd.f32 0.00028619796, %v2554_v11  ;;  %v2566_v15 = vadd.f32 0.001143296, %v2565_v12 }
0x22f9   : > { %v2556_v17 = vmul.f32 %v2555_v14, %v2553_v10  ;;  %v2567_v18 = vmul.f32 %v2566_v15, %v2553_v10  ;;  %v4299_v14 = vld [vmem:[%s5671_s4 + $0x1e] ss:$0 sm:$0xff] }
0x22fb   : > { %v2568_v20 = vadd.f32 0.014752088, %v2567_v18  ;;  %v2557_v22 = vadd.f32 0.0036580483, %v2556_v17  ;;  %v4300_v17 = vld [vmem:[%s5671_s4 + $0x1f] ss:$0 sm:$0xff] }
0x22fd   : > { %v2569_v40 = vmul.f32 %v2568_v20, %v2553_v10  ;;  %v2558_v31 = vmul.f32 %v2557_v22, %v2553_v10  ;;  %v4301_v20 = vld [vmem:[%s5671_s4 + $0x20] ss:$0 sm:$0xff] }
0x22ff   : > { %v2570_v26 = vadd.f32 0.112945676, %v2569_v40  ;;  %v2559_v36 = vadd.f32 0.05243302, %v2558_v31 }
0x2301   : > { %v2571_v35 = vmul.f32 %v2570_v26, %v2553_v10  ;;  %v2560_v39 = vmul.f32 %v2559_v36, %v2553_v10 }
0x2303   : > { %v2572_v27 = vadd.f32 0.4994258, %v2571_v35  ;;  %v2561_v34 = vadd.f32 0.18741608, %v2560_v39  ;;  %v4119_v35 = vld [vmem:[%s5669_s2 + $0x188] sm:$0xff] }
0x2304   : > { %2882 = vmatpush.msrb.mxu3 %v4119_v35  ;;  %v4122_v35 = vld [vmem:[%s5669_s2 + $0x1d0] sm:$0xff] }
0x2305   : > { %v2573_v28 = vmul.f32 %v2572_v27, %v2553_v10  ;;  %v2562_v42 = vmul.f32 %v2561_v34, %v2553_v10 }
0x2307   : > { %v2574_v37 = vadd.f32 1.0, %v2573_v28  ;;  %v2563_v46 = vadd.f32 1.1283791, %v2562_v42 }
0x2309   : > { %4405 = vrcp.f32 %v2574_v37  ;;  %v2586_v45 = vand.u32 2147483648, %v2574_v37  ;;  %v2584_v48 = vand.u32 2147483647, %v2574_v37  ;;  %vm2580_vm15 = vweird.f32 %v2574_v37 }
0x230a   : > { %v2564_v51 = vmul.f32 %v2563_v46, %v2551_v7 }
0x230b   : > { %v2587_v50 = vor.u32 1.1754944e-38, %v2586_v45  ;;  %vm2585_vm2 = vcmp.eq.f32.partialorder %v2584_v48, 8.507059e+37 }
0x230f   : > { %v4406_v41 = vpop.eup %4405 }
0x2310   : > { %v2576_v43 = vmul.f32 %v4406_v41, %v2574_v37  ;;  %vm2581_vm14 = vweird.f32 %v4406_v41 }
0x2311   : > { %vm2582_vm1 = vmor %vm2580_vm15, %vm2581_vm14 }
0x2312   : > { %v2577_v44 = vsub.f32 1.0, %v2576_v43 }
0x2314   : > { %v2578_v47 = vmul.f32 %v4406_v41, %v2577_v44 }
0x2316   : > { %v2579_v49 = vadd.f32 %v4406_v41, %v2578_v47 }
0x2318   : > { %v2583_v52 = vsel %vm2582_vm1, %v4406_v41, %v2579_v49 }
0x2319   : > { %v2588_v53 = vsel %vm2585_vm2, %v2587_v50, %v2583_v52 }
0x231a   : > { %v2589_v23 = vmul.f32 %v2588_v53, %v2564_v51 }
0x231c   : > { %v4113_v54 = vclamps-f32 %v2589_v23, 1.0 }
0x231e   : > { %v2592_v25 = vadd.f32 1.0, %v4113_v54 }
0x2320   : > { %v2593_v56 = vmul.f32 %v2592_v25, %v2550_v55 }
0x2322   : > { %4114 = vmatmul.msk.f32.vlgmr.msra.gmra.mxu3 %vm856_vm13, %v2593_v56 }
0x23a5   : > { %v2617_v30 = vpop.f32.mrf.mxu3 }
0x23a6   : > { %v2618_v58 = vadd.f32 %v4298_v57, %v2617_v30 }
0x23a8   : > { %v2620_v59 = vadd.f32 %v2618_v58, %v5236_v3  ;;  %v4116_v3 = vld [vmem:[%s5669_s2 + $0x198] sm:$0xff] }
0x23a9   : > { %2702 = vmatpush.msrb.mxu0 %v4116_v3 }
0x23aa   : > { %v2621_v32 = vsel %vm291_vm0, %v2620_v59, 0.0 }
0x23ab   : > { %2622 = vadd.xlane.f32.xlu1 %v2621_v32  ;;  %2703 = vmatpush.msrb.mxu0 %v4115_v4 }
0x241e   : > { %v2623_v60 = vpop.xlane.xlu1 %2622 }
0x241f   : > { %v2624_v61 = vmul.f32 %v2623_v60, %v4632_v8 }
0x2421   : > { %v2625_v62 = vsub.f32 %v2620_v59, %v2624_v61 }
0x2423   : > { %v2626_v63 = vmul.f32 %v2625_v62, %v2625_v62 }
0x2425   : > { %v2627_v0 = vsel %vm291_vm0, %v2626_v63, 0.0 }
0x2426   : > { %2628 = vadd.xlane.f32.xlu0 %v2627_v0 }
0x2499   : > { %v2629_v5 = vpop.xlane.xlu0 %2628 }
0x249a   : > { %v2630_v6 = vmul.f32 %v2629_v5, %v4632_v8 }
0x249c   : > { %v2631_v7 = vadd.f32 1e-12, %v2630_v6 }
0x249e   : > { %4407 = vrsqrt.f32 %v2631_v7  ;;  %vm2638_vm4 = vweird.f32 %v2631_v7 }
0x24a4   : > { %v4408_v9 = vpop.eup %4407 }
0x24a5   : > { %v2633_v10 = vmul.f32 %v4408_v9, %v2631_v7  ;;  %vm2639_vm3 = vweird.f32 %v4408_v9 }
0x24a6   : > { %vm2640_vm6 = vmor %vm2638_vm4, %vm2639_vm3 }
0x24a7   : > { %v2634_v38 = vmul.f32 %v4408_v9, %v2633_v10 }
0x24a9   : > { %v2635_v11 = vmul.f32 0.5, %v2634_v38 }
0x24ab   : > { %v2636_v12 = vsub.f32 1.5, %v2635_v11 }
0x24ad   : > { %v2637_v13 = vmul.f32 %v4408_v9, %v2636_v12 }
0x24af   : > { %v2641_v15 = vsel %vm2640_vm6, %v4408_v9, %v2637_v13 }
0x24b0   : > { %v2642_v16 = vmul.f32 %v2641_v15, %v2625_v62 }
0x24b2   : > { %v2646_v18 = vmul.f32 %v4299_v14, %v2642_v16 }
0x24b4   : > { %v5294_v19 = vadd.f32 %v4300_v17, %v2646_v18 }
0x24b6   : > { %4143 = vmatmul.msk.f32.vlgmr.msrb.gmra.mxu0 %vm291_vm0, %v5294_v19 }
0x2533   : > { %v2705_v21 = vpop.f32.mrf.mxu0 }
0x2534   : > { %v5301_v22 = vadd.f32 %v4301_v20, %v2705_v21  ;;  %v4120_v20 = vld [vmem:[%s5669_s2 + $0x1a0] sm:$0xff]  ;;  %v4121_v21 = vld [vmem:[%s5669_s2 + $0x1b8] sm:$0xff] }
0x2536   : > { %2709 = vrot.lane.b32.xlu2 %v5301_v22, %s5717_s18 }
0x253e   : > { %2774 = vrot.lane.b32.xlu2 %v5301_v22, %s5718_s8 }
0x2546   : > { %2978 = vrot.lane.b32.xlu2 %v5301_v22, %s5712_s21 }
0x2590   : > { %v2710_v40 = vpop.permute.xlu2 %2709 }
0x2591   : > { %4144 = vmatpush.xpose.msk.msra.mxu2 %vm386_vm5, %v2710_v40 }
0x2594   : > { %4145 = vmatmul.msk.f32.vlgmr.msra.gmra.mxu2 %vm386_vm5, %v5301_v22 }
0x2598   : > { %v2775_v47 = vpop.permute.xlu2 %2774 }
0x25a0   : > { %v2979_v50 = vpop.permute.xlu2 %2978 }
0x2617   : > { %v2732_v24 = vpop.f32.mrf.mxu2 }
0x2618   : > { %v2735_v26 = vmul.f32 0.35355338, %v2732_v24 }
0x261a   : > { %v2736_v31 = vadd.f32 %v5313_v29, %v2735_v26 }
0x261c   : > { %v2737_v33 = vsel %vm386_vm5, %v2736_v31, -inf }
0x261d   : > { %2738 = vmax.xlane.f32.xlu0 %v2737_v33 }
0x2631   : > { %2748 = vrot.lane.b32.xlu0 %v5301_v22, %s5719_s0 }
0x2639   : > { %2980 = vrot.lane.b32.xlu0 %v5301_v22, %s5711_s19 }
0x2641   : > { %2889 = vrot.lane.b32.xlu0 %v5301_v22, %s5713_s29 }
0x2690   : > { %v2739_v27 = vpop.xlane.xlu0 %2738 }
0x2691   : > { %v2740_v36 = vsub.f32 %v2736_v31, %v2739_v27 }
0x2693   : > { %v2741_v28 = vmul.f32 1.442695, %v2740_v36 }
0x2695   : > { %4409 = vpow2.f32 %v2741_v28 }
0x269b   : > { %v4410_v37 = vpop.eup %4409 }
0x269c   : > { %v2743_v39 = vsel %vm386_vm5, %v4410_v37, 0.0 }
0x269d   : > { %2744 = vadd.xlane.f32.xlu1 %v2743_v39 }
0x26a3   : > { %v2749_v34 = vpop.permute.xlu0 %2748 }
0x26a4   : > { %2769 = vmatpush.msra.mxu1 %v2749_v34 }
0x26a6   : > { %2859 = vmatpush.msrb.mxu1 %v4120_v20 }
0x26ab   : > { %v2981_v41 = vpop.permute.xlu0 %2980 }
0x26ac   : > { %4156 = vmatpush.xpose.msk.msra.mxu3 %vm386_vm5, %v2981_v41 }
0x26b3   : > { %v2890_v46 = vpop.permute.xlu0 %2889 }
0x26b6   : > { %2776 = vrot.lane.b32.xlu1 %v5301_v22, %s5720_s23 }
0x26be   : > { %2887 = vrot.lane.b32.xlu1 %v5301_v22, %s5721_s22 }
0x2710   : > { %v2745_v42 = vpop.xlane.xlu1 %2744 }
0x2711   : > { %4411 = vrcp.f32 %v2745_v42  ;;  %v4302_v42 = vld [vmem:[%s5671_s4 + $0x21] ss:$0 sm:$0xff] }
0x2717   : > { %v4412_v43 = vpop.eup %4411 }
0x2718   : > { %v2747_v44 = vmul.f32 %v4412_v43, %v4410_v37 }
0x271a   : > { %4146 = vmatmul.msk.f32.vlgmr.msra.gmra.mxu1 %vm386_vm5, %v2747_v44 }
0x271b   : > { %2972 = vmatpush.msra.mxu1 %v4121_v21 }
0x2728   : > { %v2777_v45 = vpop.permute.xlu1 %2776 }
0x2729   : > { %4147 = vmatpush.xpose.msk.msra.mxu0 %vm386_vm5, %v2777_v45 }
0x272c   : > { %4148 = vmatmul.msk.f32.vlgmr.msra.gmra.mxu0 %vm386_vm5, %v2775_v47 }
0x272d   : > { %4152 = vmatpush.xpose.msk.msrb.mxu0 %vm386_vm5, %v2890_v46 }
0x2730   : > { %v2888_v48 = vpop.permute.xlu1 %2887 }
0x2734   : > { %4153 = vmatmul.msk.f32.vlgmr.msrb.gmra.mxu0 %vm386_vm5, %v2888_v48 }
0x2797   : > { %v2771_v49 = vpop.f32.mrf.mxu1 }
0x2798   : > { %4151 = vmatmul.msk.f32.vlgmr.msrb.gmra.mxu3 %vm386_vm5, %v2771_v49 }
0x27a0   : > { %4157 = vmatmul.msk.f32.vlgmr.msra.gmra.mxu3 %vm386_vm5, %v2979_v50 }
0x27a9   : > { %v2799_v51 = vpop.f32.mrf.mxu0 }
0x27aa   : > { %v2802_v52 = vmul.f32 0.35355338, %v2799_v51  ;;  %v4126_v51 = vld [vmem:[%s5669_s2 + $0x1d8] sm:$0xff] }
0x27ac   : > { %v2803_v53 = vadd.f32 %v5313_v29, %v2802_v52  ;;  %v4124_v52 = vld [vmem:[%s5669_s2 + $0x1a8] sm:$0xff] }
0x27ae   : > { %v2804_v23 = vsel %vm386_vm5, %v2803_v53, -inf }
0x27af   : > { %2805 = vmax.xlane.f32.xlu2 %v2804_v23 }
0x27b1   : > { %v2912_v54 = vpop.f32.mrf.mxu0 }
0x27b2   : > { %v2915_v55 = vmul.f32 0.35355338, %v2912_v54 }
0x27b4   : > { %v2916_v25 = vadd.f32 %v5313_v29, %v2915_v55 }
0x27b6   : > { %v2917_v56 = vsel %vm386_vm5, %v2916_v25, -inf }
0x27b7   : > { %2918 = vmax.xlane.f32.xlu0 %v2917_v56 }
0x281b   : > { %v5343_v57 = vpop.f32.mrf.mxu3 }
0x2822   : > { %v2806_v30 = vpop.xlane.xlu2 %2805 }
0x2823   : > { %v2807_v58 = vsub.f32 %v2803_v53, %v2806_v30  ;;  %v3003_v59 = vpop.f32.mrf.mxu3  ;;  %v4123_v53 = vld [vmem:[%s5669_s2 + $0x190] sm:$0xff] }
0x2824   : > { %v3006_v32 = vmul.f32 0.35355338, %v3003_v59 }
0x2825   : > { %v2808_v60 = vmul.f32 1.442695, %v2807_v58 }
0x2826   : > { %v3007_v61 = vadd.f32 %v5313_v29, %v3006_v32  ;;  %v4303_v32 = vld [vmem:[%s5671_s4 + $0x22] ss:$0 sm:$0xff] }
0x2827   : > { %4413 = vpow2.f32 %v2808_v60 }
0x2828   : > { %v3008_v62 = vsel %vm386_vm5, %v3007_v61, -inf }
0x2829   : > { %3009 = vmax.xlane.f32.xlu1 %v3008_v62  ;;  %v4304_v62 = vld [vmem:[%s5671_s4 + $0x23] ss:$0 sm:$0xff] }
0x282a   : > { %v2919_v63 = vpop.xlane.xlu0 %2918 }
0x282b   : > { %v2920_v0 = vsub.f32 %v2916_v25, %v2919_v63 }
0x282d   : > { %v4414_v1 = vpop.eup %4413  ;;  %v2921_v2 = vmul.f32 1.442695, %v2920_v0 }
0x282e   : > { %v2810_v3 = vsel %vm386_vm5, %v4414_v1, 0.0 }
0x282f   : > { %4415 = vpow2.f32 %v2921_v2  ;;  %2811 = vadd.xlane.f32.xlu2 %v2810_v3 }
0x2835   : > { %v4416_v4 = vpop.eup %4415 }
0x2836   : > { %v2923_v5 = vsel %vm386_vm5, %v4416_v4, 0.0 }
0x2837   : > { %2924 = vadd.xlane.f32.xlu0 %v2923_v5 }
0x2847   : > { %2815 = vrot.lane.b32.xlu2 %v5301_v22, %s5714_s14 }
0x284b   : > { %2928 = vrot.lane.b32.xlu0 %v5301_v22, %s5715_s16 }
0x289c   : > { %v3010_v6 = vpop.xlane.xlu1 %3009 }
0x289d   : > { %v3011_v7 = vsub.f32 %v3007_v61, %v3010_v6 }
0x289f   : > { %v3012_v9 = vmul.f32 1.442695, %v3011_v7  ;;  %v4134_v7 = vld [vmem:[%s5670_s3 + $0x138] sm:$0xff] }
0x28a0   : > { %3188 = vmatpush.msrb.mxu3 %v4134_v7 }
0x28a1   : > { %4417 = vpow2.f32 %v3012_v9 }
0x28a2   : > { %v2812_v10 = vpop.xlane.xlu2 %2811 }
0x28a3   : > { %4419 = vrcp.f32 %v2812_v10 }
0x28a7   : > { %v4418_v38 = vpop.eup %4417 }
0x28a8   : > { %v3014_v11 = vsel %vm386_vm5, %v4418_v38, 0.0 }
0x28a9   : > { %v4420_v12 = vpop.eup %4419  ;;  %3015 = vadd.xlane.f32.xlu1 %v3014_v11 }
0x28aa   : > { %v2814_v13 = vmul.f32 %v4420_v12, %v4414_v1  ;;  %v2816_v14 = vpop.permute.xlu2 %2815  ;;  %v2925_v15 = vpop.xlane.xlu0 %2924  ;;  %v4305_v1 = vld [vmem:[%s5671_s4 + $0x24] ss:$0 sm:$0xff] }
0x28ab   : > { %2836 = vmatpush.msrb.mxu2 %v2816_v14  ;;  %4421 = vrcp.f32 %v2925_v15 }
0x28ac   : > { %4149 = vmatmul.msk.f32.vlgmr.msrb.gmra.mxu2 %vm386_vm5, %v2814_v13  ;;  %v4132_v13 = vld [vmem:[%s5670_s3 + $0x128] sm:$0xff] }
0x28b1   : > { %v4422_v16 = vpop.eup %4421 }
0x28b2   : > { %v2927_v17 = vmul.f32 %v4422_v16, %v4416_v4  ;;  %v4131_v16 = vld [vmem:[%s5670_s3 + $0x120] sm:$0xff] }
0x28bd   : > { %v2929_v18 = vpop.permute.xlu0 %2928 }
0x28be   : > { %2949 = vmatpush.msra.mxu2 %v2929_v18  ;;  %v4130_v18 = vld [vmem:[%s5670_s3 + $0x118] sm:$0xff] }
0x28bf   : > { %4154 = vmatmul.msk.f32.vlgmr.msra.gmra.mxu2 %vm386_vm5, %v2927_v17 }
0x28c0   : > { %3063 = vmatpush.msrb.mxu2 %v4122_v35 }
0x28c2   : > { %3019 = vrot.lane.b32.xlu1 %v5301_v22, %s5716_s20 }
0x291c   : > { %v3016_v40 = vpop.xlane.xlu1 %3015 }
0x291d   : > { %4423 = vrcp.f32 %v3016_v40  ;;  %v4129_v40 = vld [vmem:[%s5670_s3 + $0x110] sm:$0xff] }
0x2923   : > { %v4424_v26 = vpop.eup %4423 }
0x2924   : > { %v3018_v31 = vmul.f32 %v4424_v26, %v4418_v38  ;;  %v4133_v38 = vld [vmem:[%s5670_s3 + $0x130] sm:$0xff]  ;;  %v4128_v26 = vld [vmem:[%s5670_s3 + $0x108] sm:$0xff] }
0x2925   : > { %3189 = vmatpush.msrb.mxu3 %v4133_v38 }
0x2927   : > { %3190 = vmatpush.msrb.mxu3 %v4132_v13 }
0x2929   : > { %3191 = vmatpush.msrb.mxu3 %v4131_v16 }
0x292b   : > { %3192 = vmatpush.msrb.mxu3 %v4130_v18  ;;  %v4309_v18 = vld [vmem:[%s5671_s4 + $0x28] ss:$0 sm:$0xff] }
0x292d   : > { %3193 = vmatpush.msrb.mxu3 %v4129_v40  ;;  %v4167_v40 = vld [vmem:[%s5669_s2 + $0x1e8] sm:$0xff] }
0x292f   : > { %v2838_v24 = vpop.f32.mrf.mxu2  ;;  %3194 = vmatpush.msrb.mxu3 %v4128_v26 }
0x2930   : > { %4150 = vmatmul.msk.f32.vlgmr.msrb.gmra.mxu1 %vm386_vm5, %v2838_v24 }
0x2931   : > { %3122 = vmatpush.msrb.mxu1 %v4126_v51 }
0x2934   : > { %v3020_v33 = vpop.permute.xlu1 %3019 }
0x2935   : > { %3040 = vmatpush.msra.mxu0 %v3020_v33  ;;  %v4127_v33 = vld [vmem:[%s5670_s3 + $0x100] sm:$0xff] }
0x2936   : > { %4158 = vmatmul.msk.f32.vlgmr.msra.gmra.mxu0 %vm386_vm5, %v3018_v31  ;;  %3195 = vmatpush.msrb.mxu3 %v4127_v33 }
0x2938   : > { %3462 = vmatpush.msra.mxu3 %v4167_v40 }
0x2942   : > { %v2951_v22 = vpop.f32.mrf.mxu2 }
0x2943   : > { %4155 = vmatmul.msk.f32.vlgmr.msra.gmra.mxu1 %vm386_vm5, %v2951_v22 }
0x29ad   : > { %v2861_v36 = vpop.f32.mrf.mxu1 }
0x29ae   : > { %v2885_v37 = vadd.f32 %v5343_v57, %v2861_v36 }
0x29b3   : > { %v3042_v27 = vpop.f32.mrf.mxu0 }
0x29b4   : > { %4159 = vmatmul.msk.f32.vlgmr.msrb.gmra.mxu2 %vm386_vm5, %v3042_v27 }
0x29c0   : > { %v2974_v28 = vpop.f32.mrf.mxu1 }
0x29c1   : > { %v2977_v39 = vadd.f32 %v2974_v28, %v2885_v37 }
0x2a37   : > { %v3065_v34 = vpop.f32.mrf.mxu2 }
0x2a38   : > { %v3068_v41 = vadd.f32 %v3065_v34, %v2977_v39 }
0x2a3a   : > { %v3069_v43 = vadd.f32 %v3068_v41, %v5294_v19  ;;  %v4125_v19 = vld [vmem:[%s5669_s2 + $0x1c0] sm:$0xff] }
0x2a3b   : > { %3123 = vmatpush.msrb.mxu1 %v4125_v19 }
0x2a3c   : > { %v3073_v44 = vadd.f32 %v4302_v42, %v3069_v43 }
0x2a3d   : > { %3124 = vmatpush.msrb.mxu1 %v4124_v52 }
0x2a3e   : > { %v3074_v45 = vsel %vm291_vm0, %v3073_v44, 0.0 }
0x2a3f   : > { %3075 = vadd.xlane.f32.xlu2 %v3074_v45  ;;  %3125 = vmatpush.msrb.mxu1 %v4123_v53 }
0x2ab2   : > { %v3076_v46 = vpop.xlane.xlu2 %3075 }
0x2ab3   : > { %v3077_v47 = vmul.f32 %v3076_v46, %v4632_v8 }
0x2ab5   : > { %v3078_v48 = vsub.f32 %v3073_v44, %v3077_v47 }
0x2ab7   : > { %v3079_v49 = vmul.f32 %v3078_v48, %v3078_v48 }
0x2ab9   : > { %v3080_v50 = vsel %vm291_vm0, %v3079_v49, 0.0 }
0x2aba   : > { %3081 = vadd.xlane.f32.xlu0 %v3080_v50 }
0x2b2d   : > { %v3082_v23 = vpop.xlane.xlu0 %3081 }
0x2b2e   : > { %v3083_v54 = vmul.f32 %v3082_v23, %v4632_v8 }
0x2b30   : > { %v3084_v55 = vadd.f32 1e-12, %v3083_v54 }
0x2b32   : > { %4425 = vrsqrt.f32 %v3084_v55  ;;  %vm3091_vm8 = vweird.f32 %v3084_v55 }
0x2b38   : > { %v4426_v25 = vpop.eup %4425 }
0x2b39   : > { %v3086_v56 = vmul.f32 %v4426_v25, %v3084_v55  ;;  %vm3092_vm7 = vweird.f32 %v4426_v25 }
0x2b3a   : > { %vm3093_vm9 = vmor %vm3091_vm8, %vm3092_vm7 }
0x2b3b   : > { %v3087_v57 = vmul.f32 %v4426_v25, %v3086_v56 }
0x2b3d   : > { %v3088_v30 = vmul.f32 0.5, %v3087_v57 }
0x2b3f   : > { %v3089_v58 = vsub.f32 1.5, %v3088_v30 }
0x2b41   : > { %v3090_v59 = vmul.f32 %v4426_v25, %v3089_v58 }
0x2b43   : > { %v3094_v60 = vsel %vm3093_vm9, %v4426_v25, %v3090_v59  ;;  %v4306_v25 = vld [vmem:[%s5671_s4 + $0x25] ss:$0 sm:$0xff] }
0x2b44   : > { %v3095_v61 = vmul.f32 %v3094_v60, %v3078_v48 }
0x2b46   : > { %v3099_v63 = vmul.f32 %v4303_v32, %v3095_v61 }
0x2b48   : > { %v5398_v0 = vadd.f32 %v4304_v62, %v3099_v63  ;;  %v4166_v63 = vld [vmem:[%s5669_s2 + $0x228] sm:$0xff] }
0x2b49   : > { %3280 = vmatpush.msrb.mxu0 %v4166_v63 }
0x2b4a   : > { %4160 = vmatmul.msk.f32.vlgmr.msrb.gmra.mxu1 %vm291_vm0, %v5398_v0 }
0x2bc7   : > { %v3127_v2 = vpop.f32.mrf.mxu1 }
0x2bc8   : > { %v3128_v3 = vadd.f32 %v4305_v1, %v3127_v2  ;;  %v4164_v1 = vld [vmem:[%s5669_s2 + $0x1f8] sm:$0xff]  ;;  %v4163_v2 = vld [vmem:[%s5669_s2 + $0x1e0] sm:$0xff] }
0x2bca   : > { %v3131_v4 = vmul.f32 0.70710677, %v3128_v3  ;;  %v3130_v23 = vmul.f32 0.5, %v3128_v3 }
0x2bcc   : > { %v3132_v5 = vmul.f32 %v3131_v4, %v3131_v4 }
0x2bce   : > { %v3133_v6 = vmin.f32 %v3132_v5, 16.0 }
0x2bd0   : > { %v3134_v9 = vmul.f32 2.1237322e-06, %v3133_v6  ;;  %v3145_v10 = vmul.f32 3.8918573e-05, %v3133_v6 }
0x2bd2   : > { %v3135_v11 = vadd.f32 0.00028619796, %v3134_v9  ;;  %v3146_v12 = vadd.f32 0.001143296, %v3145_v10 }
0x2bd4   : > { %v3136_v14 = vmul.f32 %v3135_v11, %v3133_v6  ;;  %v3147_v15 = vmul.f32 %v3146_v12, %v3133_v6  ;;  %v4307_v12 = vld [vmem:[%s5671_s4 + $0x26] ss:$0 sm:$0xff] }
0x2bd6   : > { %v3148_v17 = vadd.f32 0.014752088, %v3147_v15  ;;  %v3137_v20 = vadd.f32 0.0036580483, %v3136_v14  ;;  %v4308_v15 = vld [vmem:[%s5671_s4 + $0x27] ss:$0 sm:$0xff] }
0x2bd8   : > { %v3149_v21 = vmul.f32 %v3148_v17, %v3133_v6  ;;  %v3138_v31 = vmul.f32 %v3137_v20, %v3133_v6 }
0x2bda   : > { %v3150_v24 = vadd.f32 0.112945676, %v3149_v21  ;;  %v3139_v27 = vadd.f32 0.05243302, %v3138_v31 }
0x2bdc   : > { %v3151_v22 = vmul.f32 %v3150_v24, %v3133_v6  ;;  %v3140_v37 = vmul.f32 %v3139_v27, %v3133_v6 }
0x2bde   : > { %v3152_v35 = vadd.f32 0.4994258, %v3151_v22  ;;  %v3141_v39 = vadd.f32 0.18741608, %v3140_v37 }
0x2be0   : > { %v3153_v36 = vmul.f32 %v3152_v35, %v3133_v6  ;;  %v3142_v41 = vmul.f32 %v3141_v39, %v3133_v6 }
0x2be2   : > { %v3154_v28 = vadd.f32 1.0, %v3153_v36  ;;  %v3143_v45 = vadd.f32 1.1283791, %v3142_v41 }
0x2be4   : > { %4427 = vrcp.f32 %v3154_v28  ;;  %v3166_v44 = vand.u32 2147483648, %v3154_v28  ;;  %v3164_v47 = vand.u32 2147483647, %v3154_v28  ;;  %vm3160_vm11 = vweird.f32 %v3154_v28 }
0x2be5   : > { %v3144_v50 = vmul.f32 %v3143_v45, %v3131_v4 }
0x2be6   : > { %v3167_v49 = vor.u32 1.1754944e-38, %v3166_v44  ;;  %vm3165_vm14 = vcmp.eq.f32.partialorder %v3164_v47, 8.507059e+37 }
0x2bea   : > { %v4428_v34 = vpop.eup %4427 }
0x2beb   : > { %v3156_v42 = vmul.f32 %v4428_v34, %v3154_v28  ;;  %vm3161_vm10 = vweird.f32 %v4428_v34 }
0x2bec   : > { %vm3162_vm12 = vmor %vm3160_vm11, %vm3161_vm10 }
0x2bed   : > { %v3157_v43 = vsub.f32 1.0, %v3156_v42 }
0x2bef   : > { %v3158_v46 = vmul.f32 %v4428_v34, %v3157_v43 }
0x2bf1   : > { %v3159_v48 = vadd.f32 %v4428_v34, %v3158_v46 }
0x2bf3   : > { %v3163_v51 = vsel %vm3162_vm12, %v4428_v34, %v3159_v48 }
0x2bf4   : > { %v3168_v19 = vsel %vm3165_vm14, %v3167_v49, %v3163_v51 }
0x2bf5   : > { %v3169_v52 = vmul.f32 %v3168_v19, %v3144_v50 }
0x2bf7   : > { %v4161_v53 = vclamps-f32 %v3169_v52, 1.0 }
0x2bf9   : > { %v3172_v54 = vadd.f32 1.0, %v4161_v53 }
0x2bfb   : > { %v3173_v55 = vmul.f32 %v3172_v54, %v3130_v23 }
0x2bfd   : > { %4162 = vmatmul.msk.f32.vlgmr.msrb.gmra.mxu3 %vm856_vm13, %v3173_v55 }
0x2c80   : > { %v3197_v56 = vpop.f32.mrf.mxu3 }
0x2c81   : > { %v3198_v57 = vadd.f32 %v4306_v25, %v3197_v56 }
0x2c83   : > { %v3200_v30 = vadd.f32 %v3198_v57, %v5398_v0  ;;  %v4165_v0 = vld [vmem:[%s5669_s2 + $0x210] sm:$0xff] }
0x2c84   : > { %3281 = vmatpush.msrb.mxu0 %v4165_v0 }
0x2c85   : > { %v3201_v58 = vsel %vm291_vm0, %v3200_v30, 0.0 }
0x2c86   : > { %3202 = vadd.xlane.f32.xlu1 %v3201_v58  ;;  %3282 = vmatpush.msrb.mxu0 %v4164_v1 }
0x2c88   : > { %3283 = vmatpush.msrb.mxu0 %v4163_v2 }
0x2cf9   : > { %v3203_v59 = vpop.xlane.xlu1 %3202 }
0x2cfa   : > { %v3204_v32 = vmul.f32 %v3203_v59, %v4632_v8 }
0x2cfc   : > { %v3205_v60 = vsub.f32 %v3200_v30, %v3204_v32 }
0x2cfe   : > { %v3206_v61 = vmul.f32 %v3205_v60, %v3205_v60 }
0x2d00   : > { %v3207_v62 = vsel %vm291_vm0, %v3206_v61, 0.0 }
0x2d01   : > { %3208 = vadd.xlane.f32.xlu2 %v3207_v62 }
0x2d74   : > { %v3209_v3 = vpop.xlane.xlu2 %3208 }
0x2d75   : > { %v3210_v4 = vmul.f32 %v3209_v3, %v4632_v8 }
0x2d77   : > { %v3211_v5 = vadd.f32 1e-12, %v3210_v4 }
0x2d79   : > { %4429 = vrsqrt.f32 %v3211_v5  ;;  %vm3218_vm1 = vweird.f32 %v3211_v5 }
0x2d7f   : > { %v4430_v6 = vpop.eup %4429 }
0x2d80   : > { %v3213_v7 = vmul.f32 %v4430_v6, %v3211_v5  ;;  %vm3219_vm15 = vweird.f32 %v4430_v6 }
0x2d81   : > { %vm3220_vm2 = vmor %vm3218_vm1, %vm3219_vm15 }
0x2d82   : > { %v3214_v9 = vmul.f32 %v4430_v6, %v3213_v7 }
0x2d84   : > { %v3215_v10 = vmul.f32 0.5, %v3214_v9 }
0x2d86   : > { %v3216_v38 = vsub.f32 1.5, %v3215_v10 }
0x2d88   : > { %v3217_v11 = vmul.f32 %v4430_v6, %v3216_v38 }
0x2d8a   : > { %v3221_v13 = vsel %vm3220_vm2, %v4430_v6, %v3217_v11 }
0x2d8b   : > { %v3222_v14 = vmul.f32 %v3221_v13, %v3205_v60 }
0x2d8d   : > { %v3226_v16 = vmul.f32 %v4307_v12, %v3222_v14 }
0x2d8f   : > { %v5456_v17 = vadd.f32 %v4308_v15, %v3226_v16  ;;  %v4168_v16 = vld [vmem:[%s5669_s2 + $0x200] sm:$0xff] }
0x2d91   : > { %4191 = vmatmul.msk.f32.vlgmr.msrb.gmra.mxu0 %vm291_vm0, %v5456_v17 }
0x2e0e   : > { %v3285_v20 = vpop.f32.mrf.mxu0 }
0x2e0f   : > { %v5463_v21 = vadd.f32 %v4309_v18, %v3285_v20  ;;  %v4169_v20 = vld [vmem:[%s5669_s2 + $0x218] sm:$0xff] }
0x2e11   : > { %3289 = vrot.lane.b32.xlu0 %v5463_v21, %s5717_s18 }
0x2e19   : > { %3354 = vrot.lane.b32.xlu0 %v5463_v21, %s5718_s8 }
0x2e21   : > { %3560 = vrot.lane.b32.xlu0 %v5463_v21, %s5711_s19 }
0x2e29   : > { %3558 = vrot.lane.b32.xlu0 %v5463_v21, %s5712_s21 }
0x2e83   : > { %v3290_v24 = vpop.permute.xlu0 %3289 }
0x2e84   : > { %4192 = vmatpush.xpose.msk.msra.mxu2 %vm386_vm5, %v3290_v24 }
0x2e87   : > { %4193 = vmatmul.msk.f32.vlgmr.msra.gmra.mxu2 %vm386_vm5, %v5463_v21 }
0x2e8b   : > { %v3355_v26 = vpop.permute.xlu0 %3354 }
0x2e93   : > { %v3561_v31 = vpop.permute.xlu0 %3560 }
0x2e94   : > { %4204 = vmatpush.xpose.msk.msrb.mxu3 %vm386_vm5, %v3561_v31 }
0x2e9b   : > { %v3559_v49 = vpop.permute.xlu0 %3558 }
0x2f0a   : > { %v3312_v33 = vpop.f32.mrf.mxu2 }
0x2f0b   : > { %v3315_v22 = vmul.f32 0.35355338, %v3312_v33  ;;  %v4170_v33 = vld [vmem:[%s5669_s2 + $0x230] sm:$0xff] }
0x2f0d   : > { %v3316_v35 = vadd.f32 %v5313_v29, %v3315_v22 }
0x2f0f   : > { %v3317_v27 = vsel %vm386_vm5, %v3316_v35, -inf }
0x2f10   : > { %3318 = vmax.xlane.f32.xlu2 %v3317_v27 }
0x2f28   : > { %3328 = vrot.lane.b32.xlu2 %v5463_v21, %s5719_s0 }
0x2f30   : > { %3469 = vrot.lane.b32.xlu2 %v5463_v21, %s5713_s29  ;;  %s278_s29 = sand.u32 1, %s4511_s25  }
0x2f31   : > { %s279_s0 = scalar_lea.vmem [#allocation2], %s278_s29  ;;  %s3870_s10 = scalar_lea.sflag [#allocation3], %s278_s29 }
0x2f83   : > { %v3319_v36 = vpop.xlane.xlu2 %3318 }
0x2f84   : > { %v3320_v28 = vsub.f32 %v3316_v35, %v3319_v36 }
0x2f86   : > { %v3321_v37 = vmul.f32 1.442695, %v3320_v28 }
0x2f88   : > { %4431 = vpow2.f32 %v3321_v37 }
0x2f8b   : > { %v3329_v39 = vpop.permute.xlu2 %3328 }
0x2f8c   : > { %3349 = vmatpush.msra.mxu1 %v3329_v39 }
0x2f8e   : > { %v4432_v34 = vpop.eup %4431  ;;  %3439 = vmatpush.msrb.mxu1 %v4168_v16 }
0x2f8f   : > { %v3323_v41 = vsel %vm386_vm5, %v4432_v34, 0.0 }
0x2f90   : > { %3324 = vadd.xlane.f32.xlu1 %v3323_v41 }
0x2f93   : > { %v3470_v46 = vpop.permute.xlu2 %3469 }
0x2fa9   : > { %3356 = vrot.lane.b32.xlu1 %v5463_v21, %s5720_s23  ;;  %s3880_s23 = sshll.u32 %s279_s0, 4  ;;  %s3881_s23 = int_to_ptr.vmem [resolvable:$true] %s3880_s23 }
0x2fb1   : > { %3467 = vrot.lane.b32.xlu1 %v5463_v21, %s5721_s22 }
0x3003   : > { %v3325_v42 = vpop.xlane.xlu1 %3324 }
0x3004   : > { %4433 = vrcp.f32 %v3325_v42 }
0x300a   : > { %v4434_v43 = vpop.eup %4433 }
0x300b   : > { %v3327_v44 = vmul.f32 %v4434_v43, %v4432_v34  ;;  %v4310_v34 = vld [vmem:[%s5671_s4 + $0x29] ss:$0 sm:$0xff] }
0x300d   : > { %4194 = vmatmul.msk.f32.vlgmr.msra.gmra.mxu1 %vm386_vm5, %v3327_v44 }
0x300e   : > { %3552 = vmatpush.msra.mxu1 %v4169_v20 }
0x301b   : > { %v3357_v45 = vpop.permute.xlu1 %3356 }
0x301c   : > { %4195 = vmatpush.xpose.msk.msra.mxu0 %vm386_vm5, %v3357_v45 }
0x301f   : > { %4196 = vmatmul.msk.f32.vlgmr.msra.gmra.mxu0 %vm386_vm5, %v3355_v26 }
0x3020   : > { %4200 = vmatpush.xpose.msk.msrb.mxu0 %vm386_vm5, %v3470_v46 }
0x3023   : > { %v3468_v47 = vpop.permute.xlu1 %3467 }
0x3027   : > { %4201 = vmatmul.msk.f32.vlgmr.msrb.gmra.mxu0 %vm386_vm5, %v3468_v47 }
0x308a   : > { %v3351_v48 = vpop.f32.mrf.mxu1 }
0x308b   : > { %4199 = vmatmul.msk.f32.vlgmr.msra.gmra.mxu3 %vm386_vm5, %v3351_v48 }
0x3093   : > { %4205 = vmatmul.msk.f32.vlgmr.msrb.gmra.mxu3 %vm386_vm5, %v3559_v49  ;;  %v4174_v49 = vld [vmem:[%s5669_s2 + $0x238] sm:$0xff] }
0x309c   : > { %v3379_v50 = vpop.f32.mrf.mxu0 }
0x309d   : > { %v3382_v51 = vmul.f32 0.35355338, %v3379_v50  ;;  %v4172_v50 = vld [vmem:[%s5669_s2 + $0x208] sm:$0xff] }
0x309f   : > { %v3383_v19 = vadd.f32 %v5313_v29, %v3382_v51  ;;  %v4171_v51 = vld [vmem:[%s5669_s2 + $0x1f0] sm:$0xff] }
0x30a1   : > { %v3384_v52 = vsel %vm386_vm5, %v3383_v19, -inf }
0x30a2   : > { %3385 = vmax.xlane.f32.xlu0 %v3384_v52 }
0x30a4   : > { %v3492_v53 = vpop.f32.mrf.mxu0 }
0x30a5   : > { %v3495_v23 = vmul.f32 0.35355338, %v3492_v53 }
0x30a7   : > { %v3496_v54 = vadd.f32 %v5313_v29, %v3495_v23 }
0x30a9   : > { %v3497_v55 = vsel %vm386_vm5, %v3496_v54, -inf }
0x30aa   : > { %3498 = vmax.xlane.f32.xlu2 %v3497_v55 }
0x310e   : > { %v5502_v25 = vpop.f32.mrf.mxu3 }
0x3115   : > { %v3386_v56 = vpop.xlane.xlu0 %3385 }
0x3116   : > { %v3387_v57 = vsub.f32 %v3383_v19, %v3386_v56  ;;  %v3583_v30 = vpop.f32.mrf.mxu3 }
0x3117   : > { %v3586_v58 = vmul.f32 0.35355338, %v3583_v30  ;;  %v4311_v30 = vld [vmem:[%s5671_s4 + $0x2a] ss:$0 sm:$0xff] }
0x3118   : > { %v3388_v59 = vmul.f32 1.442695, %v3387_v57 }
0x3119   : > { %v3587_v32 = vadd.f32 %v5313_v29, %v3586_v58 }
0x311a   : > { %4435 = vpow2.f32 %v3388_v59 }
0x311b   : > { %v3588_v60 = vsel %vm386_vm5, %v3587_v32, -inf }
0x311c   : > { %3589 = vmax.xlane.f32.xlu1 %v3588_v60 }
0x311d   : > { %v3499_v61 = vpop.xlane.xlu2 %3498 }
0x311e   : > { %v3500_v62 = vsub.f32 %v3496_v54, %v3499_v61 }
0x3120   : > { %v4436_v63 = vpop.eup %4435  ;;  %v3501_v0 = vmul.f32 1.442695, %v3500_v62  ;;  %v4313_v62 = vld [vmem:[%s5671_s4 + $0x2c] ss:$0 sm:$0xff] }
0x3121   : > { %v3390_v1 = vsel %vm386_vm5, %v4436_v63, 0.0 }
0x3122   : > { %4437 = vpow2.f32 %v3501_v0  ;;  %3391 = vadd.xlane.f32.xlu2 %v3390_v1 }
0x3128   : > { %v4438_v2 = vpop.eup %4437 }
0x3129   : > { %v3503_v3 = vsel %vm386_vm5, %v4438_v2, 0.0 }
0x312a   : > { %3504 = vadd.xlane.f32.xlu0 %v3503_v3 }
0x3135   : > { %3395 = vrot.lane.b32.xlu1 %v5463_v21, %s5714_s14 }
0x313e   : > { %3508 = vrot.lane.b32.xlu0 %v5463_v21, %s5715_s16 }
0x318f   : > { %v3590_v29 = vpop.xlane.xlu1 %3589 }
0x3190   : > { %v3591_v4 = vsub.f32 %v3587_v32, %v3590_v29  ;;  %v4312_v32 = vld [vmem:[%s5671_s4 + $0x2b] ss:$0 sm:$0xff]  ;;  %v4182_v29 = vld [vmem:[%s5670_s3 + $0x178] sm:$0xff] }
0x3191   : > { %3768 = vmatpush.msra.mxu3 %v4182_v29 }
0x3192   : > { %v3592_v5 = vmul.f32 1.442695, %v3591_v4 }
0x3194   : > { %4439 = vpow2.f32 %v3592_v5 }
0x3195   : > { %v3392_v7 = vpop.xlane.xlu2 %3391 }
0x3196   : > { %4441 = vrcp.f32 %v3392_v7 }
0x319a   : > { %v4440_v6 = vpop.eup %4439 }
0x319b   : > { %v3594_v9 = vsel %vm386_vm5, %v4440_v6, 0.0 }
0x319c   : > { %3595 = vadd.xlane.f32.xlu2 %v3594_v9  ;;  %v4442_v10 = vpop.eup %4441 }
0x319d   : > { %v3505_v38 = vpop.xlane.xlu0 %3504  ;;  %v3394_v11 = vmul.f32 %v4442_v10, %v4436_v63  ;;  %v4180_v10 = vld [vmem:[%s5670_s3 + $0x168] sm:$0xff] }
0x319e   : > { %4443 = vrcp.f32 %v3505_v38 }
0x31a4   : > { %v4444_v13 = vpop.eup %4443 }
0x31a5   : > { %v3507_v14 = vmul.f32 %v4444_v13, %v4438_v2 }
0x31a7   : > { %v3396_v12 = vpop.permute.xlu1 %3395 }
0x31a8   : > { %3416 = vmatpush.msrb.mxu2 %v3396_v12  ;;  %v4179_v12 = vld [vmem:[%s5670_s3 + $0x160] sm:$0xff] }
0x31a9   : > { %4197 = vmatmul.msk.f32.vlgmr.msrb.gmra.mxu2 %vm386_vm5, %v3394_v11 }
0x31b0   : > { %v3509_v15 = vpop.permute.xlu0 %3508 }
0x31b1   : > { %3529 = vmatpush.msra.mxu2 %v3509_v15 }
0x31b2   : > { %4202 = vmatmul.msk.f32.vlgmr.msra.gmra.mxu2 %vm386_vm5, %v3507_v14  ;;  %v4178_v14 = vld [vmem:[%s5670_s3 + $0x158] sm:$0xff] }
0x31b3   : > { %3643 = vmatpush.msrb.mxu2 %v4170_v33 }
0x31b4   : > { %3599 = vrot.lane.b32.xlu2 %v5463_v21, %s5716_s20  ;;  %s3878_s20 = scalar_lea.hbm %s5674_s7, %s4594_s28 }
0x31b5   : > { %s3882_s22 = sshll.u32 %s3878_s20, 4  ;;  %s3883_s22 = int_to_ptr.hbm [resolvable:$true] %s3882_s22 }
0x31b6   : > { %s4471_s30 = sshra.s32 %s3883_s22, 4  ;;  %s4472_s30 = int_to_ptr.hbm [resolvable:$true] %s4471_s30 }
0x31b7   : > { %s4473_s12 = scalar_lea.hbm %s4472_s30, 1  ;;  %p4478_p0 = scmp.lt.s32.totalorder %s4472_s30, %s5674_s7 }
0x31b8   : > { %p4474_p11 = scmp.ne.s32.totalorder %s4472_s30, %s4473_s12  ;;  %p4479_p1 = scmp.lt.s32.totalorder %s4477_s9, %s4473_s12 }
0x31ba   : > { %p4475_p12 = pnand %p4474_p11, %p4611_p5  ;;  %p4480_p2 = por %p4479_p1, %p4478_p0 }
0x31bc   : > { %p4476_p13 = pneg %p4475_p12 }
0x31be   : > { %p4481_p3 = pnand %p4480_p2, %p4476_p13 }
0x320f   : > { %v3596_v18 = vpop.xlane.xlu2 %3595 }
0x3210   : > { %4445 = vrcp.f32 %v3596_v18  ;;  %v4177_v18 = vld [vmem:[%s5670_s3 + $0x150] sm:$0xff] }
0x3216   : > { %v4446_v40 = vpop.eup %4445 }
0x3217   : > { %v3598_v24 = vmul.f32 %v4446_v40, %v4440_v6  ;;  %v3600_v26 = vpop.permute.xlu2 %3599  ;;  %v4181_v6 = vld [vmem:[%s5670_s3 + $0x170] sm:$0xff]  ;;  %v4176_v40 = vld [vmem:[%s5670_s3 + $0x148] sm:$0xff] }
0x3218   : > { %3620 = vmatpush.msra.mxu0 %v3600_v26  ;;  %3769 = vmatpush.msra.mxu3 %v4181_v6  ;;  %v4175_v26 = vld [vmem:[%s5670_s3 + $0x140] sm:$0xff] }
0x3219   : > { %4206 = vmatmul.msk.f32.vlgmr.msra.gmra.mxu0 %vm386_vm5, %v3598_v24 }
0x321a   : > { %3770 = vmatpush.msra.mxu3 %v4180_v10 }
0x321c   : > { %3771 = vmatpush.msra.mxu3 %v4179_v12  ;;  %v3818_v12 = vld [vmem:[%s5672_s5 + $0x38] sm:$0xff] }
0x321d   : > { %3860 = vmatpush.msra.mxu2 %v3818_v12 }
0x321e   : > { %3772 = vmatpush.msra.mxu3 %v4178_v14  ;;  %v3816_v14 = vld [vmem:[%s5672_s5 + $0x18] sm:$0xff] }
0x3220   : > { %3773 = vmatpush.msra.mxu3 %v4177_v18 }
0x3222   : > { %3774 = vmatpush.msra.mxu3 %v4176_v40 }
0x3224   : > { %3775 = vmatpush.msra.mxu3 %v4175_v26 }
0x322c   : > { %v3418_v31 = vpop.f32.mrf.mxu2 }
0x322d   : > { %4198 = vmatmul.msk.f32.vlgmr.msrb.gmra.mxu1 %vm386_vm5, %v3418_v31 }
0x322e   : > { %3702 = vmatpush.msrb.mxu1 %v4174_v49 }
0x3235   : > { %v3531_v21 = vpop.f32.mrf.mxu2 }
0x3236   : > { %4203 = vmatmul.msk.f32.vlgmr.msra.gmra.mxu1 %vm386_vm5, %v3531_v21 }
0x3296   : > { %v3622_v22 = vpop.f32.mrf.mxu0 }
0x3297   : > { %4207 = vmatmul.msk.f32.vlgmr.msrb.gmra.mxu2 %vm386_vm5, %v3622_v22 }
0x32aa   : > { %v3441_v35 = vpop.f32.mrf.mxu1 }
0x32ab   : > { %v3465_v36 = vadd.f32 %v5502_v25, %v3441_v35 }
0x32b3   : > { %v3554_v27 = vpop.f32.mrf.mxu1 }
0x32b4   : > { %v3557_v28 = vadd.f32 %v3554_v27, %v3465_v36 }
0x331a   : > { %v3645_v37 = vpop.f32.mrf.mxu2 }
0x331b   : > { %v3648_v39 = vadd.f32 %v3645_v37, %v3557_v28 }
0x331d   : > { %v3649_v41 = vadd.f32 %v3648_v39, %v5456_v17  ;;  %v4173_v17 = vld [vmem:[%s5669_s2 + $0x220] sm:$0xff] }
0x331e   : > { %3703 = vmatpush.msrb.mxu1 %v4173_v17 }
0x331f   : > { %v3653_v42 = vadd.f32 %v4310_v34, %v3649_v41 }
0x3320   : > { %3704 = vmatpush.msrb.mxu1 %v4172_v50 }
0x3321   : > { %v3654_v43 = vsel %vm291_vm0, %v3653_v42, 0.0 }
0x3322   : > { %3655 = vadd.xlane.f32.xlu0 %v3654_v43  ;;  %3705 = vmatpush.msrb.mxu1 %v4171_v51 }
0x3395   : > { %v3656_v44 = vpop.xlane.xlu0 %3655 }
0x3396   : > { %v3657_v45 = vmul.f32 %v3656_v44, %v4632_v8 }
0x3398   : > { %v3658_v46 = vsub.f32 %v3653_v42, %v3657_v45 }
0x339a   : > { %v3659_v47 = vmul.f32 %v3658_v46, %v3658_v46 }
0x339c   : > { %v3660_v48 = vsel %vm291_vm0, %v3659_v47, 0.0 }
0x339d   : > { %3661 = vadd.xlane.f32.xlu1 %v3660_v48 }
0x3410   : > { %v3662_v19 = vpop.xlane.xlu1 %3661 }
0x3411   : > { %v3663_v52 = vmul.f32 %v3662_v19, %v4632_v8 }
0x3413   : > { %v3664_v53 = vadd.f32 1e-12, %v3663_v52 }
0x3415   : > { %4447 = vrsqrt.f32 %v3664_v53  ;;  %vm3671_vm3 = vweird.f32 %v3664_v53 }
0x341b   : > { %v4448_v23 = vpop.eup %4447 }
0x341c   : > { %v3666_v54 = vmul.f32 %v4448_v23, %v3664_v53  ;;  %vm3672_vm5 = vweird.f32 %v4448_v23  ;;  %v4314_v53 = vld [vmem:[%s5671_s4 + $0x2d] ss:$0 sm:$0xff] }
0x341d   : > { %vm3673_vm4 = vmor %vm3671_vm3, %vm3672_vm5 }
0x341e   : > { %v3667_v55 = vmul.f32 %v4448_v23, %v3666_v54 }
0x3420   : > { %v3668_v25 = vmul.f32 0.5, %v3667_v55 }
0x3422   : > { %v3669_v56 = vsub.f32 1.5, %v3668_v25 }
0x3424   : > { %v3670_v57 = vmul.f32 %v4448_v23, %v3669_v56 }
0x3426   : > { %v3674_v58 = vsel %vm3673_vm4, %v4448_v23, %v3670_v57 }
0x3427   : > { %v3675_v59 = vmul.f32 %v3674_v58, %v3658_v46 }
0x3429   : > { %v3679_v60 = vmul.f32 %v4311_v30, %v3675_v59 }
0x342b   : > { %v5557_v61 = vadd.f32 %v4312_v32, %v3679_v60  ;;  %v3814_v32 = vld [vmem:[%s5672_s5 + $0x30] sm:$0xff]  ;;  %v3813_v60 = vld [vmem:[%s5672_s5 + $0x20] sm:$0xff] }
0x342c   : > { %3836 = vmatpush.msrb.mxu0 %v3814_v32 }
0x342d   : > { %4208 = vmatmul.msk.f32.vlgmr.msrb.gmra.mxu1 %vm291_vm0, %v5557_v61 }
0x342e   : > { %3837 = vmatpush.msrb.mxu0 %v3813_v60 }
0x34aa   : > { %v3707_v63 = vpop.f32.mrf.mxu1 }
0x34ab   : > { %v3708_v0 = vadd.f32 %v4313_v62, %v3707_v63  ;;  %v3811_v62 = vld [vmem:[%s5672_s5] sm:$0xff] }
0x34ad   : > { %v3711_v1 = vmul.f32 0.70710677, %v3708_v0  ;;  %v3710_v51 = vmul.f32 0.5, %v3708_v0 }
0x34af   : > { %v3712_v2 = vmul.f32 %v3711_v1, %v3711_v1 }
0x34b1   : > { %v3713_v3 = vmin.f32 %v3712_v2, 16.0 }
0x34b3   : > { %v3714_v4 = vmul.f32 2.1237322e-06, %v3713_v3  ;;  %v3725_v5 = vmul.f32 3.8918573e-05, %v3713_v3 }
0x34b5   : > { %v3715_v7 = vadd.f32 0.00028619796, %v3714_v4  ;;  %v3726_v9 = vadd.f32 0.001143296, %v3725_v5 }
0x34b7   : > { %v3716_v38 = vmul.f32 %v3715_v7, %v3713_v3  ;;  %v3727_v11 = vmul.f32 %v3726_v9, %v3713_v3  ;;  %v4315_v7 = vld [vmem:[%s5671_s4 + $0x2e] ss:$0 sm:$0xff] }
0x34b9   : > { %v3728_v13 = vadd.f32 0.014752088, %v3727_v11  ;;  %v3717_v15 = vadd.f32 0.0036580483, %v3716_v38 }
0x34bb   : > { %v3729_v16 = vmul.f32 %v3728_v13, %v3713_v3  ;;  %v3718_v24 = vmul.f32 %v3717_v15, %v3713_v3  ;;  %v3817_v13 = vld [vmem:[%s5672_s5 + $0x28] sm:$0xff] }
0x34bc   : > { %3861 = vmatpush.msra.mxu2 %v3817_v13  ;;  %v3815_v15 = vld [vmem:[%s5672_s5 + $0x8] sm:$0xff] }
0x34bd   : > { %v3730_v20 = vadd.f32 0.112945676, %v3729_v16  ;;  %v3719_v33 = vadd.f32 0.05243302, %v3718_v24  ;;  %v3819_v16 = vld [vmem:[%s5673_s6] sm:$0x1] }
0x34be   : > { %3862 = vmatpush.msra.mxu2 %v3816_v14  ;;  %v3820_v24 = vld [vmem:[%s5673_s6 + $0x1] sm:$0x1] }
0x34bf   : > { %v3731_v31 = vmul.f32 %v3730_v20, %v3713_v3  ;;  %v3720_v27 = vmul.f32 %v3719_v33, %v3713_v3 }
0x34c0   : > { %3863 = vmatpush.msra.mxu2 %v3815_v15 }
0x34c1   : > { %v3732_v21 = vadd.f32 0.4994258, %v3731_v31  ;;  %v3721_v36 = vadd.f32 0.18741608, %v3720_v27 }
0x34c3   : > { %v3733_v22 = vmul.f32 %v3732_v21, %v3713_v3  ;;  %v3722_v37 = vmul.f32 %v3721_v36, %v3713_v3 }
0x34c5   : > { %v3734_v35 = vadd.f32 1.0, %v3733_v22  ;;  %v3723_v42 = vadd.f32 1.1283791, %v3722_v37 }
0x34c7   : > { %4449 = vrcp.f32 %v3734_v35  ;;  %v3746_v41 = vand.u32 2147483648, %v3734_v35  ;;  %v3744_v44 = vand.u32 2147483647, %v3734_v35  ;;  %vm3740_vm7 = vweird.f32 %v3734_v35 }
0x34c8   : > { %v3724_v47 = vmul.f32 %v3723_v42, %v3711_v1 }
0x34c9   : > { %v3747_v46 = vor.u32 1.1754944e-38, %v3746_v41  ;;  %vm3745_vm9 = vcmp.eq.f32.partialorder %v3744_v44, 8.507059e+37 }
0x34cd   : > { %v4450_v28 = vpop.eup %4449 }
0x34ce   : > { %v3736_v39 = vmul.f32 %v4450_v28, %v3734_v35  ;;  %vm3741_vm6 = vweird.f32 %v4450_v28 }
0x34cf   : > { %vm3742_vm8 = vmor %vm3740_vm7, %vm3741_vm6 }
0x34d0   : > { %v3737_v34 = vsub.f32 1.0, %v3736_v39 }
0x34d2   : > { %v3738_v43 = vmul.f32 %v4450_v28, %v3737_v34 }
0x34d4   : > { %v3739_v45 = vadd.f32 %v4450_v28, %v3738_v43 }
0x34d6   : > { %v3743_v48 = vsel %vm3742_vm8, %v4450_v28, %v3739_v45 }
0x34d7   : > { %v3748_v49 = vsel %vm3745_vm9, %v3747_v46, %v3743_v48 }
0x34d8   : > { %v3749_v17 = vmul.f32 %v3748_v49, %v3724_v47 }
0x34da   : > { %v4209_v50 = vclamps-f32 %v3749_v17, 1.0 }
0x34dc   : > { %v3752_v19 = vadd.f32 1.0, %v4209_v50 }
0x34de   : > { %v3753_v52 = vmul.f32 %v3752_v19, %v3710_v51 }
0x34e0   : > { %4210 = vmatmul.msk.f32.vlgmr.msra.gmra.mxu3 %vm856_vm13, %v3753_v52 }
0x3563   : > { %v3777_v23 = vpop.f32.mrf.mxu3 }
0x3564   : > { %v3778_v54 = vadd.f32 %v4314_v53, %v3777_v23 }
0x3566   : > { %v3780_v55 = vadd.f32 %v3778_v54, %v5557_v61  ;;  %v3812_v61 = vld [vmem:[%s5672_s5 + $0x10] sm:$0xff] }
0x3567   : > { %3838 = vmatpush.msrb.mxu0 %v3812_v61 }
0x3568   : > { %v3781_v25 = vsel %vm291_vm0, %v3780_v55, 0.0 }
0x3569   : > { %3782 = vadd.xlane.f32.xlu2 %v3781_v25  ;;  %3839 = vmatpush.msrb.mxu0 %v3811_v62 }
0x35dc   : > { %v3783_v56 = vpop.xlane.xlu2 %3782 }
0x35dd   : > { %v3784_v57 = vmul.f32 %v3783_v56, %v4632_v8 }
0x35df   : > { %v3785_v30 = vsub.f32 %v3780_v55, %v3784_v57 }
0x35e1   : > { %v3786_v58 = vmul.f32 %v3785_v30, %v3785_v30 }
0x35e3   : > { %v3787_v59 = vsel %vm291_vm0, %v3786_v58, 0.0 }
0x35e4   : > { %3788 = vadd.xlane.f32.xlu0 %v3787_v59 }
0x3657   : > { %v3789_v63 = vpop.xlane.xlu0 %3788 }
0x3658   : > { %v3790_v0 = vmul.f32 %v3789_v63, %v4632_v8  ;;  %v4316_v8 = vld [vmem:[%s5671_s4 + $0x2f] ss:$0 sm:$0xff] }
0x365a   : > { %v3791_v1 = vadd.f32 1e-12, %v3790_v0 }
0x365c   : > { %4451 = vrsqrt.f32 %v3791_v1  ;;  %vm3798_vm10 = vweird.f32 %v3791_v1 }
0x3662   : > { %v4452_v2 = vpop.eup %4451 }
0x3663   : > { %v3793_v3 = vmul.f32 %v4452_v2, %v3791_v1  ;;  %vm3799_vm13 = vweird.f32 %v4452_v2 }
0x3664   : > { %vm3800_vm11 = vmor %vm3798_vm10, %vm3799_vm13 }
0x3665   : > { %v3794_v29 = vmul.f32 %v4452_v2, %v3793_v3 }
0x3667   : > { %v3795_v4 = vmul.f32 0.5, %v3794_v29 }
0x3669   : > { %v3796_v5 = vsub.f32 1.5, %v3795_v4 }
0x366b   : > { %v3797_v6 = vmul.f32 %v4452_v2, %v3796_v5 }
0x366d   : > { %v3801_v9 = vsel %vm3800_vm11, %v4452_v2, %v3797_v6 }
0x366e   : > { %v3802_v10 = vmul.f32 %v3801_v9, %v3785_v30 }
0x3670   : > { %v3806_v38 = vmul.f32 %v4315_v7, %v3802_v10 }
0x3672   : > { %v3810_v11 = vadd.f32 %v4316_v8, %v3806_v38 }
0x3674   : > { %4211 = vmatmul.msk.f32.vlgmr.msrb.gmra.mxu0 %vm291_vm0, %v3810_v11 }
0x36f1   : > { %v3841_v18 = vpop.f32.mrf.mxu0 }
0x36f2   : > { %v3842_v20 = vadd.f32 %v3841_v18, %v3819_v16 }
0x36f4   : > { %4453 = vtanh.f32 %v3842_v20 }
0x36fa   : > { %v4454_v40 = vpop.eup %4453 }
0x36fb   : > { %4212 = vmatmul.msk.f32.vlgmr.msra.gmra.mxu2 %vm291_vm0, %v4454_v40 }
0x377e   : > { %v3865_v26 = vpop.f32.mrf.mxu2 }
0x377f   : > { %v3866_v31 = vadd.f32 %v3865_v26, %v3820_v24 }
0x3781   : > { %3868 = vst [vmem:[%s279_s0] sm:$0x1] %v3866_v31 }
0x3782   : > { %4484 = shalt.err (!%p4481_p3)
}
0x3783   : > { %4215 = dma.vmem_to_hbm [thread:$0]  (%p4611_p5), %s3881_s23, 16, %s3883_s22, %s3870_s10  }
0x3784 PF: > { %p4221_p4 = scmp.ge.s32.totalorder %s4519_s27, 2  ;;  %s3894_s26 = sand.u32 1, %s4507_s24  }
0x3785   : > { %s3895_s19 = scalar_lea.sflag [#allocation3], %s3894_s26 }
0x3786   : > { %p4218_p7 = pnand %p4221_p4, %p4615_p6 }
0x3788   : > { %p4219_p8 = pneg %p4218_p7 }
0x378a   : > { %4502 = dma.done.wait (%p4219_p8), %s3895_s19, 16  }
0x378b   : > { %4504 = vsyncadd (%p4219_p8), %s3895_s19, 4294967280  ;;  %s5723_s27 = sld [smem:[#allocation6_spill]]  ;;  %s5726_s24 = smov %s4511_s25 }
0x378c   : > { %s5724_s21 = sld [smem:[#allocation5_spill]] }
0x378d   : > { %s5725_s26 = sld [smem:[#allocation7_spill]] }
0x3791   : > { %p17_p9 = scmp.ge.s32.totalorder %s5723_s27, 4  }
0x3792   : > { %s5727_s25 = smov %s5724_s21 }
0x3793   :  { %19 = sbr.rel (!%p17_p9) target bundleno = 6 (0x6), region = 101 }
0x3798   :  { %3900 = vsyncpa [#allocation3], 1 }
0x3799   :  { %3902 = vsyncpa [#allocation3 + $0x1], 1 }

</bundles_post_ra>
